<compile_context>
chip_gen: v5e
topology: v5e:2x2
jax: 0.10.0
libtpu: 0.0.40
codegen_flags: <defaults>
</compile_context>

<pallas_src>
import functools

import jax
import jax.numpy as jnp
from jax.experimental import pallas as pl
from jax.experimental.pallas import tpu as pltpu


def _fused_conv_bias_prelu_kernel(alpha_ref, x_ref, w_ref, b_ref, o_ref,
                                  *, H, W, C):
    """One image: out = PReLU(conv3x3(x) + b), flattened to (H*W, Cout_pad).

    alpha_ref: (1,) f32 in SMEM           (shared PReLU slope)
    x_ref:     (H+2, W+2, C) bf16         (zero-padded NHWC image, VMEM)
    w_ref:     (9, C, Cout_pad) bf16      (tap-major conv weights, resident)
    b_ref:     (1, Cout_pad) f32
    o_ref:     (H*W, Cout_pad) f32
    """
    HW, Coutp = o_ref.shape
    acc = jnp.zeros((HW, Coutp), jnp.float32)
    # 9 accumulated (H*W, C) x (C, Cout_pad) matmuls; the shifted views are
    # built from the VMEM tile (fused im2col), no patch matrix in HBM.
    for tap in range(9):
        di, dj = divmod(tap, 3)
        v = x_ref[pl.ds(di, H), pl.ds(dj, W), :]          # (H, W, C) bf16
        v = v.reshape(HW, C)                              # collapse rows
        acc = acc + jnp.dot(v, w_ref[tap],
                            preferred_element_type=jnp.float32)
    acc = acc + b_ref[...]                                # (1, Coutp) bcast
    alpha = alpha_ref[0]
    o_ref[...] = jnp.where(acc >= 0.0, acc, alpha * acc).astype(o_ref.dtype)


def upsample_block(x, weight, bias, alpha, up_scale):
    """Forward pass of UpsampleBLock.

    x:      [N, C, H, W]  float32 (NCHW, PyTorch convention)
    weight: [C*r*r, C, 3, 3]      (PyTorch Conv2d weight layout)
    bias:   [C*r*r]
    alpha:  scalar PReLU parameter (num_parameters=1)
    returns [N, C, H*r, W*r]
    """
    N, C, H, W = x.shape
    r = up_scale
    Cout = C * r * r
    Coutp = ((Cout + 127) // 128) * 128      # lane-dense output columns
    HW = H * W

    # ---- glue (single transpose + pad; bf16 on the streamed input) ----
    x_nhwc = jnp.transpose(x, (0, 2, 3, 1))                       # [N,H,W,C]
    xp = jnp.pad(x_nhwc, ((0, 0), (1, 1), (1, 1), (0, 0))).astype(jnp.bfloat16)

    # PyTorch weight [Cout, Cin, kh, kw] -> [9, Cin, Cout_pad], tap = kh*3+kw.
    w = jnp.transpose(weight, (2, 3, 1, 0)).reshape(9, C, Cout)
    w = w.astype(jnp.bfloat16)
    b_row = bias.reshape(1, Cout).astype(jnp.float32)
    if Coutp != Cout:
        w = jnp.pad(w, ((0, 0), (0, 0), (0, Coutp - Cout)))
        b_row = jnp.pad(b_row, ((0, 0), (0, Coutp - Cout)))
    alpha_arr = jnp.reshape(alpha, (1,)).astype(jnp.float32)

    # ---- VMEM budget + cost estimate ----
    in_blk = (H + 2) * (W + 2) * C * 2          # bf16 input tile
    w_blk = 9 * C * Coutp * 2                   # resident bf16 weights
    b_blk = Coutp * 4
    out_blk = HW * Coutp * 4                    # f32 output tile
    acc_blk = HW * Coutp * 4                    # f32 accumulator
    vmem_est = 2 * (in_blk + out_blk) + w_blk + b_blk + acc_blk
    vmem_limit = int(min(max(4 * vmem_est, 16 * 1024 * 1024),
                         32 * 1024 * 1024))     # valid on v5e/v6e/v7x

    flops = 2 * N * HW * (9 * C) * Coutp
    bytes_accessed = (N * (H + 2) * (W + 2) * C * 2   # padded input (bf16)
                      + 9 * C * Coutp * 2             # weights (bf16)
                      + Coutp * 4                     # bias
                      + N * HW * Coutp * 4)           # output (f32)

    kernel = functools.partial(_fused_conv_bias_prelu_kernel, H=H, W=W, C=C)

    out = pl.pallas_call(
        kernel,
        out_shape=jax.ShapeDtypeStruct((N, HW, Coutp), jnp.float32),
        grid_spec=pltpu.PrefetchScalarGridSpec(
            num_scalar_prefetch=0,
            grid=(N,),
            in_specs=[
                pl.BlockSpec(memory_space=pltpu.MemorySpace.SMEM),   # alpha
                pl.BlockSpec((pl.Squeezed(), H + 2, W + 2, C),
                             lambda n: (n, 0, 0, 0)),                # padded x
                pl.BlockSpec((9, C, Coutp), lambda n: (0, 0, 0)),    # weights
                pl.BlockSpec((1, Coutp), lambda n: (0, 0)),          # bias
            ],
            out_specs=pl.BlockSpec((pl.Squeezed(), HW, Coutp),
                                   lambda n: (n, 0, 0)),
        ),
        compiler_params=pltpu.CompilerParams(
            dimension_semantics=("parallel",),
            vmem_limit_bytes=vmem_limit),
        cost_estimate=pl.CostEstimate(flops=flops, transcendentals=0,
                                      bytes_accessed=bytes_accessed),
    )(alpha_arr, xp, w, b_row)

    # ---- glue: drop lane padding + PixelShuffle(r) -> NCHW ----
    y = out[:, :, :Cout].reshape(N, H, W, C, r, r)
    y = jnp.transpose(y, (0, 3, 1, 4, 2, 5)).reshape(N, C, H * r, W * r)
    return y


def _reference(x, weight, bias, alpha, up_scale):
    """Pure-JAX reference matching PyTorch semantics (conv->shuffle->PReLU).

    Uses the same bf16-rounded x / weight as the kernel's hot path so the
    comparison isolates kernel correctness (f32 accumulation everywhere).
    """
    N, C, H, W = x.shape
    r = up_scale
    xq = x.astype(jnp.bfloat16).astype(jnp.float32)
    wq = weight.astype(jnp.bfloat16).astype(jnp.float32)
    y = jax.lax.conv_general_dilated(
        xq, wq, window_strides=(1, 1), padding=((1, 1), (1, 1)),
        dimension_numbers=("NCHW", "OIHW", "NCHW"),
        precision=jax.lax.Precision.HIGHEST)
    y = y + bias.reshape(1, -1, 1, 1)
    y = y.reshape(N, C, r, r, H, W)
    y = jnp.transpose(y, (0, 1, 4, 2, 5, 3)).reshape(N, C, H * r, W * r)
    return jnp.where(y >= 0, y, alpha * y)


if __name__ == "__main__":
    key = jax.random.PRNGKey(0)
    k1, k2, k3 = jax.random.split(key, 3)

    N, C, H, W = 2, 4, 16, 16
    up_scale = 2
    Cout = C * up_scale ** 2

    x = jax.random.normal(k1, (N, C, H, W), dtype=jnp.float32)
    # Deterministic synthetic parameters (shapes follow nn.Conv2d / nn.PReLU).
    weight = 0.1 * jax.random.normal(k2, (Cout, C, 3, 3), dtype=jnp.float32)
    bias = 0.05 * jax.random.normal(k3, (Cout,), dtype=jnp.float32)
    alpha = jnp.float32(0.25)   # PyTorch PReLU default init

    fwd = jax.jit(upsample_block, static_argnames=("up_scale",))
    y = fwd(x, weight, bias, alpha, up_scale=up_scale)
    y = jax.block_until_ready(y)

    y_ref = _reference(x, weight, bias, alpha, up_scale)
    assert y.shape == (N, C, H * up_scale, W * up_scale)
    assert jnp.allclose(y, y_ref, atol=2e-4, rtol=2e-4), \
        float(jnp.max(jnp.abs(y - y_ref)))

    print("KERNEL_OK")
</pallas_src>

<mosaic_0001>
module attributes {stable_mosaic.version = 11 : i64} {
  func.func @_fused_conv_bias_prelu_kernel(%arg0: i32, %arg1: memref<1xf32, #tpu.memory_space<smem>>, %arg2: memref<1x18x18x4xbf16, #tpu.memory_space<vmem>>, %arg3: memref<9x4x128xbf16, #tpu.memory_space<vmem>>, %arg4: memref<1x128xf32, #tpu.memory_space<vmem>>, %arg5: memref<1x256x128xf32, #tpu.memory_space<vmem>>) attributes {dimension_semantics = [#tpu.dimension_semantics<parallel>], iteration_bounds = array<i64: 2>, scalar_prefetch = 0 : i64, scratch_operands = 0 : i64, tpu.core_type = #tpu.core_type<tc>, window_params = [{transform_indices = @transform_0, window_bounds = array<i64: 1>}, {transform_indices = @transform_1, window_bounds = array<i64: 1, 18, 18, 4>}, {pipeline_mode = #tpu.pipeline_mode<synchronous>, transform_indices = @transform_2, window_bounds = array<i64: 9, 4, 128>}, {pipeline_mode = #tpu.pipeline_mode<synchronous>, transform_indices = @transform_3, window_bounds = array<i64: 1, 128>}, {transform_indices = @transform_4, window_bounds = array<i64: 1, 256, 128>}]} {
    %cst = arith.constant 0.000000e+00 : f32
    %0 = vector.broadcast %cst : f32 to vector<256x128xf32>
    %c0 = arith.constant 0 : index
    %c0_0 = arith.constant 0 : index
    %c0_1 = arith.constant 0 : index
    %c0_2 = arith.constant 0 : index
    %1 = vector.load %arg2[%c0, %c0_0, %c0_1, %c0_2] : memref<1x18x18x4xbf16, #tpu.memory_space<vmem>>, vector<1x16x16x4xbf16>
    %2 = vector.shape_cast %1 : vector<1x16x16x4xbf16> to vector<16x16x4xbf16>
    %3 = vector.shape_cast %2 : vector<16x16x4xbf16> to vector<256x4xbf16>
    %c0_3 = arith.constant 0 : index
    %c0_4 = arith.constant 0 : index
    %c0_5 = arith.constant 0 : index
    %4 = vector.load %arg3[%c0_3, %c0_4, %c0_5] : memref<9x4x128xbf16, #tpu.memory_space<vmem>>, vector<1x4x128xbf16>
    %5 = vector.shape_cast %4 : vector<1x4x128xbf16> to vector<4x128xbf16>
    %cst_6 = arith.constant dense<0.000000e+00> : vector<256x128xf32>
    %6 = tpu.matmul %3, %5, %cst_6 {dimension_numbers = #tpu.dot_dimension_numbers<[1], [0], [0], [1], [0, 0, 1, 1], [], []>} : vector<256x4xbf16>, vector<4x128xbf16>, vector<256x128xf32> -> vector<256x128xf32>
    %7 = arith.addf %0, %6 : vector<256x128xf32>
    %c0_7 = arith.constant 0 : index
    %c0_8 = arith.constant 0 : index
    %c1 = arith.constant 1 : index
    %c0_9 = arith.constant 0 : index
    %8 = vector.load %arg2[%c0_7, %c0_8, %c1, %c0_9] : memref<1x18x18x4xbf16, #tpu.memory_space<vmem>>, vector<1x16x16x4xbf16>
    %9 = vector.shape_cast %8 : vector<1x16x16x4xbf16> to vector<16x16x4xbf16>
    %10 = vector.shape_cast %9 : vector<16x16x4xbf16> to vector<256x4xbf16>
    %c1_10 = arith.constant 1 : index
    %c0_11 = arith.constant 0 : index
    %c0_12 = arith.constant 0 : index
    %11 = vector.load %arg3[%c1_10, %c0_11, %c0_12] : memref<9x4x128xbf16, #tpu.memory_space<vmem>>, vector<1x4x128xbf16>
    %12 = vector.shape_cast %11 : vector<1x4x128xbf16> to vector<4x128xbf16>
    %cst_13 = arith.constant dense<0.000000e+00> : vector<256x128xf32>
    %13 = tpu.matmul %10, %12, %cst_13 {dimension_numbers = #tpu.dot_dimension_numbers<[1], [0], [0], [1], [0, 0, 1, 1], [], []>} : vector<256x4xbf16>, vector<4x128xbf16>, vector<256x128xf32> -> vector<256x128xf32>
    %14 = arith.addf %7, %13 : vector<256x128xf32>
    %c0_14 = arith.constant 0 : index
    %c0_15 = arith.constant 0 : index
    %c2 = arith.constant 2 : index
    %c0_16 = arith.constant 0 : index
    %15 = vector.load %arg2[%c0_14, %c0_15, %c2, %c0_16] : memref<1x18x18x4xbf16, #tpu.memory_space<vmem>>, vector<1x16x16x4xbf16>
    %16 = vector.shape_cast %15 : vector<1x16x16x4xbf16> to vector<16x16x4xbf16>
    %17 = vector.shape_cast %16 : vector<16x16x4xbf16> to vector<256x4xbf16>
    %c2_17 = arith.constant 2 : index
    %c0_18 = arith.constant 0 : index
    %c0_19 = arith.constant 0 : index
    %18 = vector.load %arg3[%c2_17, %c0_18, %c0_19] : memref<9x4x128xbf16, #tpu.memory_space<vmem>>, vector<1x4x128xbf16>
    %19 = vector.shape_cast %18 : vector<1x4x128xbf16> to vector<4x128xbf16>
    %cst_20 = arith.constant dense<0.000000e+00> : vector<256x128xf32>
    %20 = tpu.matmul %17, %19, %cst_20 {dimension_numbers = #tpu.dot_dimension_numbers<[1], [0], [0], [1], [0, 0, 1, 1], [], []>} : vector<256x4xbf16>, vector<4x128xbf16>, vector<256x128xf32> -> vector<256x128xf32>
    %21 = arith.addf %14, %20 : vector<256x128xf32>
    %c0_21 = arith.constant 0 : index
    %c1_22 = arith.constant 1 : index
    %c0_23 = arith.constant 0 : index
    %c0_24 = arith.constant 0 : index
    %22 = vector.load %arg2[%c0_21, %c1_22, %c0_23, %c0_24] : memref<1x18x18x4xbf16, #tpu.memory_space<vmem>>, vector<1x16x16x4xbf16>
    %23 = vector.shape_cast %22 : vector<1x16x16x4xbf16> to vector<16x16x4xbf16>
    %24 = vector.shape_cast %23 : vector<16x16x4xbf16> to vector<256x4xbf16>
    %c3 = arith.constant 3 : index
    %c0_25 = arith.constant 0 : index
    %c0_26 = arith.constant 0 : index
    %25 = vector.load %arg3[%c3, %c0_25, %c0_26] : memref<9x4x128xbf16, #tpu.memory_space<vmem>>, vector<1x4x128xbf16>
    %26 = vector.shape_cast %25 : vector<1x4x128xbf16> to vector<4x128xbf16>
    %cst_27 = arith.constant dense<0.000000e+00> : vector<256x128xf32>
    %27 = tpu.matmul %24, %26, %cst_27 {dimension_numbers = #tpu.dot_dimension_numbers<[1], [0], [0], [1], [0, 0, 1, 1], [], []>} : vector<256x4xbf16>, vector<4x128xbf16>, vector<256x128xf32> -> vector<256x128xf32>
    %28 = arith.addf %21, %27 : vector<256x128xf32>
    %c0_28 = arith.constant 0 : index
    %c1_29 = arith.constant 1 : index
    %c1_30 = arith.constant 1 : index
    %c0_31 = arith.constant 0 : index
    %29 = vector.load %arg2[%c0_28, %c1_29, %c1_30, %c0_31] : memref<1x18x18x4xbf16, #tpu.memory_space<vmem>>, vector<1x16x16x4xbf16>
    %30 = vector.shape_cast %29 : vector<1x16x16x4xbf16> to vector<16x16x4xbf16>
    %31 = vector.shape_cast %30 : vector<16x16x4xbf16> to vector<256x4xbf16>
    %c4 = arith.constant 4 : index
    %c0_32 = arith.constant 0 : index
    %c0_33 = arith.constant 0 : index
    %32 = vector.load %arg3[%c4, %c0_32, %c0_33] : memref<9x4x128xbf16, #tpu.memory_space<vmem>>, vector<1x4x128xbf16>
    %33 = vector.shape_cast %32 : vector<1x4x128xbf16> to vector<4x128xbf16>
    %cst_34 = arith.constant dense<0.000000e+00> : vector<256x128xf32>
    %34 = tpu.matmul %31, %33, %cst_34 {dimension_numbers = #tpu.dot_dimension_numbers<[1], [0], [0], [1], [0, 0, 1, 1], [], []>} : vector<256x4xbf16>, vector<4x128xbf16>, vector<256x128xf32> -> vector<256x128xf32>
    %35 = arith.addf %28, %34 : vector<256x128xf32>
    %c0_35 = arith.constant 0 : index
    %c1_36 = arith.constant 1 : index
    %c2_37 = arith.constant 2 : index
    %c0_38 = arith.constant 0 : index
    %36 = vector.load %arg2[%c0_35, %c1_36, %c2_37, %c0_38] : memref<1x18x18x4xbf16, #tpu.memory_space<vmem>>, vector<1x16x16x4xbf16>
    %37 = vector.shape_cast %36 : vector<1x16x16x4xbf16> to vector<16x16x4xbf16>
    %38 = vector.shape_cast %37 : vector<16x16x4xbf16> to vector<256x4xbf16>
    %c5 = arith.constant 5 : index
    %c0_39 = arith.constant 0 : index
    %c0_40 = arith.constant 0 : index
    %39 = vector.load %arg3[%c5, %c0_39, %c0_40] : memref<9x4x128xbf16, #tpu.memory_space<vmem>>, vector<1x4x128xbf16>
    %40 = vector.shape_cast %39 : vector<1x4x128xbf16> to vector<4x128xbf16>
    %cst_41 = arith.constant dense<0.000000e+00> : vector<256x128xf32>
    %41 = tpu.matmul %38, %40, %cst_41 {dimension_numbers = #tpu.dot_dimension_numbers<[1], [0], [0], [1], [0, 0, 1, 1], [], []>} : vector<256x4xbf16>, vector<4x128xbf16>, vector<256x128xf32> -> vector<256x128xf32>
    %42 = arith.addf %35, %41 : vector<256x128xf32>
    %c0_42 = arith.constant 0 : index
    %c2_43 = arith.constant 2 : index
    %c0_44 = arith.constant 0 : index
    %c0_45 = arith.constant 0 : index
    %43 = vector.load %arg2[%c0_42, %c2_43, %c0_44, %c0_45] : memref<1x18x18x4xbf16, #tpu.memory_space<vmem>>, vector<1x16x16x4xbf16>
    %44 = vector.shape_cast %43 : vector<1x16x16x4xbf16> to vector<16x16x4xbf16>
    %45 = vector.shape_cast %44 : vector<16x16x4xbf16> to vector<256x4xbf16>
    %c6 = arith.constant 6 : index
    %c0_46 = arith.constant 0 : index
    %c0_47 = arith.constant 0 : index
    %46 = vector.load %arg3[%c6, %c0_46, %c0_47] : memref<9x4x128xbf16, #tpu.memory_space<vmem>>, vector<1x4x128xbf16>
    %47 = vector.shape_cast %46 : vector<1x4x128xbf16> to vector<4x128xbf16>
    %cst_48 = arith.constant dense<0.000000e+00> : vector<256x128xf32>
    %48 = tpu.matmul %45, %47, %cst_48 {dimension_numbers = #tpu.dot_dimension_numbers<[1], [0], [0], [1], [0, 0, 1, 1], [], []>} : vector<256x4xbf16>, vector<4x128xbf16>, vector<256x128xf32> -> vector<256x128xf32>
    %49 = arith.addf %42, %48 : vector<256x128xf32>
    %c0_49 = arith.constant 0 : index
    %c2_50 = arith.constant 2 : index
    %c1_51 = arith.constant 1 : index
    %c0_52 = arith.constant 0 : index
    %50 = vector.load %arg2[%c0_49, %c2_50, %c1_51, %c0_52] : memref<1x18x18x4xbf16, #tpu.memory_space<vmem>>, vector<1x16x16x4xbf16>
    %51 = vector.shape_cast %50 : vector<1x16x16x4xbf16> to vector<16x16x4xbf16>
    %52 = vector.shape_cast %51 : vector<16x16x4xbf16> to vector<256x4xbf16>
    %c7 = arith.constant 7 : index
    %c0_53 = arith.constant 0 : index
    %c0_54 = arith.constant 0 : index
    %53 = vector.load %arg3[%c7, %c0_53, %c0_54] : memref<9x4x128xbf16, #tpu.memory_space<vmem>>, vector<1x4x128xbf16>
    %54 = vector.shape_cast %53 : vector<1x4x128xbf16> to vector<4x128xbf16>
    %cst_55 = arith.constant dense<0.000000e+00> : vector<256x128xf32>
    %55 = tpu.matmul %52, %54, %cst_55 {dimension_numbers = #tpu.dot_dimension_numbers<[1], [0], [0], [1], [0, 0, 1, 1], [], []>} : vector<256x4xbf16>, vector<4x128xbf16>, vector<256x128xf32> -> vector<256x128xf32>
    %56 = arith.addf %49, %55 : vector<256x128xf32>
    %c0_56 = arith.constant 0 : index
    %c2_57 = arith.constant 2 : index
    %c2_58 = arith.constant 2 : index
    %c0_59 = arith.constant 0 : index
    %57 = vector.load %arg2[%c0_56, %c2_57, %c2_58, %c0_59] : memref<1x18x18x4xbf16, #tpu.memory_space<vmem>>, vector<1x16x16x4xbf16>
    %58 = vector.shape_cast %57 : vector<1x16x16x4xbf16> to vector<16x16x4xbf16>
    %59 = vector.shape_cast %58 : vector<16x16x4xbf16> to vector<256x4xbf16>
    %c8 = arith.constant 8 : index
    %c0_60 = arith.constant 0 : index
    %c0_61 = arith.constant 0 : index
    %60 = vector.load %arg3[%c8, %c0_60, %c0_61] : memref<9x4x128xbf16, #tpu.memory_space<vmem>>, vector<1x4x128xbf16>
    %61 = vector.shape_cast %60 : vector<1x4x128xbf16> to vector<4x128xbf16>
    %cst_62 = arith.constant dense<0.000000e+00> : vector<256x128xf32>
    %62 = tpu.matmul %59, %61, %cst_62 {dimension_numbers = #tpu.dot_dimension_numbers<[1], [0], [0], [1], [0, 0, 1, 1], [], []>} : vector<256x4xbf16>, vector<4x128xbf16>, vector<256x128xf32> -> vector<256x128xf32>
    %63 = arith.addf %56, %62 : vector<256x128xf32>
    %c0_63 = arith.constant 0 : index
    %c0_64 = arith.constant 0 : index
    %64 = vector.load %arg4[%c0_63, %c0_64] : memref<1x128xf32, #tpu.memory_space<vmem>>, vector<1x128xf32>
    %65 = vector.broadcast %64 : vector<1x128xf32> to vector<256x128xf32>
    %66 = arith.addf %63, %65 : vector<256x128xf32>
    %c0_65 = arith.constant 0 : index
    %67 = memref.load %arg1[%c0_65] : memref<1xf32, #tpu.memory_space<smem>>
    %cst_66 = arith.constant 0.000000e+00 : f32
    %68 = vector.broadcast %cst_66 : f32 to vector<256x128xf32>
    %69 = arith.cmpf oge, %66, %68 : vector<256x128xf32>
    %70 = vector.broadcast %67 : f32 to vector<256x128xf32>
    %71 = arith.mulf %70, %66 : vector<256x128xf32>
    %72 = arith.select %69, %66, %71 : vector<256x128xi1>, vector<256x128xf32>
    %c0_67 = arith.constant 0 : index
    %c0_68 = arith.constant 0 : index
    %c0_69 = arith.constant 0 : index
    %73 = vector.load %arg5[%c0_67, %c0_68, %c0_69] : memref<1x256x128xf32, #tpu.memory_space<vmem>>, vector<1x256x128xf32>
    %74 = vector.shape_cast %73 : vector<1x256x128xf32> to vector<256x128xf32>
    %75 = vector.shape_cast %72 : vector<256x128xf32> to vector<1x256x128xf32>
    tpu.vector_store %arg5[%c0_67, %c0_68, %c0_69], %75 {strides = array<i32>} : memref<1x256x128xf32, #tpu.memory_space<vmem>>, vector<1x256x128xf32>,
    return
  }
  func.func @transform_0(%arg0: i32) -> i32 {
    %c0_i32 = arith.constant 0 : i32
    %c0_i32_0 = arith.constant 0 : i32
    return %c0_i32 : i32
  }
  func.func @transform_1(%arg0: i32) -> (i32, i32, i32, i32) {
    %c0_i32 = arith.constant 0 : i32
    %c0_i32_0 = arith.constant 0 : i32
    %c0_i32_1 = arith.constant 0 : i32
    %c0_i32_2 = arith.constant 0 : i32
    return %arg0, %c0_i32, %c0_i32_0, %c0_i32_1 : i32, i32, i32, i32
  }
  func.func @transform_2(%arg0: i32) -> (i32, i32, i32) {
    %c0_i32 = arith.constant 0 : i32
    %c0_i32_0 = arith.constant 0 : i32
    %c0_i32_1 = arith.constant 0 : i32
    %c0_i32_2 = arith.constant 0 : i32
    return %c0_i32, %c0_i32_0, %c0_i32_1 : i32, i32, i32
  }
  func.func @transform_3(%arg0: i32) -> (i32, i32) {
    %c0_i32 = arith.constant 0 : i32
    %c0_i32_0 = arith.constant 0 : i32
    %c0_i32_1 = arith.constant 0 : i32
    return %c0_i32, %c0_i32_0 : i32, i32
  }
  func.func @transform_4(%arg0: i32) -> (i32, i32, i32) {
    %c0_i32 = arith.constant 0 : i32
    %c0_i32_0 = arith.constant 0 : i32
    %c0_i32_1 = arith.constant 0 : i32
    return %arg0, %c0_i32, %c0_i32_0 : i32, i32, i32
  }
}

</mosaic_0001>

<bundles_post_ra>
// kernel: upsample_block.1
= control target key start
LH: loop header
LB: loop body
LE: loop exit
PB: predicated region body
PF: predicated region fallthrough
CT: control target
= control target key end

     0   :  { %s5075_s17 = smov 0   ;;  %s6525_s0 = inlined_call_operand.<no memory space> [shape: f32[1], index: 0, kind: input, shape index: {}]   ;;  %s6526_s1 = inlined_call_operand.vmem [shape: bf16[2,18,18,4], index: 1, kind: input, shape index: {}]   ;;  %s6527_s2 = inlined_call_operand.vmem [shape: bf16[9,4,128], index: 2, kind: input, shape index: {}]   ;;  %s6528_s3 = inlined_call_operand.vmem [shape: f32[1,128], index: 3, kind: input, shape index: {}]   ;;  %s6529_s4 = inlined_call_operand.vmem [shape: f32[2,256,128], index: 4, kind: output, shape index: {}]  }
   0x1   :  { %9 = sst [smem:[#allocation2]] %s6525_s0 }
   0x2 LB: > { %s4332_s18 = sadd.s32 4294967295, %s5045_s17   ;;  %p4336_p0 = scmp.ge.s32.totalorder %s5045_s17, 1  ;;  %s5045_s17 = sphi %s5075_s17, %s15_s17  }
   0x3   : > { %p163_p1 = scmp.lt.s32.totalorder %s5045_s17, 3 }
   0x5   : > { %p164_p2 = pnand %p4336_p0, %p163_p1 }
   0x7   : > { %167 = sbr.rel (%p164_p2) target bundleno = 760 (0x2f8), region = 36 }
   0xc   : > { %v4340_v0 = vld [vmem:[%s6527_s2 + $0x2] sm:$0x3]  ;;  %vm735_vm0 = vcmask 1041408   ;;  %p189_p3 = scmp.lt.s32.totalorder %s4332_s18, 1  ;;  %v4453_v2 = vld [vmem:[%s6527_s2 + $0x4] sm:$0x3] }
   0xd   : > { %v737_v1 = vsel %vm735_vm0, %v4340_v0, 0  ;;  %v1310_v3 = vsel %vm735_vm0, %v4453_v2, 0  ;;  %v4502_v4 = vld [vmem:[%s6527_s2 + $0x6] sm:$0x3]  ;;  %v232_v5 = vld [vmem:[%s6527_s2] sm:$0x3] }
   0xe   : > { %4975 = vmatpush.bf16.msra.mxu1 %v737_v1  ;;  %4976 = vmatpush.bf16.msra.mxu2 %v737_v1  ;;  %s6543_s18 = smov (!%p189_p3, %s4332_s18), 1  ;;  %v4631_v6 = vld [vmem:[%s6527_s2 + $0x8] sm:$0x3]  ;;  %v1597_v7 = vsel %vm735_vm0, %v4502_v4, 0  ;;  %v957_v8 = vsel %vm735_vm0, %v232_v5, 0  ;;  %vm686_vm4 = vcmask 31744  }
   0xf   : > { %4977 = vmatpush.bf16.msra.mxu3 %v737_v1  ;;  %746 = vmatpush.bf16.msra.mxu0 %v737_v1  ;;  %s4978_s28 = smul.u32 216, %s6543_s18  ;;  %v2251_v9 = vsel %vm735_vm0, %v4631_v6, 0  ;;  %vm249_vm1 = vsmask.f32 3328  ;;  %vm250_vm2 = vsmask.f32 7440 }
  0x10   : > { %vm5121_vm3 = vmor %vm249_vm1, %vm250_vm2  ;;  %vm1096_vm5 = vcmask 1042432   ;;  %vm1097_vm6 = vcmask 1046532   ;;  %s6136_s14 = sld [smem:[#allocation2]]  ;;  %s4926_s19 = sshll.u32 %s6543_s18, 8 }
  0x11   : > { %s5109_s5 = scalar_lea.vmem %s6526_s1, %s4978_s28  ;;  %vm5295_vm7 = vmor %vm1096_vm5, %vm1097_vm6  ;;  %s6185_s18 = scalar_lea.vmem %s6529_s4, %s4926_s19 }
  0x12   : > { %1319 = vmatpush.bf16.msrb.mxu2 %v1310_v3  ;;  %966 = vmatpush.bf16.msrb.mxu1 %v957_v8  ;;  %v208_v10 = vld [vmem:[%s5109_s5 + $0x30] sm:$0xf]  ;;  %v209_v11 = vld [vmem:[%s5109_s5 + $0x34] sm:$0xf]  ;;  %v237_v12 = vld [vmem:[%s5109_s5 + $0x38] sm:$0x1] }
  0x13   : > { %1606 = vmatpush.bf16.msrb.mxu3 %v1597_v7  ;;  %2260 = vmatpush.bf16.msrb.mxu0 %v2251_v9  ;;  %v349_v13 = vshrl.u32 %v208_v10, 16  ;;  %v352_v14 = vshll.u32 %v208_v10, 16  ;;  %v358_v15 = vshll.u32 %v209_v11, 16  ;;  %v362_v16 = vshrl.u32 %v209_v11, 16  ;;  %v216_v17 = vld [vmem:[%s5109_s5 + $0x60] sm:$0xf] }
  0x14   : > { %v368_v18 = vshll.u32 %v237_v12, 16  ;;  %v217_v19 = vld [vmem:[%s5109_s5 + $0x64] sm:$0xf]  ;;  %v241_v20 = vld [vmem:[%s5109_s5 + $0x68] sm:$0x1]  ;;  %v445_v21 = vshrl.u32 %v216_v17, 16 }
  0x15   : > { %v351_v22 = vrot.slane %v349_v13, 4  ;;  %v354_v23 = vrot.slane %v352_v14, 5  ;;  %v360_v24 = vrot.slane %v358_v15, 5  ;;  %v364_v25 = vrot.slane %v362_v16, 4  ;;  %v224_v26 = vld [vmem:[%s5109_s5 + $0x90] sm:$0xf] }
  0x16   : > { %v370_v27 = vrot.slane %v368_v18, 5  ;;  %v447_v28 = vrot.slane %v445_v21, 4  ;;  %v448_v29 = vshll.u32 %v216_v17, 16  ;;  %v454_v30 = vshll.u32 %v217_v19, 16  ;;  %v225_v35 = vld [vmem:[%s5109_s5 + $0x94] sm:$0xf] }
  0x17   : > { %v355_v31 = vor.u32 %v354_v23, %v351_v22  ;;  %v365_v32 = vor.u32 %v364_v25, %v360_v24  ;;  %v458_v33 = vshrl.u32 %v217_v19, 16  ;;  %v464_v34 = vshll.u32 %v241_v20, 16  ;;  %v245_v45 = vld [vmem:[%s5109_s5 + $0x98] sm:$0x1]  ;;  %v200_v61 = vld [vmem:[%s5109_s5] sm:$0xf] }
  0x18   : > { %v450_v37 = vrot.slane %v448_v29, 5  ;;  %v456_v38 = vrot.slane %v454_v30, 5  ;;  %v541_v39 = vshrl.u32 %v224_v26, 16  ;;  %v544_v47 = vshll.u32 %v224_v26, 16  ;;  %v5134_v1 = vld [vmem:[%s5109_s5 + $0x4] sm:$0xf] }
  0x19   : > { %v356_v40 = vrot.slane %v355_v31, 4  ;;  %v366_v41 = vrot.slane %v365_v32, 4  ;;  %v460_v42 = vrot.slane %v458_v33, 4  ;;  %v466_v43 = vrot.slane %v464_v34, 5  ;;  %v5137_v2 = vld [vmem:[%s5109_s5 + $0x8] sm:$0x1] }
  0x1a   : > { %v451_v44 = vor.u32 %v450_v37, %v447_v28  ;;  %v543_v46 = vrot.slane %v541_v39, 4  ;;  %v550_v48 = vshll.u32 %v225_v35, 16  ;;  %v554_v52 = vshrl.u32 %v225_v35, 16  ;;  %v210_v19 = vld [vmem:[%s5109_s5 + $0x3c] sm:$0xf] }
  0x1b   : > { %v361_v49 = vsel %vm5121_vm3, %v356_v40, %v360_v24  ;;  %v371_v50 = vsel %vm5121_vm3, %v366_v41, %v370_v27  ;;  %v461_v51 = vor.u32 %v460_v42, %v456_v38  ;;  %v546_v56 = vrot.slane %v544_v47, 5  ;;  %v5149_v20 = vld [vmem:[%s5109_s5 + $0x40] sm:$0xf]  ;;  %v5154_v25 = vld [vmem:[%s5109_s5 + $0x44] sm:$0x1] }
  0x1c   : > { %v646_v53 = vunpack.c.l.b16 %v361_v49  ;;  %v647_v54 = vunpack.c.l.b16 %v371_v50  ;;  %v452_v55 = vrot.slane %v451_v44, 4  ;;  %v552_v58 = vrot.slane %v550_v48, 5  ;;  %v218_v33 = vld [vmem:[%s5109_s5 + $0x6c] sm:$0xf]  ;;  %v242_v47 = vld [vmem:[%s5109_s5 + $0x74] sm:$0x1] }
  0x1d   : > { %v462_v57 = vrot.slane %v461_v51, 4  ;;  %v556_v59 = vrot.slane %v554_v52, 4  ;;  %v560_v60 = vshll.u32 %v245_v45, 16  ;;  %v547_v0 = vor.u32 %v546_v56, %v543_v46 }
  0x1e   : > { %v674_v62 = vpack.c.b16 %v647_v54, %v646_v53  ;;  %v457_v63 = vsel %vm5121_vm3, %v452_v55, %v456_v38  ;;  %v253_v9 = vshrl.u32 %v200_v61, 16  ;;  %v256_v10 = vshll.u32 %v200_v61, 16  ;;  %v226_v61 = vld [vmem:[%s5109_s5 + $0x9c] sm:$0xf] }
  0x1f   : > { %v467_v3 = vsel %vm5121_vm3, %v462_v57, %v466_v43  ;;  %v654_v4 = vunpack.c.l.b16 %v457_v63  ;;  %v557_v5 = vor.u32 %v556_v59, %v552_v58  ;;  %v562_v6 = vrot.slane %v560_v60, 5  ;;  %v219_v43 = vld [vmem:[%s5109_s5 + $0x70] sm:$0xf] }
  0x20   : > { %4345 = vmatmul.msk.bf16.vlgmr.msra.gmra.mxu1 %vm686_vm4, %v674_v62  ;;  %v655_v7 = vunpack.c.l.b16 %v467_v3  ;;  %v548_v8 = vrot.slane %v547_v0, 4  ;;  %v262_v12 = vshll.u32 %v5134_v1, 16  ;;  %v266_v13 = vshrl.u32 %v5134_v1, 16  ;;  %v227_v3 = vld [vmem:[%s5109_s5 + $0xa0] sm:$0xf] }
  0x21   : > { %v558_v11 = vrot.slane %v557_v5, 4  ;;  %v272_v14 = vshll.u32 %v5137_v2, 16  ;;  %v255_v17 = vrot.slane %v253_v9, 4  ;;  %v258_v18 = vrot.slane %v256_v10, 5 }
  0x22   : > { %v678_v15 = vpack.c.b16 %v655_v7, %v654_v4  ;;  %v553_v16 = vsel %vm5121_vm3, %v548_v8, %v552_v58  ;;  %v264_v23 = vrot.slane %v262_v12, 5  ;;  %v268_v24 = vrot.slane %v266_v13, 4  ;;  %v246_v8 = vld [vmem:[%s5109_s5 + $0xa4] sm:$0x1] }
  0x23   : > { %v563_v21 = vsel %vm5121_vm3, %v558_v11, %v562_v6  ;;  %v662_v22 = vunpack.c.l.b16 %v553_v16  ;;  %v259_v27 = vor.u32 %v258_v18, %v255_v17  ;;  %v274_v28 = vrot.slane %v272_v14, 5 }
  0x24   : > { %4349 = vmatmul.msk.bf16.vlgmr.msra.gmra.mxu2 %vm686_vm4, %v678_v15  ;;  %v663_v26 = vunpack.c.l.b16 %v563_v21  ;;  %v269_v29 = vor.u32 %v268_v24, %v264_v23  ;;  %v373_v30 = vshrl.u32 %v210_v19, 16  ;;  %v376_v31 = vshll.u32 %v210_v19, 16 }
  0x25   : > { %v382_v32 = vshll.u32 %v5149_v20, 16  ;;  %v260_v35 = vrot.slane %v259_v27, 4  ;;  %v386_v37 = vshrl.u32 %v5149_v20, 16  ;;  %v392_v38 = vshll.u32 %v5154_v25, 16 }
  0x26   : > { %v682_v34 = vpack.c.b16 %v663_v26, %v662_v22  ;;  %v270_v39 = vrot.slane %v269_v29, 4  ;;  %v375_v40 = vrot.slane %v373_v30, 4  ;;  %v378_v41 = vrot.slane %v376_v31, 5  ;;  %v202_v22 = vld [vmem:[%s5109_s5 + $0xc] sm:$0xf] }
  0x27   : > { %v384_v42 = vrot.slane %v382_v32, 5  ;;  %v265_v44 = vsel %vm5121_vm3, %v260_v35, %v264_v23  ;;  %v388_v45 = vrot.slane %v386_v37, 4  ;;  %v394_v46 = vrot.slane %v392_v38, 5  ;;  %v5183_v32 = vld [vmem:[%s5109_s5 + $0x14] sm:$0x1] }
  0x28   : > { %4353 = vmatmul.msk.bf16.vlgmr.msra.gmra.mxu3 %vm686_vm4, %v682_v34  ;;  %v469_v48 = vshrl.u32 %v218_v33, 16  ;;  %v275_v49 = vsel %vm5121_vm3, %v270_v39, %v274_v28  ;;  %v638_v50 = vunpack.c.l.b16 %v265_v44  ;;  %v379_v51 = vor.u32 %v378_v41, %v375_v40  ;;  %v5180_v28 = vld [vmem:[%s5109_s5 + $0x10] sm:$0xf] }
  0x29   : > { %v472_v52 = vshll.u32 %v218_v33, 16  ;;  %v639_v53 = vunpack.c.l.b16 %v275_v49  ;;  %v389_v54 = vor.u32 %v388_v45, %v384_v42  ;;  %v478_v56 = vshll.u32 %v219_v43, 16 }
  0x2a   : > { %v471_v55 = vrot.slane %v469_v48, 4  ;;  %v380_v57 = vrot.slane %v379_v51, 4  ;;  %v482_v59 = vshrl.u32 %v219_v43, 16  ;;  %v488_v60 = vshll.u32 %v242_v47, 16  ;;  %v5193_v47 = vld [vmem:[%s5109_s5 + $0x4c] sm:$0xf] }
  0x2b   : > { %v474_v58 = vrot.slane %v472_v52, 5  ;;  %v670_v62 = vpack.c.b16 %v639_v53, %v638_v50  ;;  %v390_v63 = vrot.slane %v389_v54, 4  ;;  %v480_v0 = vrot.slane %v478_v56, 5  ;;  %v5198_v56 = vld [vmem:[%s5109_s5 + $0x50] sm:$0x1] }
  0x2c   : > { %v385_v4 = vsel %vm5121_vm3, %v380_v57, %v384_v42  ;;  %v484_v6 = vrot.slane %v482_v59, 4  ;;  %v490_v7 = vrot.slane %v488_v60, 5  ;;  %v565_v11 = vshrl.u32 %v226_v61, 16  ;;  %v212_v42 = vld [vmem:[%s5109_s5 + $0x48] sm:$0xf] }
  0x2d   : > { %v475_v5 = vor.u32 %v474_v58, %v471_v55  ;;  %4341 = vmatmul.msk.bf16.vlgmr.msra.gmra.mxu0 %vm686_vm4, %v670_v62  ;;  %v395_v9 = vsel %vm5121_vm3, %v390_v63, %v394_v46  ;;  %v648_v10 = vunpack.c.l.b16 %v385_v4  ;;  %v568_v12 = vshll.u32 %v226_v61, 16 }
  0x2e   : > { %v649_v13 = vunpack.c.l.b16 %v395_v9  ;;  %v485_v15 = vor.u32 %v484_v6, %v480_v0  ;;  %v574_v16 = vshll.u32 %v227_v3, 16  ;;  %v567_v17 = vrot.slane %v565_v11, 4 }
  0x2f   : > { %v476_v14 = vrot.slane %v475_v5, 4  ;;  %v570_v18 = vrot.slane %v568_v12, 5  ;;  %v578_v19 = vshrl.u32 %v227_v3, 16  ;;  %v584_v21 = vshll.u32 %v246_v8, 16  ;;  %v220_v3 = vld [vmem:[%s5109_s5 + $0x78] sm:$0xf] }
  0x30   : > { %v675_v23 = vpack.c.b16 %v649_v13, %v648_v10  ;;  %v486_v26 = vrot.slane %v485_v15, 4  ;;  %v576_v27 = vrot.slane %v574_v16, 5  ;;  %v277_v35 = vshrl.u32 %v202_v22, 16  ;;  %v221_v8 = vld [vmem:[%s5109_s5 + $0x7c] sm:$0xf] }
  0x31   : > { %v481_v24 = vsel %vm5121_vm3, %v476_v14, %v480_v0  ;;  %v571_v30 = vor.u32 %v570_v18, %v567_v17  ;;  %v580_v31 = vrot.slane %v578_v19, 4  ;;  %v586_v34 = vrot.slane %v584_v21, 5  ;;  %v243_v16 = vld [vmem:[%s5109_s5 + $0x80] sm:$0x1] }
  0x32   : > { %v656_v29 = vunpack.c.l.b16 %v481_v24  ;;  %4346 = vmatmul.msk.bf16.gmra.mxu1 %vm686_vm4, %v675_v23  ;;  %v491_v33 = vsel %vm5121_vm3, %v486_v26, %v490_v7  ;;  %v280_v37 = vshll.u32 %v202_v22, 16  ;;  %v286_v41 = vshll.u32 %v5180_v28, 16 }
  0x33   : > { %v657_v38 = vunpack.c.l.b16 %v491_v33  ;;  %v572_v39 = vrot.slane %v571_v30, 4  ;;  %v581_v40 = vor.u32 %v580_v31, %v576_v27  ;;  %v279_v43 = vrot.slane %v277_v35, 4 }
  0x34   : > { %v282_v44 = vrot.slane %v280_v37, 5  ;;  %v290_v45 = vshrl.u32 %v5180_v28, 16  ;;  %v296_v46 = vshll.u32 %v5183_v32, 16  ;;  %v288_v51 = vrot.slane %v286_v41, 5 }
  0x35   : > { %v679_v48 = vpack.c.b16 %v657_v38, %v656_v29  ;;  %v577_v49 = vsel %vm5121_vm3, %v572_v39, %v576_v27  ;;  %v582_v50 = vrot.slane %v581_v40, 4  ;;  %v397_v58 = vshrl.u32 %v212_v42, 16  ;;  %v229_v39 = vld [vmem:[%s5109_s5 + $0xac] sm:$0xf]  ;;  %v247_v40 = vld [vmem:[%s5109_s5 + $0xb0] sm:$0x1] }
  0x36   : > { %v664_v52 = vunpack.c.l.b16 %v577_v49  ;;  %v283_v53 = vor.u32 %v282_v44, %v279_v43  ;;  %v292_v54 = vrot.slane %v290_v45, 4  ;;  %v298_v55 = vrot.slane %v296_v46, 5 }
  0x37   : > { %4350 = vmatmul.msk.bf16.gmra.mxu2 %vm686_vm4, %v679_v48  ;;  %v587_v57 = vsel %vm5121_vm3, %v582_v50, %v586_v34  ;;  %v400_v59 = vshll.u32 %v212_v42, 16  ;;  %v406_v60 = vshll.u32 %v5193_v47, 16  ;;  %v410_v0 = vshrl.u32 %v5193_v47, 16  ;;  %v228_v34 = vld [vmem:[%s5109_s5 + $0xa8] sm:$0xf] }
  0x38   : > { %v665_v61 = vunpack.c.l.b16 %v587_v57  ;;  %v284_v62 = vrot.slane %v283_v53, 4  ;;  %v293_v63 = vor.u32 %v292_v54, %v288_v51  ;;  %v399_v4 = vrot.slane %v397_v58, 4 }
  0x39   : > { %v402_v5 = vrot.slane %v400_v59, 5  ;;  %v408_v6 = vrot.slane %v406_v60, 5  ;;  %v416_v7 = vshll.u32 %v5198_v56, 16  ;;  %v412_v12 = vrot.slane %v410_v0, 4  ;;  %v204_v59 = vld [vmem:[%s5109_s5 + $0x18] sm:$0xf] }
  0x3a   : > { %v683_v9 = vpack.c.b16 %v665_v61, %v664_v52  ;;  %v289_v10 = vsel %vm5121_vm3, %v284_v62, %v288_v51  ;;  %v294_v11 = vrot.slane %v293_v63, 4  ;;  %v493_v17 = vshrl.u32 %v220_v3, 16  ;;  %v5226_v63 = vld [vmem:[%s5109_s5 + $0x1c] sm:$0xf]  ;;  %v5229_v0 = vld [vmem:[%s5109_s5 + $0x20] sm:$0x1] }
  0x3b   : > { %v640_v13 = vunpack.c.l.b16 %v289_v10  ;;  %v403_v14 = vor.u32 %v402_v5, %v399_v4  ;;  %v418_v15 = vrot.slane %v416_v7, 5  ;;  %v413_v19 = vor.u32 %v412_v12, %v408_v6 }
  0x3c   : > { %4354 = vmatmul.msk.bf16.gmra.mxu3 %vm686_vm4, %v683_v9  ;;  %v299_v18 = vsel %vm5121_vm3, %v294_v11, %v298_v55  ;;  %v496_v21 = vshll.u32 %v220_v3, 16  ;;  %v502_v22 = vshll.u32 %v221_v8, 16  ;;  %v495_v26 = vrot.slane %v493_v17, 4 }
  0x3d   : > { %v641_v23 = vunpack.c.l.b16 %v299_v18  ;;  %v404_v24 = vrot.slane %v403_v14, 4  ;;  %v506_v27 = vshrl.u32 %v221_v8, 16  ;;  %v414_v29 = vrot.slane %v413_v19, 4 }
  0x3e   : > { %v498_v30 = vrot.slane %v496_v21, 5  ;;  %v504_v31 = vrot.slane %v502_v22, 5  ;;  %v512_v33 = vshll.u32 %v243_v16, 16  ;;  %v589_v48 = vshrl.u32 %v228_v34, 16  ;;  %v5239_v21 = vld [vmem:[%s5109_s5 + $0x58] sm:$0xf] }
  0x3f   : > { %v671_v35 = vpack.c.b16 %v641_v23, %v640_v13  ;;  %v409_v37 = vsel %vm5121_vm3, %v404_v24, %v408_v6  ;;  %v508_v38 = vrot.slane %v506_v27, 4  ;;  %v419_v41 = vsel %vm5121_vm3, %v414_v29, %v418_v15  ;;  %v214_v15 = vld [vmem:[%s5109_s5 + $0x54] sm:$0xf]  ;;  %v5244_v27 = vld [vmem:[%s5109_s5 + $0x5c] sm:$0x1] }
  0x40   : > { %v650_v42 = vunpack.c.l.b16 %v409_v37  ;;  %v499_v43 = vor.u32 %v498_v30, %v495_v26  ;;  %v514_v44 = vrot.slane %v512_v33, 5  ;;  %v651_v45 = vunpack.c.l.b16 %v419_v41 }
  0x41   : > { %4342 = vmatmul.msk.bf16.gmra.mxu0 %vm686_vm4, %v671_v35  ;;  %v509_v46 = vor.u32 %v508_v38, %v504_v31  ;;  %v592_v49 = vshll.u32 %v228_v34, 16  ;;  %v598_v51 = vshll.u32 %v229_v39, 16  ;;  %v602_v52 = vshrl.u32 %v229_v39, 16  ;;  %v222_v39 = vld [vmem:[%s5109_s5 + $0x84] sm:$0xf] }
  0x42   : > { %v500_v50 = vrot.slane %v499_v43, 4  ;;  %v608_v53 = vshll.u32 %v247_v40, 16  ;;  %v676_v54 = vpack.c.b16 %v651_v45, %v650_v42  ;;  %v591_v57 = vrot.slane %v589_v48, 4 }
  0x43   : > { %v510_v55 = vrot.slane %v509_v46, 4  ;;  %v594_v58 = vrot.slane %v592_v49, 5  ;;  %v600_v61 = vrot.slane %v598_v51, 5  ;;  %v604_v62 = vrot.slane %v602_v52, 4  ;;  %v223_v49 = vld [vmem:[%s5109_s5 + $0x88] sm:$0xf] }
  0x44   : > { %v505_v60 = vsel %vm5121_vm3, %v500_v50, %v504_v31  ;;  %4347 = vmatmul.msk.bf16.gmra.mxu1 %vm686_vm4, %v676_v54  ;;  %v610_v6 = vrot.slane %v608_v53, 5  ;;  %v301_v9 = vshrl.u32 %v204_v59, 16  ;;  %v304_v10 = vshll.u32 %v204_v59, 16  ;;  %v244_v53 = vld [vmem:[%s5109_s5 + $0x8c] sm:$0x1] }
  0x45   : > { %v515_v3 = vsel %vm5121_vm3, %v510_v55, %v514_v44  ;;  %v658_v4 = vunpack.c.l.b16 %v505_v60  ;;  %v595_v5 = vor.u32 %v594_v58, %v591_v57  ;;  %v605_v8 = vor.u32 %v604_v62, %v600_v61 }
  0x46   : > { %v659_v7 = vunpack.c.l.b16 %v515_v3  ;;  %v310_v12 = vshll.u32 %v5226_v63, 16  ;;  %v314_v13 = vshrl.u32 %v5226_v63, 16  ;;  %v320_v14 = vshll.u32 %v5229_v0, 16 }
  0x47   : > { %v596_v11 = vrot.slane %v595_v5, 4  ;;  %v606_v17 = vrot.slane %v605_v8, 4  ;;  %v303_v18 = vrot.slane %v301_v9, 4  ;;  %v306_v19 = vrot.slane %v304_v10, 5  ;;  %v230_v8 = vld [vmem:[%s5109_s5 + $0xb4] sm:$0xf] }
  0x48   : > { %v680_v16 = vpack.c.b16 %v659_v7, %v658_v4  ;;  %v312_v23 = vrot.slane %v310_v12, 5  ;;  %v316_v24 = vrot.slane %v314_v13, 4  ;;  %v322_v26 = vrot.slane %v320_v14, 5  ;;  %v231_v12 = vld [vmem:[%s5109_s5 + $0xb8] sm:$0xf] }
  0x49   : > { %v601_v22 = vsel %vm5121_vm3, %v596_v11, %v600_v61  ;;  %v611_v29 = vsel %vm5121_vm3, %v606_v17, %v610_v6  ;;  %v307_v31 = vor.u32 %v306_v19, %v303_v18  ;;  %v421_v33 = vshrl.u32 %v214_v15, 16  ;;  %v248_v17 = vld [vmem:[%s5109_s5 + $0xbc] sm:$0x1] }
  0x4a   : > { %4351 = vmatmul.msk.bf16.gmra.mxu2 %vm686_vm4, %v680_v16  ;;  %v666_v30 = vunpack.c.l.b16 %v601_v22  ;;  %v667_v34 = vunpack.c.l.b16 %v611_v29  ;;  %v317_v35 = vor.u32 %v316_v24, %v312_v23  ;;  %v424_v37 = vshll.u32 %v214_v15, 16 }
  0x4b   : > { %v430_v38 = vshll.u32 %v5239_v21, 16  ;;  %v308_v40 = vrot.slane %v307_v31, 4  ;;  %v423_v41 = vrot.slane %v421_v33, 4  ;;  %v434_v42 = vshrl.u32 %v5239_v21, 16 }
  0x4c   : > { %v440_v43 = vshll.u32 %v5244_v27, 16  ;;  %v684_v44 = vpack.c.b16 %v667_v34, %v666_v30  ;;  %v318_v45 = vrot.slane %v317_v35, 4  ;;  %v426_v46 = vrot.slane %v424_v37, 5  ;;  %v206_v37 = vld [vmem:[%s5109_s5 + $0x24] sm:$0xf] }
  0x4d   : > { %v432_v48 = vrot.slane %v430_v38, 5  ;;  %v313_v50 = vsel %vm5121_vm3, %v308_v40, %v312_v23  ;;  %v436_v51 = vrot.slane %v434_v42, 4  ;;  %v517_v54 = vshrl.u32 %v222_v39, 16  ;;  %v5272_v42 = vld [vmem:[%s5109_s5 + $0x28] sm:$0xf] }
  0x4e   : > { %v442_v52 = vrot.slane %v440_v43, 5  ;;  %4355 = vmatmul.msk.bf16.gmra.mxu3 %vm686_vm4, %v684_v44  ;;  %v323_v55 = vsel %vm5121_vm3, %v318_v45, %v322_v26  ;;  %v642_v57 = vunpack.c.l.b16 %v313_v50  ;;  %v427_v58 = vor.u32 %v426_v46, %v423_v41 }
  0x4f   : > { %v520_v59 = vshll.u32 %v222_v39, 16  ;;  %v643_v60 = vunpack.c.l.b16 %v323_v55  ;;  %v437_v61 = vor.u32 %v436_v51, %v432_v48  ;;  %v519_v62 = vrot.slane %v517_v54, 4 }
  0x50   : > { %v526_v3 = vshll.u32 %v223_v49, 16  ;;  %v428_v4 = vrot.slane %v427_v58, 4  ;;  %v530_v6 = vshrl.u32 %v223_v49, 16  ;;  %v536_v7 = vshll.u32 %v244_v53, 16 }
  0x51   : > { %v522_v5 = vrot.slane %v520_v59, 5  ;;  %v672_v9 = vpack.c.b16 %v643_v60, %v642_v57  ;;  %v438_v10 = vrot.slane %v437_v61, 4  ;;  %v613_v22 = vshrl.u32 %v230_v8, 16  ;;  %v1048_v61 = vld [vmem:[%s5109_s5] sm:$0xe] }
  0x52   : > { %v528_v11 = vrot.slane %v526_v3, 5  ;;  %v433_v13 = vsel %vm5121_vm3, %v428_v4, %v432_v48  ;;  %v532_v15 = vrot.slane %v530_v6, 4  ;;  %v538_v16 = vrot.slane %v536_v7, 5  ;;  %v5276_v48 = vld [vmem:[%s5109_s5 + $0x2c] sm:$0x1] }
  0x53   : > { %v523_v14 = vor.u32 %v522_v5, %v519_v62  ;;  %4343 = vmatmul.msk.bf16.gmra.mxu0 %vm686_vm4, %v672_v9  ;;  %v443_v18 = vsel %vm5121_vm3, %v438_v10, %v442_v52  ;;  %v652_v19 = vunpack.c.l.b16 %v433_v13  ;;  %v616_v23 = vshll.u32 %v230_v8, 16  ;;  %v4583_v6 = vld [vmem:[%s5109_s5 + $0xc] sm:$0xf] }
  0x54   : > { %v653_v24 = vunpack.c.l.b16 %v443_v18  ;;  %v533_v29 = vor.u32 %v532_v15, %v528_v11  ;;  %v622_v30 = vshll.u32 %v231_v12, 16  ;;  %v615_v31 = vrot.slane %v613_v22, 4 }
  0x55   : > { %v524_v26 = vrot.slane %v523_v14, 4  ;;  %v618_v33 = vrot.slane %v616_v23, 5  ;;  %v626_v34 = vshrl.u32 %v231_v12, 16  ;;  %v632_v35 = vshll.u32 %v248_v17, 16  ;;  %v4584_v12 = vld [vmem:[%s5109_s5 + $0x10] sm:$0xf] }
  0x56   : > { %v677_v38 = vpack.c.b16 %v653_v24, %v652_v19  ;;  %v534_v40 = vrot.slane %v533_v29, 4  ;;  %v624_v41 = vrot.slane %v622_v30, 5  ;;  %v1104_v43 = vrot.slane %v5137_v2, 5 }
  0x57   : > { %v529_v39 = vsel %vm5121_vm3, %v524_v26, %v528_v11  ;;  %v619_v45 = vor.u32 %v618_v33, %v615_v31  ;;  %v628_v46 = vrot.slane %v626_v34, 4  ;;  %v634_v50 = vrot.slane %v632_v35, 5  ;;  %v4729_v11 = vld [vmem:[%s6527_s2 + $0xc] sm:$0x3] }
  0x58   : > { %v660_v44 = vunpack.c.l.b16 %v529_v39  ;;  %4348 = vmatmul.msk.bf16.gmra.mxu1 %vm686_vm4, %v677_v38  ;;  %v539_v49 = vsel %vm5121_vm3, %v534_v40, %v538_v16  ;;  %v325_v51 = vshrl.u32 %v206_v37, 16  ;;  %v328_v52 = vshll.u32 %v206_v37, 16  ;;  %v4585_v38 = vld [vmem:[%s5109_s5 + $0x14] sm:$0x1] }
  0x59   : > { %v661_v53 = vunpack.c.l.b16 %v539_v49  ;;  %v620_v54 = vrot.slane %v619_v45, 4  ;;  %v629_v55 = vor.u32 %v628_v46, %v624_v41  ;;  %v334_v2 = vshll.u32 %v5272_v42, 16  ;;  %v4858_v45 = vld [vmem:[%s6527_s2 + $0xe] sm:$0x3] }
  0x5a   : > { %v327_v57 = vrot.slane %v325_v51, 4  ;;  %v330_v58 = vrot.slane %v328_v52, 5  ;;  %v338_v59 = vshrl.u32 %v5272_v42, 16  ;;  %v344_v60 = vshll.u32 %v5276_v48, 16  ;;  %v4927_v51 = vld [vmem:[%s5109_s5] sm:$0xff] }
  0x5b   : > { %v681_v62 = vpack.c.b16 %v661_v53, %v660_v44  ;;  %v625_v3 = vsel %vm5121_vm3, %v620_v54, %v624_v41  ;;  %v630_v4 = vrot.slane %v629_v55, 4  ;;  %v336_v5 = vrot.slane %v334_v2, 5  ;;  %v4907_v2 = vld [vmem:[%s6527_s2 + $0x10] sm:$0x3] }
  0x5c   : > { %v668_v7 = vunpack.c.l.b16 %v625_v3  ;;  %v331_v8 = vor.u32 %v330_v58, %v327_v57  ;;  %v340_v9 = vrot.slane %v338_v59, 4  ;;  %v346_v10 = vrot.slane %v344_v60, 5 }
  0x5d   : > { %4352 = vmatmul.msk.bf16.gmra.mxu2 %vm686_vm4, %v681_v62  ;;  %v635_v13 = vsel %vm5121_vm3, %v630_v4, %v634_v50  ;;  %v4437_v14 = vrot.slane %v1048_v61, 9  ;;  %v1101_v19 = vrot.slane %v5134_v1, 5  ;;  %v2936_v22 = vsel %vm735_vm0, %v4729_v11, 0  ;;  %v4680_v50 = vld [vmem:[%s6527_s2 + $0xa] sm:$0x3] }
  0x5e   : > { %v669_v15 = vunpack.c.l.b16 %v635_v13  ;;  %v332_v16 = vrot.slane %v331_v8, 4  ;;  %v341_v17 = vor.u32 %v340_v9, %v336_v5  ;;  %v1769_v23 = vshrl.u32 %v4583_v6, 16  ;;  %2945 = vmatpush.bf16.msra.mxu2 %v2936_v22  ;;  %v1049_v8 = vld [vmem:[%s5109_s5 + $0xc] sm:$0xe] }
  0x5f   : > { %v1772_v24 = vshll.u32 %v4583_v6, 16  ;;  %v1778_v26 = vshll.u32 %v4584_v12, 16  ;;  %v1102_v33 = vsel %vm5295_vm7, %v4437_v14, %v1101_v19  ;;  %v1103_v35 = vrot.slane %v1101_v19, 4  ;;  %v4587_v6 = vld [vmem:[%s5109_s5 + $0x1c] sm:$0xf] }
  0x60   : > { %v685_v29 = vpack.c.b16 %v669_v15, %v668_v7  ;;  %v337_v30 = vsel %vm5121_vm3, %v332_v16, %v336_v5  ;;  %v342_v31 = vrot.slane %v341_v17, 4  ;;  %v1213_v37 = vunpack.c.l.b16 %v1102_v33  ;;  %v4586_v5 = vld [vmem:[%s5109_s5 + $0x18] sm:$0xf]  ;;  %v4943_v15 = vld [vmem:[%s5109_s5 + $0xc] sm:$0xff] }
  0x61   : > { %v644_v34 = vunpack.c.l.b16 %v337_v30  ;;  %v1771_v1 = vrot.slane %v1769_v23, 4  ;;  %v1774_v40 = vrot.slane %v1772_v24, 5  ;;  %v1780_v41 = vrot.slane %v1778_v26, 5  ;;  %v4588_v30 = vld [vmem:[%s5109_s5 + $0x20] sm:$0x1] }
  0x62   : > { %4356 = vmatmul.msk.bf16.gmra.mxu3 %vm686_vm4, %v685_v29  ;;  %v347_v39 = vsel %vm5121_vm3, %v342_v31, %v346_v10  ;;  %v1782_v44 = vshrl.u32 %v4584_v12, 16  ;;  %v1105_v49 = vsel %vm5295_vm7, %v1103_v35, %v1104_v43  ;;  %v1788_v55 = vshll.u32 %v4585_v38, 16  ;;  %v4928_v35 = vld [vmem:[%s5109_s5 + $0xc] sm:$0xff] }
  0x63   : > { %v645_v46 = vunpack.c.l.b16 %v347_v39  ;;  %v1214_v52 = vunpack.c.l.b16 %v1105_v49  ;;  %v1775_v53 = vor.u32 %v1774_v40, %v1771_v1  ;;  %v3590_v58 = vsel %vm735_vm0, %v4858_v45, 0 }
  0x64   : > { %v1784_v54 = vrot.slane %v1782_v44, 4  ;;  %3599 = vmatpush.bf16.msra.mxu3 %v3590_v58  ;;  %v2649_v60 = vsel %vm735_vm0, %v4680_v50, 0  ;;  %v3988_v61 = vsel %vm735_vm0, %v4907_v2, 0  ;;  %v1790_v4 = vrot.slane %v1788_v55, 5  ;;  %v1050_v50 = vld [vmem:[%s5109_s5 + $0x18] sm:$0xe] }
  0x65   : > { %v673_v57 = vpack.c.b16 %v645_v46, %v644_v34  ;;  %v1245_v43 = vpack.c.b16 %v1214_v52, %v1213_v37  ;;  %2658 = vmatpush.bf16.msra.mxu1 %v2649_v60  ;;  %v1776_v62 = vrot.slane %v1775_v53, 4  ;;  %3997 = vmatpush.bf16.msra.mxu0 %v3988_v61  ;;  %v1108_v7 = vrot.slane %v5180_v28, 5  ;;  %v4590_v46 = vld [vmem:[%s5109_s5 + $0x28] sm:$0xf] }
  0x66   : > { %v1785_v59 = vor.u32 %v1784_v54, %v1780_v41  ;;  %v1793_v9 = vshrl.u32 %v4586_v5, 16  ;;  %v1796_v10 = vshll.u32 %v4586_v5, 16  ;;  %v1802_v13 = vshll.u32 %v4587_v6, 16 }
  0x67   : > { %4344 = vmatmul.msk.bf16.gmra.mxu0 %vm686_vm4, %v673_v57  ;;  %v1781_v11 = vsel %vm5121_vm3, %v1776_v62, %v1780_v41  ;;  %v1806_v14 = vshrl.u32 %v4587_v6, 16  ;;  %v4438_v16 = vrot.slane %v1049_v8, 9  ;;  %v1110_v17 = vrot.slane %v1108_v7, 4  ;;  %v4589_v41 = vld [vmem:[%s5109_s5 + $0x24] sm:$0xf] }
  0x68   : > { %4421 = vmatmul.msk.bf16.vlgmr.msrb.gmra.mxu1 %vm686_vm4, %v4927_v51  ;;  %v1786_v3 = vrot.slane %v1785_v59, 4  ;;  %v1111_v28 = vrot.slane %v5183_v32, 5  ;;  %v2154_v19 = vunpack.c.l.b16 %v1781_v11  ;;  %v1795_v23 = vrot.slane %v1793_v9, 4  ;;  %v4591_v6 = vld [vmem:[%s5109_s5 + $0x2c] sm:$0x1] }
  0x69   : > { %v1798_v24 = vrot.slane %v1796_v10, 5  ;;  %v1804_v26 = vrot.slane %v1802_v13, 5  ;;  %v1808_v29 = vrot.slane %v1806_v14, 4  ;;  %v1109_v31 = vsel %vm5295_vm7, %v4438_v16, %v1108_v7 }
  0x6a   : > { %v1791_v12 = vsel %vm5121_vm3, %v1786_v3, %v1790_v4  ;;  %v1112_v33 = vsel %vm5295_vm7, %v1110_v17, %v1111_v28  ;;  %v1812_v38 = vshll.u32 %v4588_v30, 16  ;;  %v1215_v1 = vunpack.c.l.b16 %v1109_v31 }
  0x6b   : > { %v2155_v22 = vunpack.c.l.b16 %v1791_v12  ;;  %v1799_v32 = vor.u32 %v1798_v24, %v1795_v23  ;;  %v1809_v37 = vor.u32 %v1808_v29, %v1804_v26  ;;  %v1216_v39 = vunpack.c.l.b16 %v1112_v33  ;;  %v4929_v12 = vld [vmem:[%s5109_s5 + $0x18] sm:$0xff]  ;;  %v1051_v29 = vld [vmem:[%s5109_s5 + $0x24] sm:$0xe] }
  0x6c   : > { %v1814_v45 = vrot.slane %v1812_v38, 5  ;;  %v1115_v51 = vrot.slane %v5226_v63, 5  ;;  %v1817_v52 = vshrl.u32 %v4589_v41, 16  ;;  %v1820_v54 = vshll.u32 %v4589_v41, 16 }
  0x6d   : > { %4454 = vmatmul.msk.bf16.vlgmr.msrb.gmra.mxu2 %vm686_vm4, %v1245_v43  ;;  %v2186_v34 = vpack.c.b16 %v2155_v22, %v2154_v19  ;;  %v1800_v40 = vrot.slane %v1799_v32, 4  ;;  %v1810_v44 = vrot.slane %v1809_v37, 4  ;;  %v1246_v49 = vpack.c.b16 %v1216_v39, %v1215_v1  ;;  %v4944_v43 = vld [vmem:[%s5109_s5 + $0x18] sm:$0xff]  ;;  %v4592_v19 = vld [vmem:[%s5109_s5 + $0x30] sm:$0xf]  ;;  %v4945_v32 = vld [vmem:[%s5109_s5 + $0x24] sm:$0xff] }
  0x6e   : > { %v1826_v55 = vshll.u32 %v4590_v46, 16  ;;  %v1830_v2 = vshrl.u32 %v4590_v46, 16  ;;  %v4439_v58 = vrot.slane %v1050_v50, 9  ;;  %v1117_v60 = vrot.slane %v1115_v51, 4  ;;  %v4593_v22 = vld [vmem:[%s5109_s5 + $0x34] sm:$0xf] }
  0x6f   : > { %v1805_v53 = vsel %vm5121_vm3, %v1800_v40, %v1804_v26  ;;  %v1815_v57 = vsel %vm5121_vm3, %v1810_v44, %v1814_v45  ;;  %v1118_v63 = vrot.slane %v5229_v0, 5  ;;  %v1819_v61 = vrot.slane %v1817_v52, 4  ;;  %v4594_v45 = vld [vmem:[%s5109_s5 + $0x38] sm:$0x1] }
  0x70   : > { %v2156_v59 = vunpack.c.l.b16 %v1805_v53  ;;  %v2157_v62 = vunpack.c.l.b16 %v1815_v57  ;;  %v1822_v3 = vrot.slane %v1820_v54, 5  ;;  %v1828_v4 = vrot.slane %v1826_v55, 5  ;;  %v4596_v57 = vld [vmem:[%s5109_s5 + $0x40] sm:$0xf] }
  0x71   : > { %v1832_v5 = vrot.slane %v1830_v2, 4  ;;  %v1116_v7 = vsel %vm5295_vm7, %v4439_v58, %v1115_v51  ;;  %v1119_v8 = vsel %vm5295_vm7, %v1117_v60, %v1118_v63  ;;  %v1836_v0 = vshll.u32 %v4591_v6, 16  ;;  %v4595_v2 = vld [vmem:[%s5109_s5 + $0x3c] sm:$0xf]  ;;  %v4988_v63 = vld [vmem:[%s5109_s5 + $0x34] sm:$0xf] }
  0x72   : > { %4567 = vmatmul.msk.bf16.vlgmr.msrb.gmra.mxu3 %vm686_vm4, %v4943_v15  ;;  %v2187_v9 = vpack.c.b16 %v2157_v62, %v2156_v59  ;;  %v1823_v10 = vor.u32 %v1822_v3, %v1819_v61  ;;  %v1217_v13 = vunpack.c.l.b16 %v1116_v7  ;;  %v1218_v14 = vunpack.c.l.b16 %v1119_v8  ;;  %v1052_v62 = vld [vmem:[%s5109_s5 + $0x30] sm:$0xe] }
  0x73   : > { %v1833_v11 = vor.u32 %v1832_v5, %v1828_v4  ;;  %v1838_v17 = vrot.slane %v1836_v0, 5  ;;  %v1122_v23 = vrot.slane %v5272_v42, 5  ;;  %v1841_v30 = vshrl.u32 %v4592_v19, 16  ;;  %v4989_v0 = vld [vmem:[%s5109_s5 + $0x38] sm:$0x1] }
  0x74   : > { %v1824_v15 = vrot.slane %v1823_v10, 4  ;;  %v1247_v28 = vpack.c.b16 %v1218_v14, %v1217_v13  ;;  %v1844_v31 = vshll.u32 %v4592_v19, 16  ;;  %v1850_v33 = vshll.u32 %v4593_v22, 16  ;;  %v4946_v13 = vld [vmem:[%s5109_s5 + $0x30] sm:$0xff] }
  0x75   : > { %v1834_v16 = vrot.slane %v1833_v11, 4  ;;  %v1124_v37 = vrot.slane %v1122_v23, 4  ;;  %v1125_v42 = vrot.slane %v5276_v48, 5  ;;  %v1843_v39 = vrot.slane %v1841_v30, 4  ;;  %v4930_v48 = vld [vmem:[%s5109_s5 + $0x24] sm:$0xff] }
  0x76   : > { %v1829_v24 = vsel %vm5121_vm3, %v1824_v15, %v1828_v4  ;;  %v1846_v40 = vrot.slane %v1844_v31, 5  ;;  %v1852_v41 = vrot.slane %v1850_v33, 5  ;;  %v1860_v53 = vshll.u32 %v4594_v45, 16  ;;  %v4931_v33 = vld [vmem:[%s5109_s5 + $0x30] sm:$0xff] }
  0x77   : > { %4632 = vmatmul.msk.bf16.vlgmr.msrb.gmra.mxu0 %vm686_vm4, %v2186_v34  ;;  %v1839_v26 = vsel %vm5121_vm3, %v1834_v16, %v1838_v17  ;;  %v1854_v34 = vshrl.u32 %v4593_v22, 16  ;;  %v2158_v38 = vunpack.c.l.b16 %v1829_v24  ;;  %v1129_v61 = vrot.slane %v4988_v63, 5  ;;  %v4597_v22 = vld [vmem:[%s5109_s5 + $0x44] sm:$0x1] }
  0x78   : > { %4422 = vmatmul.msk.bf16.gmra.mxu1 %vm686_vm4, %v4928_v35  ;;  %v4440_v35 = vrot.slane %v1051_v29, 9  ;;  %v2159_v1 = vunpack.c.l.b16 %v1839_v26  ;;  %v1847_v51 = vor.u32 %v1846_v40, %v1843_v39  ;;  %v1862_v59 = vrot.slane %v1860_v53, 5  ;;  %v4598_v39 = vld [vmem:[%s5109_s5 + $0x48] sm:$0xf]  ;;  %v4599_v40 = vld [vmem:[%s5109_s5 + $0x4c] sm:$0xf] }
  0x79   : > { %v1856_v44 = vrot.slane %v1854_v34, 4  ;;  %v1865_v3 = vshrl.u32 %v4595_v2, 16  ;;  %v1868_v4 = vshll.u32 %v4595_v2, 16  ;;  %v1874_v5 = vshll.u32 %v4596_v57, 16  ;;  %v4947_v2 = vld [vmem:[%s5109_s5 + $0x3c] sm:$0xff] }
  0x7a   : > { %v1123_v46 = vsel %vm5295_vm7, %v4440_v35, %v1122_v23  ;;  %v2188_v50 = vpack.c.b16 %v2159_v1, %v2158_v38  ;;  %v1848_v58 = vrot.slane %v1847_v51, 4  ;;  %v1878_v6 = vshrl.u32 %v4596_v57, 16 }
  0x7b   : > { %v1857_v52 = vor.u32 %v1856_v44, %v1852_v41  ;;  %v1219_v54 = vunpack.c.l.b16 %v1123_v46  ;;  %v4441_v10 = vrot.slane %v1052_v62, 9  ;;  %v1131_v11 = vrot.slane %v1129_v61, 4 }
  0x7c   : > { %v1853_v8 = vsel %vm5121_vm3, %v1848_v58, %v1852_v41  ;;  %v1867_v14 = vrot.slane %v1865_v3, 4  ;;  %v1870_v15 = vrot.slane %v1868_v4, 5  ;;  %v1876_v16 = vrot.slane %v1874_v5, 5  ;;  %v4600_v4 = vld [vmem:[%s5109_s5 + $0x50] sm:$0x1] }
  0x7d   : > { %4455 = vmatmul.msk.bf16.gmra.mxu2 %vm686_vm4, %v1246_v49  ;;  %v1126_v49 = vsel %vm5295_vm7, %v1124_v37, %v1125_v42  ;;  %v1880_v17 = vrot.slane %v1878_v6, 4  ;;  %v1130_v23 = vsel %vm5295_vm7, %v4441_v10, %v1129_v61  ;;  %v1884_v30 = vshll.u32 %v4597_v22, 16 }
  0x7e   : > { %v1220_v55 = vunpack.c.l.b16 %v1126_v49  ;;  %v1871_v26 = vor.u32 %v1870_v15, %v1867_v14  ;;  %v1889_v51 = vshrl.u32 %v4598_v39, 16  ;;  %v1898_v53 = vshll.u32 %v4599_v40, 16 }
  0x7f   : > { %v1881_v29 = vor.u32 %v1880_v17, %v1876_v16  ;;  %v1886_v1 = vrot.slane %v1884_v30, 5 }
  0x80   : > { %v1248_v60 = vpack.c.b16 %v1220_v55, %v1219_v54  ;;  %v1872_v42 = vrot.slane %v1871_v26, 4  ;;  %v1902_v54 = vshrl.u32 %v4599_v40, 16  ;;  %v1900_v62 = vrot.slane %v1898_v53, 5 }
  0x81   : > { %v1882_v38 = vrot.slane %v1881_v29, 4  ;;  %v1143_v26 = vrot.slane %v5193_v47, 5 }
  0x82   : > { %4568 = vmatmul.msk.bf16.gmra.mxu3 %vm686_vm4, %v4944_v43  ;;  %v1858_v43 = vrot.slane %v1857_v52, 4  ;;  %v1877_v45 = vsel %vm5121_vm3, %v1872_v42, %v1876_v16  ;;  %v1892_v52 = vshll.u32 %v4598_v39, 16  ;;  %v1904_v3 = vrot.slane %v1902_v54, 4  ;;  %v4603_v54 = vld [vmem:[%s5109_s5 + $0x5c] sm:$0x1] }
  0x83   : > { %v1887_v46 = vsel %vm5121_vm3, %v1882_v38, %v1886_v1  ;;  %v2162_v55 = vunpack.c.l.b16 %v1877_v45  ;;  %v4948_v1 = vld [vmem:[%s5109_s5 + $0x48] sm:$0xff]  ;;  %v1145_v40 = vrot.slane %v1143_v26, 4 }
  0x84   : > { %v2163_v57 = vunpack.c.l.b16 %v1887_v46  ;;  %v1894_v61 = vrot.slane %v1892_v52, 5  ;;  %v1905_v10 = vor.u32 %v1904_v3, %v1900_v62 }
  0x86   : > { %v1906_v16 = vrot.slane %v1905_v10, 4 }
  0x87   : > { %4633 = vmatmul.msk.bf16.gmra.mxu0 %vm686_vm4, %v2187_v9  ;;  %v1863_v9 = vsel %vm5121_vm3, %v1858_v43, %v1862_v59 }
  0x88   : > { %4423 = vmatmul.msk.bf16.gmra.mxu1 %vm686_vm4, %v4929_v12  ;;  %v1132_v12 = vrot.slane %v4989_v0, 5  ;;  %v2161_v19 = vunpack.c.l.b16 %v1863_v9 }
  0x8a   : > { %v1133_v24 = vsel %vm5295_vm7, %v1131_v11, %v1132_v12  ;;  %v1908_v11 = vshll.u32 %v4600_v4, 16  ;;  %v4932_v12 = vld [vmem:[%s5109_s5 + $0x3c] sm:$0xff] }
  0x8b   : > { %v1222_v35 = vunpack.c.l.b16 %v1133_v24  ;;  %v4602_v24 = vld [vmem:[%s5109_s5 + $0x58] sm:$0xf]  ;;  %v4604_v4 = vld [vmem:[%s5109_s5 + $0x60] sm:$0xf] }
  0x8c   : > { %v1910_v17 = vrot.slane %v1908_v11, 5  ;;  %v1926_v42 = vshrl.u32 %v4602_v24, 16 }
  0x8d   : > { %4456 = vmatmul.msk.bf16.gmra.mxu2 %vm686_vm4, %v1247_v28  ;;  %v2160_v28 = vunpack.c.l.b16 %v1853_v8  ;;  %v2190_v8 = vpack.c.b16 %v2163_v57, %v2162_v55 }
  0x8e   : > { %v1911_v30 = vsel %vm5121_vm3, %v1906_v16, %v1910_v17  ;;  %v1928_v52 = vrot.slane %v1926_v42, 4 }
  0x8f   : > { %v2189_v31 = vpack.c.b16 %v2161_v19, %v2160_v28  ;;  %v2165_v46 = vunpack.c.l.b16 %v1911_v30 }
  0x92   : > { %4569 = vmatmul.msk.bf16.gmra.mxu3 %vm686_vm4, %v4945_v32  ;;  %v1221_v32 = vunpack.c.l.b16 %v1130_v23  ;;  %v4601_v23 = vld [vmem:[%s5109_s5 + $0x54] sm:$0xf] }
  0x94   : > { %v1249_v44 = vpack.c.b16 %v1222_v35, %v1221_v32  ;;  %v1916_v32 = vshll.u32 %v4601_v23, 16  ;;  %v1922_v35 = vshll.u32 %v4602_v24, 16 }
  0x97   : > { %4634 = vmatmul.msk.bf16.gmra.mxu0 %vm686_vm4, %v2188_v50  ;;  %v1136_v50 = vrot.slane %v5149_v20, 5  ;;  %v1891_v20 = vrot.slane %v1889_v51, 4  ;;  %v1924_v51 = vrot.slane %v1922_v35, 5  ;;  %v1153_v35 = vrot.slane %v5244_v27, 5 }
  0x98   : > { %4424 = vmatmul.msk.bf16.gmra.mxu1 %vm686_vm4, %v4930_v48  ;;  %v1053_v48 = vld [vmem:[%s5109_s5 + $0x3c] sm:$0xe] }
  0x99   : > { %v4442_v43 = vrot.slane %v1053_v48, 9  ;;  %v1138_v59 = vrot.slane %v1136_v50, 4  ;;  %v1918_v48 = vrot.slane %v1916_v32, 5 }
  0x9b   : > { %v1137_v5 = vsel %vm5295_vm7, %v4442_v43, %v1136_v50  ;;  %v4933_v43 = vld [vmem:[%s5109_s5 + $0x48] sm:$0xff] }
  0x9d   : > { %v5390_v7 = vpop.f32.mrf.mxu1  ;;  %4457 = vmatmul.msk.bf16.gmra.mxu2 %vm686_vm4, %v1248_v60  ;;  %v1139_v60 = vrot.slane %v5154_v25, 5  ;;  %v1895_v25 = vor.u32 %v1894_v61, %v1891_v20  ;;  %v1932_v20 = vshll.u32 %v4603_v54, 16  ;;  %v4934_v54 = vld [vmem:[%s5109_s5 + $0x54] sm:$0xff] }
  0x9f   : > { %v1140_v6 = vsel %vm5295_vm7, %v1138_v59, %v1139_v60  ;;  %v1896_v15 = vrot.slane %v1895_v25, 4  ;;  %v1929_v60 = vor.u32 %v1928_v52, %v1924_v51  ;;  %v1934_v10 = vrot.slane %v1932_v20, 5 }
  0xa0   : > { %v1224_v14 = vunpack.c.l.b16 %v1140_v6 }
  0xa1   : > { %v1901_v29 = vsel %vm5121_vm3, %v1896_v15, %v1900_v62  ;;  %v1930_v25 = vrot.slane %v1929_v60, 4  ;;  %v1150_v15 = vrot.slane %v5239_v21, 5 }
  0xa2   : > { %4570 = vmatmul.msk.bf16.gmra.mxu3 %vm686_vm4, %v4946_v13  ;;  %v1223_v13 = vunpack.c.l.b16 %v1137_v5  ;;  %v2164_v45 = vunpack.c.l.b16 %v1901_v29  ;;  %v4605_v5 = vld [vmem:[%s5109_s5 + $0x64] sm:$0xf] }
  0xa3   : > { %v1950_v16 = vshrl.u32 %v4605_v5, 16  ;;  %v1935_v24 = vsel %vm5121_vm3, %v1930_v25, %v1934_v10  ;;  %v1152_v32 = vrot.slane %v1150_v15, 4  ;;  %v4990_v10 = vld [vmem:[%s5109_s5 + $0x64] sm:$0xf] }
  0xa4   : > { %v1250_v19 = vpack.c.b16 %v1224_v14, %v1223_v13  ;;  %v2191_v57 = vpack.c.b16 %v2165_v46, %v2164_v45  ;;  %v1940_v13 = vshll.u32 %v4604_v4, 16  ;;  %v1946_v14 = vshll.u32 %v4605_v5, 16 }
  0xa5   : > { %v5406_v34 = vpop.f32.mrf.mxu1  ;;  %v1952_v42 = vrot.slane %v1950_v16, 4 }
  0xa6   : > { %v1942_v30 = vrot.slane %v1940_v13, 5  ;;  %v1056_v13 = vld [vmem:[%s5109_s5 + $0x60] sm:$0xe] }
  0xa7   : > { %v5408_v37 = vpop.f32.mrf.mxu2  ;;  %4635 = vmatmul.msk.bf16.gmra.mxu0 %vm686_vm4, %v2189_v31  ;;  %v1054_v31 = vld [vmem:[%s5109_s5 + $0x48] sm:$0xe] }
  0xa8   : > { %4425 = vmatmul.msk.bf16.gmra.mxu1 %vm686_vm4, %v4931_v33  ;;  %v1913_v33 = vshrl.u32 %v4601_v23, 16  ;;  %v4443_v47 = vrot.slane %v1054_v31, 9  ;;  %v1948_v31 = vrot.slane %v1946_v14, 5 }
  0xaa   : > { %v5414_v41 = vpop.f32.mrf.mxu0  ;;  %v1915_v50 = vrot.slane %v1913_v33, 4  ;;  %v4949_v33 = vld [vmem:[%s5109_s5 + $0x54] sm:$0xff]  ;;  %v1953_v27 = vor.u32 %v1952_v42, %v1948_v31 }
  0xab   : > { %v5420_v49 = vpop.f32.mrf.mxu3 }
  0xac   : > { %v1919_v59 = vor.u32 %v1918_v48, %v1915_v50  ;;  %v1154_v48 = vsel %vm5295_vm7, %v1152_v32, %v1153_v35  ;;  %v1954_v60 = vrot.slane %v1953_v27, 4 }
  0xad   : > { %4458 = vmatmul.msk.bf16.gmra.mxu2 %vm686_vm4, %v1249_v44  ;;  %v1146_v44 = vrot.slane %v5198_v56, 5 }
  0xaf   : > { %v5426_v58 = vpop.f32.mrf.mxu1  ;;  %v5429_v63 = vpop.f32.mrf.mxu2  ;;  %v1147_v56 = vsel %vm5295_vm7, %v1145_v40, %v1146_v44  ;;  %v4606_v40 = vld [vmem:[%s5109_s5 + $0x68] sm:$0x1] }
  0xb0   : > { %v1226_v62 = vunpack.c.l.b16 %v1147_v56 }
  0xb2   : > { %4571 = vmatmul.msk.bf16.gmra.mxu3 %vm686_vm4, %v4947_v2  ;;  %v5437_v9 = vpop.f32.mrf.mxu0  ;;  %v1144_v2 = vsel %vm5295_vm7, %v4443_v47, %v1143_v26  ;;  %v2167_v47 = vunpack.c.l.b16 %v1935_v24 }
  0xb3   : > { %v5439_v0 = vpop.f32.mrf.mxu3  ;;  %v1225_v61 = vunpack.c.l.b16 %v1144_v2 }
  0xb5   : > { %v1251_v11 = vpack.c.b16 %v1226_v62, %v1225_v61  ;;  %v4607_v61 = vld [vmem:[%s5109_s5 + $0x6c] sm:$0xf]  ;;  %v4608_v62 = vld [vmem:[%s5109_s5 + $0x70] sm:$0xf] }
  0xb6   : > { %v1961_v14 = vshrl.u32 %v4607_v61, 16  ;;  %v1970_v16 = vshll.u32 %v4608_v62, 16 }
  0xb7   : > { %4636 = vmatmul.msk.bf16.gmra.mxu0 %vm686_vm4, %v2190_v8  ;;  %v5443_v28 = vpop.f32.mrf.mxu1  ;;  %v1920_v8 = vrot.slane %v1919_v59, 4 }
  0xb8   : > { %4426 = vmatmul.msk.bf16.gmra.mxu1 %vm686_vm4, %v4932_v12  ;;  %v1937_v12 = vshrl.u32 %v4604_v4, 16  ;;  %v1963_v35 = vrot.slane %v1961_v14, 4  ;;  %v4611_v14 = vld [vmem:[%s5109_s5 + $0x7c] sm:$0xf] }
  0xb9   : > { %v1925_v23 = vsel %vm5121_vm3, %v1920_v8, %v1924_v51  ;;  %v1956_v51 = vshll.u32 %v4606_v40, 16 }
  0xba   : > { %v5446_v22 = vpop.f32.mrf.mxu2  ;;  %v1939_v29 = vrot.slane %v1937_v12, 4 }
  0xbb   : > { %v1958_v20 = vrot.slane %v1956_v51, 5 }
  0xbc   : > { %v1943_v46 = vor.u32 %v1942_v30, %v1939_v29  ;;  %v4950_v30 = vld [vmem:[%s5109_s5 + $0x60] sm:$0xff] }
  0xbd   : > { %4459 = vmatmul.msk.bf16.gmra.mxu2 %vm686_vm4, %v1250_v19  ;;  %v1055_v19 = vld [vmem:[%s5109_s5 + $0x54] sm:$0xe]  ;;  %v1959_v25 = vsel %vm5121_vm3, %v1954_v60, %v1958_v20 }
  0xbe   : > { %v5456_v38 = vpop.f32.mrf.mxu0  ;;  %v4444_v21 = vrot.slane %v1055_v19, 9  ;;  %v1944_v59 = vrot.slane %v1943_v46, 4  ;;  %v1974_v19 = vshrl.u32 %v4608_v62, 16  ;;  %v4609_v46 = vld [vmem:[%s5109_s5 + $0x74] sm:$0x1] }
  0xbf   : > { %v5460_v39 = vpop.f32.mrf.mxu3 }
  0xc0   : > { %v1151_v50 = vsel %vm5295_vm7, %v4444_v21, %v1150_v15  ;;  %v1949_v8 = vsel %vm5121_vm3, %v1944_v59, %v1948_v31  ;;  %v1964_v15 = vshll.u32 %v4607_v61, 16  ;;  %v4445_v21 = vrot.slane %v1056_v13, 9  ;;  %v4610_v13 = vld [vmem:[%s5109_s5 + $0x78] sm:$0xf] }
  0xc1   : > { %v5463_v53 = vpop.f32.mrf.mxu1  ;;  %v1227_v56 = vunpack.c.l.b16 %v1151_v50  ;;  %v2168_v31 = vunpack.c.l.b16 %v1949_v8 }
  0xc2   : > { %4572 = vmatmul.msk.bf16.gmra.mxu3 %vm686_vm4, %v4948_v1  ;;  %v5467_v55 = vpop.f32.mrf.mxu2  ;;  %v2166_v1 = vunpack.c.l.b16 %v1925_v23  ;;  %v4991_v23 = vld [vmem:[%s5109_s5 + $0x68] sm:$0x1]  ;;  %v1966_v42 = vrot.slane %v1964_v15, 5  ;;  %v4992_v15 = vld [vmem:[%s5109_s5 + $0x70] sm:$0xf] }
  0xc3   : > { %v1160_v24 = vrot.slane %v4991_v23, 5  ;;  %v1057_v23 = vld [vmem:[%s5109_s5 + $0x6c] sm:$0xe] }
  0xc4   : > { %v2192_v52 = vpack.c.b16 %v2167_v47, %v2166_v1  ;;  %v1972_v1 = vrot.slane %v1970_v16, 5  ;;  %v1976_v47 = vrot.slane %v1974_v19, 4  ;;  %v1967_v51 = vor.u32 %v1966_v42, %v1963_v35  ;;  %v4993_v42 = vld [vmem:[%s5109_s5 + $0x74] sm:$0x1] }
  0xc5   : > { %v1164_v16 = vrot.slane %v4992_v15, 5 }
  0xc6   : > { %v5474_v3 = vpop.f32.mrf.mxu0 }
  0xc7   : > { %4637 = vmatmul.msk.bf16.gmra.mxu0 %vm686_vm4, %v2191_v57  ;;  %v5479_v6 = vpop.f32.mrf.mxu3  ;;  %v1228_v57 = vunpack.c.l.b16 %v1154_v48 }
  0xc8   : > { %4427 = vmatmul.msk.bf16.gmra.mxu1 %vm686_vm4, %v4933_v43 }
  0xc9   : > { %v5483_v17 = vpop.f32.mrf.mxu1  ;;  %v1252_v4 = vpack.c.b16 %v1228_v57, %v1227_v56  ;;  %v4935_v57 = vld [vmem:[%s5109_s5 + $0x60] sm:$0xff] }
  0xcd   : > { %v5490_v26 = vpop.f32.mrf.mxu2  ;;  %4460 = vmatmul.msk.bf16.gmra.mxu2 %vm686_vm4, %v1251_v11  ;;  %v1157_v11 = vrot.slane %v4990_v10, 5 }
  0xcf   : > { %v1159_v32 = vrot.slane %v1157_v11, 4  ;;  %v1158_v50 = vsel %vm5295_vm7, %v4445_v21, %v1157_v11  ;;  %v1998_v21 = vshrl.u32 %v4611_v14, 16 }
  0xd0   : > { %v5496_v44 = vpop.f32.mrf.mxu0  ;;  %v1229_v20 = vunpack.c.l.b16 %v1158_v50  ;;  %v4446_v50 = vrot.slane %v1057_v23, 9 }
  0xd1   : > { %v5498_v45 = vpop.f32.mrf.mxu3  ;;  %v1161_v48 = vsel %vm5295_vm7, %v1159_v32, %v1160_v24 }
  0xd2   : > { %4573 = vmatmul.msk.bf16.gmra.mxu3 %vm686_vm4, %v4949_v33  ;;  %v2169_v33 = vunpack.c.l.b16 %v1959_v25  ;;  %v1230_v61 = vunpack.c.l.b16 %v1161_v48  ;;  %v1166_v48 = vrot.slane %v1164_v16, 4 }
  0xd4   : > { %v2193_v27 = vpack.c.b16 %v2169_v33, %v2168_v31  ;;  %v1253_v11 = vpack.c.b16 %v1230_v61, %v1229_v20  ;;  %v1988_v31 = vshll.u32 %v4610_v13, 16  ;;  %v1994_v33 = vshll.u32 %v4611_v14, 16 }
  0xd5   : > { %v5506_v2 = vpop.f32.mrf.mxu1  ;;  %v5508_v43 = vpop.f32.mrf.mxu2  ;;  %v2000_v20 = vrot.slane %v1998_v21, 4 }
  0xd7   : > { %4638 = vmatmul.msk.bf16.gmra.mxu0 %vm686_vm4, %v2192_v52  ;;  %v1977_v52 = vor.u32 %v1976_v47, %v1972_v1  ;;  %v1167_v47 = vrot.slane %v4993_v42, 5 }
  0xd8   : > { %4428 = vmatmul.msk.bf16.gmra.mxu1 %vm686_vm4, %v4934_v54  ;;  %v5514_v5 = vpop.f32.mrf.mxu0  ;;  %v1980_v54 = vshll.u32 %v4609_v46, 16  ;;  %v4951_v46 = vld [vmem:[%s5109_s5 + $0x6c] sm:$0xff] }
  0xd9   : > { %v5521_v12 = vpop.f32.mrf.mxu3  ;;  %v1978_v8 = vrot.slane %v1977_v52, 4 }
  0xda   : > { %v1982_v25 = vrot.slane %v1980_v54, 5 }
  0xdd   : > { %4461 = vmatmul.msk.bf16.gmra.mxu2 %vm686_vm4, %v1252_v4  ;;  %v5526_v29 = vpop.f32.mrf.mxu1  ;;  %v1968_v4 = vrot.slane %v1967_v51, 4 }
  0xdf   : > { %v1973_v19 = vsel %vm5121_vm3, %v1968_v4, %v1972_v1  ;;  %v4612_v4 = vld [vmem:[%s5109_s5 + $0x80] sm:$0x1] }
  0xe0   : > { %v5529_v40 = vpop.f32.mrf.mxu2 }
  0xe2   : > { %4574 = vmatmul.msk.bf16.gmra.mxu3 %vm686_vm4, %v4950_v30  ;;  %v1985_v30 = vshrl.u32 %v4610_v13, 16  ;;  %v4936_v13 = vld [vmem:[%s5109_s5 + $0x6c] sm:$0xff] }
  0xe4   : > { %v5537_v56 = vpop.f32.mrf.mxu0  ;;  %v1987_v54 = vrot.slane %v1985_v30, 4 }
  0xe5   : > { %v5540_v59 = vpop.f32.mrf.mxu3  ;;  %v968_v60 = vpop.f32.mrf.mxu1 }
  0xe6   : > { %v969_v62 = vadd.f32 %v968_v60, %v5414_v41  ;;  %v1983_v41 = vsel %vm5121_vm3, %v1978_v8, %v1982_v25  ;;  %v1996_v60 = vrot.slane %v1994_v33, 5  ;;  %v1165_v8 = vsel %vm5295_vm7, %v4446_v50, %v1164_v16 }
  0xe7   : > { %4639 = vmatmul.msk.bf16.gmra.mxu0 %vm686_vm4, %v2193_v27  ;;  %v2170_v27 = vunpack.c.l.b16 %v1973_v19  ;;  %v2171_v51 = vunpack.c.l.b16 %v1983_v41  ;;  %v2004_v19 = vshll.u32 %v4612_v4, 16 }
  0xe8   : > { %v5544_v10 = vpop.f32.mrf.mxu2  ;;  %4429 = vmatmul.msk.bf16.gmra.mxu1 %vm686_vm4, %v4935_v57  ;;  %v1990_v57 = vrot.slane %v1988_v31, 5  ;;  %v2001_v15 = vor.u32 %v2000_v20, %v1996_v60 }
  0xe9   : > { %v2194_v25 = vpack.c.b16 %v2171_v51, %v2170_v27  ;;  %v2006_v42 = vrot.slane %v2004_v19, 5  ;;  %v4614_v27 = vld [vmem:[%s5109_s5 + $0x88] sm:$0xf]  ;;  %v4994_v51 = vld [vmem:[%s5109_s5 + $0x7c] sm:$0xf] }
  0xea   : > { %v1991_v14 = vor.u32 %v1990_v57, %v1987_v54  ;;  %v1058_v54 = vld [vmem:[%s5109_s5 + $0x78] sm:$0xe] }
  0xec   : > { %v5555_v24 = vpop.f32.mrf.mxu0  ;;  %v1992_v21 = vrot.slane %v1991_v14, 4 }
  0xed   : > { %v5557_v32 = vpop.f32.mrf.mxu3  ;;  %4462 = vmatmul.msk.bf16.gmra.mxu2 %vm686_vm4, %v1253_v11  ;;  %v970_v35 = vpop.f32.mrf.mxu1 }
  0xee   : > { %v971_v1 = vadd.f32 %v970_v35, %v5437_v9  ;;  %v1168_v9 = vsel %vm5295_vm7, %v1166_v48, %v1167_v47  ;;  %v2002_v35 = vrot.slane %v2001_v15, 4  ;;  %v4613_v47 = vld [vmem:[%s5109_s5 + $0x84] sm:$0xf]  ;;  %v4952_v15 = vld [vmem:[%s5109_s5 + $0x78] sm:$0xff] }
  0xef   : > { %v1232_v30 = vunpack.c.l.b16 %v1168_v9  ;;  %v2012_v57 = vshll.u32 %v4613_v47, 16  ;;  %v2022_v9 = vshrl.u32 %v4614_v27, 16 }
  0xf0   : > { %v1321_v52 = vpop.f32.mrf.mxu2  ;;  %v2007_v4 = vsel %vm5121_vm3, %v2002_v35, %v2006_v42 }
  0xf1   : > { %v1401_v61 = vadd.f32 %v1321_v52, %v969_v62  ;;  %v1231_v62 = vunpack.c.l.b16 %v1165_v8  ;;  %v1171_v52 = vrot.slane %v4994_v51, 5  ;;  %v2018_v8 = vshll.u32 %v4614_v27, 16 }
  0xf2   : > { %4575 = vmatmul.msk.bf16.gmra.mxu3 %vm686_vm4, %v4951_v46  ;;  %v2024_v35 = vrot.slane %v2022_v9, 4 }
  0xf3   : > { %v1254_v48 = vpack.c.b16 %v1232_v30, %v1231_v62 }
  0xf4   : > { %v2262_v11 = vpop.f32.mrf.mxu0 }
  0xf5   : > { %v1608_v41 = vpop.f32.mrf.mxu3  ;;  %v973_v23 = vpop.f32.mrf.mxu1 }
  0xf6   : > { %v1688_v31 = vadd.f32 %v1608_v41, %v1401_v61  ;;  %v974_v16 = vadd.f32 %v973_v23, %v5456_v38  ;;  %v2009_v38 = vshrl.u32 %v4613_v47, 16  ;;  %v1997_v61 = vsel %vm5121_vm3, %v1992_v21, %v1996_v60 }
  0xf7   : > { %4640 = vmatmul.msk.bf16.gmra.mxu0 %vm686_vm4, %v2194_v25  ;;  %v4995_v25 = vld [vmem:[%s5109_s5 + $0x80] sm:$0x1]  ;;  %v4447_v41 = vrot.slane %v1058_v54, 9  ;;  %v1173_v23 = vrot.slane %v1171_v52, 4  ;;  %v2172_v62 = vunpack.c.l.b16 %v1997_v61  ;;  %v2173_v60 = vunpack.c.l.b16 %v2007_v4 }
  0xf8   : > { %v1323_v33 = vpop.f32.mrf.mxu2  ;;  %4430 = vmatmul.msk.bf16.gmra.mxu1 %vm686_vm4, %v4936_v13  ;;  %v5574_v46 = vadd.f32 %v2262_v11, %v1688_v31  ;;  %v1174_v11 = vrot.slane %v4995_v25, 5  ;;  %v2011_v30 = vrot.slane %v2009_v38, 4  ;;  %v2014_v31 = vrot.slane %v2012_v57, 5  ;;  %v4937_v38 = vld [vmem:[%s5109_s5 + $0x78] sm:$0xff] }
  0xf9   : > { %v1402_v50 = vadd.f32 %v1323_v33, %v971_v1  ;;  %v2020_v21 = vrot.slane %v2018_v8, 5  ;;  %v2195_v27 = vpack.c.b16 %v2173_v60, %v2172_v62  ;;  %v4617_v62 = vld [vmem:[%s5109_s5 + $0x94] sm:$0xf]  ;;  %v4996_v60 = vld [vmem:[%s5109_s5 + $0x88] sm:$0xf] }
  0xfa   : > { %v2015_v51 = vor.u32 %v2014_v31, %v2011_v30  ;;  %v1178_v30 = vrot.slane %v4996_v60, 5  ;;  %v1059_v31 = vld [vmem:[%s5109_s5 + $0x84] sm:$0xe] }
  0xfb   : > { %v2025_v57 = vor.u32 %v2024_v35, %v2020_v21 }
  0xfc   : > { %v2264_v20 = vpop.f32.mrf.mxu0  ;;  %v2016_v25 = vrot.slane %v2015_v51, 4 }
  0xfd   : > { %v1610_v1 = vpop.f32.mrf.mxu3  ;;  %4463 = vmatmul.msk.bf16.gmra.mxu2 %vm686_vm4, %v1254_v48  ;;  %v975_v13 = vpop.f32.mrf.mxu1  ;;  %v4615_v48 = vld [vmem:[%s5109_s5 + $0x8c] sm:$0x1] }
  0xfe   : > { %v1689_v14 = vadd.f32 %v1610_v1, %v1402_v50  ;;  %v976_v19 = vadd.f32 %v975_v13, %v5474_v3  ;;  %v1172_v50 = vsel %vm5295_vm7, %v4447_v41, %v1171_v52  ;;  %v1175_v3 = vsel %vm5295_vm7, %v1173_v23, %v1174_v11 }
  0xff   : > { %v2028_v61 = vshll.u32 %v4615_v48, 16  ;;  %v1234_v8 = vunpack.c.l.b16 %v1175_v3  ;;  %v2026_v1 = vrot.slane %v2025_v57, 4  ;;  %v2046_v3 = vshrl.u32 %v4617_v62, 16  ;;  %v4953_v57 = vld [vmem:[%s5109_s5 + $0x84] sm:$0xff] }
 0x100   : > { %v1326_v33 = vpop.f32.mrf.mxu2  ;;  %v5587_v42 = vadd.f32 %v2264_v20, %v1689_v14  ;;  %v4616_v14 = vld [vmem:[%s5109_s5 + $0x90] sm:$0xf] }
 0x101   : > { %v1403_v47 = vadd.f32 %v1326_v33, %v974_v16  ;;  %v1233_v16 = vunpack.c.l.b16 %v1172_v50  ;;  %v2030_v13 = vrot.slane %v2028_v61, 5  ;;  %v2033_v33 = vshrl.u32 %v4616_v14, 16 }
 0x102   : > { %4576 = vmatmul.msk.bf16.gmra.mxu3 %vm686_vm4, %v4952_v15  ;;  %v2036_v48 = vshll.u32 %v4616_v14, 16  ;;  %v2042_v50 = vshll.u32 %v4617_v62, 16  ;;  %v4448_v61 = vrot.slane %v1059_v31, 9 }
 0x103   : > { %v1255_v23 = vpack.c.b16 %v1234_v8, %v1233_v16  ;;  %v2035_v8 = vrot.slane %v2033_v33, 4 }
 0x104   : > { %v2267_v54 = vpop.f32.mrf.mxu0 }
 0x105   : > { %v1613_v4 = vpop.f32.mrf.mxu3  ;;  %v978_v20 = vpop.f32.mrf.mxu1 }
 0x106   : > { %v1690_v9 = vadd.f32 %v1613_v4, %v1403_v47  ;;  %v979_v52 = vadd.f32 %v978_v20, %v5496_v44  ;;  %v2021_v44 = vsel %vm5121_vm3, %v2016_v25, %v2020_v21  ;;  %v2031_v47 = vsel %vm5121_vm3, %v2026_v1, %v2030_v13 }
 0x107   : > { %4641 = vmatmul.msk.bf16.gmra.mxu0 %vm686_vm4, %v2195_v27  ;;  %v4997_v27 = vld [vmem:[%s5109_s5 + $0x8c] sm:$0x1]  ;;  %v1180_v4 = vrot.slane %v1178_v30, 4  ;;  %v2174_v20 = vunpack.c.l.b16 %v2021_v44  ;;  %v2175_v16 = vunpack.c.l.b16 %v2031_v47  ;;  %v2038_v25 = vrot.slane %v2036_v48, 5  ;;  %v4938_v44 = vld [vmem:[%s5109_s5 + $0x84] sm:$0xff] }
 0x108   : > { %v1328_v11 = vpop.f32.mrf.mxu2  ;;  %4431 = vmatmul.msk.bf16.gmra.mxu1 %vm686_vm4, %v4937_v38  ;;  %v5600_v15 = vadd.f32 %v2267_v54, %v1690_v9  ;;  %v1181_v51 = vrot.slane %v4997_v27, 5  ;;  %v2048_v1 = vrot.slane %v2046_v3, 4 }
 0x109   : > { %v1404_v41 = vadd.f32 %v1328_v11, %v976_v19  ;;  %v2044_v11 = vrot.slane %v2042_v50, 5  ;;  %v2196_v62 = vpack.c.b16 %v2175_v16, %v2174_v20  ;;  %v2039_v31 = vor.u32 %v2038_v25, %v2035_v8  ;;  %v4620_v20 = vld [vmem:[%s5109_s5 + $0xa0] sm:$0xf]  ;;  %v4998_v16 = vld [vmem:[%s5109_s5 + $0x94] sm:$0xf] }
 0x10a   : > { %v1185_v8 = vrot.slane %v4998_v16, 5 }
 0x10b   : > { %v2049_v33 = vor.u32 %v2048_v1, %v2044_v11 }
 0x10c   : > { %v2269_v35 = vpop.f32.mrf.mxu0 }
 0x10d   : > { %v1615_v19 = vpop.f32.mrf.mxu3  ;;  %4464 = vmatmul.msk.bf16.gmra.mxu2 %vm686_vm4, %v1255_v23  ;;  %v980_v54 = vpop.f32.mrf.mxu1  ;;  %v4618_v23 = vld [vmem:[%s5109_s5 + $0x98] sm:$0x1] }
 0x10e   : > { %v1691_v38 = vadd.f32 %v1615_v19, %v1404_v41  ;;  %v981_v21 = vadd.f32 %v980_v54, %v5514_v5  ;;  %v1179_v41 = vsel %vm5295_vm7, %v4448_v61, %v1178_v30  ;;  %v1182_v5 = vsel %vm5295_vm7, %v1180_v4, %v1181_v51 }
 0x10f   : > { %v2052_v47 = vshll.u32 %v4618_v23, 16  ;;  %v1236_v50 = vunpack.c.l.b16 %v1182_v5  ;;  %v2040_v51 = vrot.slane %v2039_v31, 4  ;;  %v2050_v19 = vrot.slane %v2049_v33, 4  ;;  %v4954_v33 = vld [vmem:[%s5109_s5 + $0x90] sm:$0xff] }
 0x110   : > { %v1331_v9 = vpop.f32.mrf.mxu2  ;;  %v5613_v13 = vadd.f32 %v2269_v35, %v1691_v38  ;;  %v4619_v38 = vld [vmem:[%s5109_s5 + $0x9c] sm:$0xf]  ;;  %v2070_v5 = vshrl.u32 %v4620_v20, 16 }
 0x111   : > { %v1405_v14 = vadd.f32 %v1331_v9, %v979_v52  ;;  %v1235_v52 = vunpack.c.l.b16 %v1179_v41  ;;  %v2054_v54 = vrot.slane %v2052_v47, 5  ;;  %v1060_v9 = vld [vmem:[%s5109_s5 + $0x90] sm:$0xe]  ;;  %v2060_v25 = vshll.u32 %v4619_v38, 16 }
 0x112   : > { %4577 = vmatmul.msk.bf16.gmra.mxu3 %vm686_vm4, %v4953_v57  ;;  %v2066_v41 = vshll.u32 %v4620_v20, 16 }
 0x113   : > { %v1256_v4 = vpack.c.b16 %v1236_v50, %v1235_v52  ;;  %v2055_v23 = vsel %vm5121_vm3, %v2050_v19, %v2054_v54  ;;  %v2072_v19 = vrot.slane %v2070_v5, 4 }
 0x114   : > { %v2272_v60 = vpop.f32.mrf.mxu0 }
 0x115   : > { %v1618_v48 = vpop.f32.mrf.mxu3  ;;  %v983_v35 = vpop.f32.mrf.mxu1 }
 0x116   : > { %v1692_v3 = vadd.f32 %v1618_v48, %v1405_v14  ;;  %v984_v30 = vadd.f32 %v983_v35, %v5537_v56  ;;  %v2057_v56 = vshrl.u32 %v4619_v38, 16  ;;  %v2045_v14 = vsel %vm5121_vm3, %v2040_v51, %v2044_v11 }
 0x117   : > { %4642 = vmatmul.msk.bf16.gmra.mxu0 %vm686_vm4, %v2196_v62  ;;  %v4999_v62 = vld [vmem:[%s5109_s5 + $0x98] sm:$0x1]  ;;  %v4449_v48 = vrot.slane %v1060_v9, 9  ;;  %v1187_v35 = vrot.slane %v1185_v8, 4  ;;  %v2176_v52 = vunpack.c.l.b16 %v2045_v14  ;;  %v2177_v11 = vunpack.c.l.b16 %v2055_v23 }
 0x118   : > { %v1333_v27 = vpop.f32.mrf.mxu2  ;;  %4432 = vmatmul.msk.bf16.gmra.mxu1 %vm686_vm4, %v4938_v44  ;;  %v5626_v57 = vadd.f32 %v2272_v60, %v1692_v3  ;;  %v1188_v60 = vrot.slane %v4999_v62, 5  ;;  %v2059_v50 = vrot.slane %v2057_v56, 4  ;;  %v2062_v3 = vrot.slane %v2060_v25, 5  ;;  %v4939_v56 = vld [vmem:[%s5109_s5 + $0x90] sm:$0xff] }
 0x119   : > { %v1406_v61 = vadd.f32 %v1333_v27, %v981_v21  ;;  %v2068_v51 = vrot.slane %v2066_v41, 5  ;;  %v2197_v20 = vpack.c.b16 %v2177_v11, %v2176_v52  ;;  %v4623_v11 = vld [vmem:[%s5109_s5 + $0xac] sm:$0xf] }
 0x11a   : > { %v2063_v16 = vor.u32 %v2062_v3, %v2059_v50  ;;  %v1061_v50 = vld [vmem:[%s5109_s5 + $0x9c] sm:$0xe] }
 0x11b   : > { %v2073_v25 = vor.u32 %v2072_v19, %v2068_v51 }
 0x11c   : > { %v2274_v1 = vpop.f32.mrf.mxu0 }
 0x11d   : > { %v1620_v21 = vpop.f32.mrf.mxu3  ;;  %4465 = vmatmul.msk.bf16.gmra.mxu2 %vm686_vm4, %v1256_v4  ;;  %v985_v44 = vpop.f32.mrf.mxu1  ;;  %v4621_v4 = vld [vmem:[%s5109_s5 + $0xa4] sm:$0x1] }
 0x11e   : > { %v1693_v31 = vadd.f32 %v1620_v21, %v1406_v61  ;;  %v986_v47 = vadd.f32 %v985_v44, %v5555_v24  ;;  %v1186_v61 = vsel %vm5295_vm7, %v4449_v48, %v1185_v8  ;;  %v1189_v24 = vsel %vm5295_vm7, %v1187_v35, %v1188_v60  ;;  %v4622_v44 = vld [vmem:[%s5109_s5 + $0xa8] sm:$0xf]  ;;  %v5000_v35 = vld [vmem:[%s5109_s5 + $0xa0] sm:$0xf] }
 0x11f   : > { %v2076_v14 = vshll.u32 %v4621_v4, 16  ;;  %v1238_v41 = vunpack.c.l.b16 %v1189_v24  ;;  %v2064_v8 = vrot.slane %v2063_v16, 4  ;;  %v2074_v60 = vrot.slane %v2073_v25, 4 }
 0x120   : > { %v1336_v27 = vpop.f32.mrf.mxu2  ;;  %v5639_v54 = vadd.f32 %v2274_v1, %v1693_v31  ;;  %v1192_v52 = vrot.slane %v5000_v35, 5  ;;  %v2084_v19 = vshll.u32 %v4622_v44, 16  ;;  %v2094_v24 = vshrl.u32 %v4623_v11, 16 }
 0x121   : > { %v1407_v38 = vadd.f32 %v1336_v27, %v984_v30  ;;  %v1237_v30 = vunpack.c.l.b16 %v1186_v61  ;;  %v2078_v21 = vrot.slane %v2076_v14, 5  ;;  %v2069_v3 = vsel %vm5121_vm3, %v2064_v8, %v2068_v51 }
 0x122   : > { %4578 = vmatmul.msk.bf16.gmra.mxu3 %vm686_vm4, %v4954_v33  ;;  %v2081_v27 = vshrl.u32 %v4622_v44, 16  ;;  %v2090_v61 = vshll.u32 %v4623_v11, 16  ;;  %v1194_v25 = vrot.slane %v1192_v52, 4  ;;  %v2178_v51 = vunpack.c.l.b16 %v2069_v3  ;;  %v4624_v11 = vld [vmem:[%s5109_s5 + $0xb0] sm:$0x1]  ;;  %v4940_v3 = vld [vmem:[%s5109_s5 + $0x9c] sm:$0xff] }
 0x123   : > { %v1257_v48 = vpack.c.b16 %v1238_v41, %v1237_v30  ;;  %v2079_v4 = vsel %vm5121_vm3, %v2074_v60, %v2078_v21  ;;  %v2086_v8 = vrot.slane %v2084_v19, 5  ;;  %v2096_v21 = vrot.slane %v2094_v24, 4 }
 0x124   : > { %v2277_v9 = vpop.f32.mrf.mxu0  ;;  %v2179_v41 = vunpack.c.l.b16 %v2079_v4  ;;  %v2092_v60 = vrot.slane %v2090_v61, 5  ;;  %v2100_v4 = vshll.u32 %v4624_v11, 16 }
 0x125   : > { %v1623_v1 = vpop.f32.mrf.mxu3  ;;  %v988_v23 = vpop.f32.mrf.mxu1 }
 0x126   : > { %v1694_v5 = vadd.f32 %v1623_v1, %v1407_v38  ;;  %v4955_v1 = vld [vmem:[%s5109_s5 + $0x9c] sm:$0xff]  ;;  %v989_v30 = vadd.f32 %v988_v23, %v5390_v7  ;;  %v2198_v7 = vpack.c.b16 %v2179_v41, %v2178_v51  ;;  %v2102_v51 = vrot.slane %v2100_v4, 5 }
 0x127   : > { %4643 = vmatmul.msk.bf16.gmra.mxu0 %vm686_vm4, %v2197_v20  ;;  %v5001_v20 = vld [vmem:[%s5109_s5 + $0xa4] sm:$0x1] }
 0x128   : > { %v1338_v62 = vpop.f32.mrf.mxu2  ;;  %4433 = vmatmul.msk.bf16.gmra.mxu1 %vm686_vm4, %v4939_v56  ;;  %v5651_v31 = vadd.f32 %v2277_v9, %v1694_v5  ;;  %v1195_v16 = vrot.slane %v5001_v20, 5  ;;  %v4450_v56 = vrot.slane %v1061_v50, 9  ;;  %v2083_v5 = vrot.slane %v2081_v27, 4 }
 0x129   : > { %v1408_v33 = vadd.f32 %v1338_v62, %v986_v47 }
 0x12a   : > { %v2087_v23 = vor.u32 %v2086_v8, %v2083_v5 }
 0x12c   : > { %v2279_v38 = vpop.f32.mrf.mxu0 }
 0x12d   : > { %v1625_v47 = vpop.f32.mrf.mxu3  ;;  %4466 = vmatmul.msk.bf16.gmra.mxu2 %vm686_vm4, %v1257_v48  ;;  %v990_v9 = vpop.f32.mrf.mxu1  ;;  %v1193_v48 = vsel %vm5295_vm7, %v4450_v56, %v1192_v52  ;;  %v4625_v52 = vld [vmem:[%s5109_s5 + $0xb4] sm:$0xf]  ;;  %v2088_v56 = vrot.slane %v2087_v23, 4 }
 0x12e   : > { %v1695_v14 = vadd.f32 %v1625_v47, %v1408_v33  ;;  %v1196_v33 = vsel %vm5295_vm7, %v1194_v25, %v1195_v16  ;;  %v1239_v27 = vunpack.c.l.b16 %v1193_v48  ;;  %v4626_v47 = vld [vmem:[%s5109_s5 + $0xb8] sm:$0xf]  ;;  %v991_v16 = vadd.f32 %v990_v9, %v5406_v34 }
 0x12f   : > { %v1240_v19 = vunpack.c.l.b16 %v1196_v33  ;;  %v2105_v5 = vshrl.u32 %v4625_v52, 16  ;;  %v2108_v8 = vshll.u32 %v4625_v52, 16  ;;  %v2118_v48 = vshrl.u32 %v4626_v47, 16  ;;  %v1062_v33 = vld [vmem:[%s5109_s5 + $0xa8] sm:$0xe] }
 0x130   : > { %v1341_v62 = vpop.f32.mrf.mxu2  ;;  %v5664_v44 = vadd.f32 %v2279_v38, %v1695_v14  ;;  %v2097_v38 = vor.u32 %v2096_v21, %v2092_v60  ;;  %v5002_v21 = vld [vmem:[%s5109_s5 + $0xac] sm:$0xf]  ;;  %v2093_v9 = vsel %vm5121_vm3, %v2088_v56, %v2092_v60 }
 0x131   : > { %v1409_v35 = vadd.f32 %v1341_v62, %v989_v30  ;;  %v1258_v14 = vpack.c.b16 %v1240_v19, %v1239_v27  ;;  %v2114_v62 = vshll.u32 %v4626_v47, 16  ;;  %v2107_v27 = vrot.slane %v2105_v5, 4 }
 0x132   : > { %4579 = vmatmul.msk.bf16.gmra.mxu3 %vm686_vm4, %v4955_v1  ;;  %v2098_v1 = vrot.slane %v2097_v38, 4  ;;  %v2110_v19 = vrot.slane %v2108_v8, 5  ;;  %v2120_v47 = vrot.slane %v2118_v48, 4  ;;  %v4941_v48 = vld [vmem:[%s5109_s5 + $0xa8] sm:$0xff] }
 0x133   : > { %v2116_v38 = vrot.slane %v2114_v62, 5 }
 0x134   : > { %v2282_v50 = vpop.f32.mrf.mxu0  ;;  %v2103_v11 = vsel %vm5121_vm3, %v2098_v1, %v2102_v51 }
 0x135   : > { %v1628_v61 = vpop.f32.mrf.mxu3  ;;  %v993_v24 = vpop.f32.mrf.mxu1  ;;  %v2181_v56 = vunpack.c.l.b16 %v2103_v11  ;;  %v2121_v8 = vor.u32 %v2120_v47, %v2116_v38 }
 0x136   : > { %v1696_v20 = vadd.f32 %v1628_v61, %v1409_v35  ;;  %v1199_v35 = vrot.slane %v5002_v21, 5  ;;  %v4956_v61 = vld [vmem:[%s5109_s5 + $0xa8] sm:$0xff]  ;;  %v994_v60 = vadd.f32 %v993_v24, %v5426_v58 }
 0x137   : > { %4644 = vmatmul.msk.bf16.gmra.mxu0 %vm686_vm4, %v2198_v7  ;;  %v5003_v7 = vld [vmem:[%s5109_s5 + $0xb0] sm:$0x1] }
 0x138   : > { %v1343_v25 = vpop.f32.mrf.mxu2  ;;  %4434 = vmatmul.msk.bf16.gmra.mxu1 %vm686_vm4, %v4940_v3  ;;  %v5678_v30 = vadd.f32 %v2282_v50, %v1696_v20  ;;  %v1202_v23 = vrot.slane %v5003_v7, 5  ;;  %v4451_v20 = vrot.slane %v1062_v33, 9  ;;  %v1201_v52 = vrot.slane %v1199_v35, 4 }
 0x139   : > { %v1410_v41 = vadd.f32 %v1343_v25, %v991_v16  ;;  %v2180_v16 = vunpack.c.l.b16 %v2093_v9  ;;  %v4627_v25 = vld [vmem:[%s5109_s5 + $0xbc] sm:$0x1] }
 0x13a   : > { %v1203_v5 = vsel %vm5295_vm7, %v1201_v52, %v1202_v23  ;;  %v2124_v58 = vshll.u32 %v4627_v25, 16  ;;  %v4629_v52 = vld [vmem:[%s5109_s5 + $0xc4] sm:$0xf] }
 0x13b   : > { %v2199_v24 = vpack.c.b16 %v2181_v56, %v2180_v16  ;;  %v1242_v11 = vunpack.c.l.b16 %v1203_v5  ;;  %v1063_v16 = vld [vmem:[%s5109_s5 + $0xb4] sm:$0xe]  ;;  %v5005_v56 = vld [vmem:[%s5109_s5 + $0xb8] sm:$0xf]  ;;  %v2142_v5 = vshrl.u32 %v4629_v52, 16 }
 0x13c   : > { %v2284_v34 = vpop.f32.mrf.mxu0  ;;  %v1206_v25 = vrot.slane %v5005_v56, 5 }
 0x13d   : > { %v1630_v50 = vpop.f32.mrf.mxu3  ;;  %4467 = vmatmul.msk.bf16.gmra.mxu2 %vm686_vm4, %v1258_v14  ;;  %v995_v3 = vpop.f32.mrf.mxu1  ;;  %v2111_v14 = vor.u32 %v2110_v19, %v2107_v27  ;;  %v2126_v27 = vrot.slane %v2124_v58, 5  ;;  %v4628_v19 = vld [vmem:[%s5109_s5 + $0xc0] sm:$0xf]  ;;  %v5006_v58 = vld [vmem:[%s5109_s5 + $0x14] sm:$0x1] }
 0x13e   : > { %v1697_v4 = vadd.f32 %v1630_v50, %v1410_v41  ;;  %v1200_v41 = vsel %vm5295_vm7, %v4451_v20, %v1199_v35  ;;  %v2122_v35 = vrot.slane %v2121_v8, 4  ;;  %v996_v23 = vadd.f32 %v995_v3, %v5443_v28 }
 0x13f   : > { %v1241_v9 = vunpack.c.l.b16 %v1200_v41  ;;  %v2112_v50 = vrot.slane %v2111_v14, 4  ;;  %v2129_v3 = vshrl.u32 %v4628_v19, 16  ;;  %v2132_v14 = vshll.u32 %v4628_v19, 16  ;;  %v4957_v19 = vld [vmem:[%s5109_s5 + $0xb4] sm:$0xff] }
 0x140   : > { %v1346_v1 = vpop.f32.mrf.mxu2  ;;  %v5691_v51 = vadd.f32 %v2284_v34, %v1697_v4  ;;  %v5004_v4 = vld [vmem:[%s5109_s5 + $0x10] sm:$0xf]  ;;  %v2127_v28 = vsel %vm5121_vm3, %v2122_v35, %v2126_v27  ;;  %v2138_v41 = vshll.u32 %v4629_v52, 16  ;;  %v1208_v35 = vrot.slane %v1206_v25, 4  ;;  %v4648_v27 = vld [vmem:[%s5109_s5 + $0xc] sm:$0xe] }
 0x141   : > { %v1411_v21 = vadd.f32 %v1346_v1, %v994_v60  ;;  %v1259_v60 = vpack.c.b16 %v1242_v11, %v1241_v9  ;;  %v5007_v9 = vld [vmem:[%s5109_s5 + $0xbc] sm:$0x1]  ;;  %v4664_v52 = vrot.slane %v4648_v27, 9 }
 0x142   : > { %4580 = vmatmul.msk.bf16.gmra.mxu3 %vm686_vm4, %v4956_v61  ;;  %v2440_v61 = vrot.slane %v5004_v4, 5  ;;  %v2131_v4 = vrot.slane %v2129_v3, 4 }
 0x144   : > { %v2287_v62 = vpop.f32.mrf.mxu0  ;;  %v2442_v8 = vrot.slane %v2440_v61, 4 }
 0x145   : > { %v1633_v33 = vpop.f32.mrf.mxu3  ;;  %v998_v34 = vpop.f32.mrf.mxu1 }
 0x146   : > { %v1698_v7 = vadd.f32 %v1633_v33, %v1411_v21  ;;  %v2117_v21 = vsel %vm5121_vm3, %v2112_v50, %v2116_v38  ;;  %v4452_v33 = vrot.slane %v1063_v16, 9  ;;  %v999_v56 = vadd.f32 %v998_v34, %v5463_v53 }
 0x147   : > { %4645 = vmatmul.msk.bf16.gmra.mxu0 %vm686_vm4, %v2199_v24  ;;  %v2443_v24 = vrot.slane %v5006_v58, 5  ;;  %v2182_v38 = vunpack.c.l.b16 %v2117_v21  ;;  %v2140_v16 = vrot.slane %v2138_v41, 5  ;;  %v2144_v58 = vrot.slane %v2142_v5, 4  ;;  %v4630_v21 = vld [vmem:[%s5109_s5 + $0xc8] sm:$0x1] }
 0x148   : > { %v1348_v20 = vpop.f32.mrf.mxu2  ;;  %4435 = vmatmul.msk.bf16.gmra.mxu1 %vm686_vm4, %v4941_v48  ;;  %v5707_v1 = vadd.f32 %v2287_v62, %v1698_v7  ;;  %v1209_v62 = vrot.slane %v5007_v9, 5  ;;  %v2183_v7 = vunpack.c.l.b16 %v2127_v28  ;;  %v2441_v28 = vsel %vm5295_vm7, %v4664_v52, %v2440_v61  ;;  %v4810_v41 = vld [vmem:[%s5109_s5 + $0x18] sm:$0xf] }
 0x149   : > { %v1412_v47 = vadd.f32 %v1348_v20, %v996_v23  ;;  %v2134_v20 = vrot.slane %v2132_v14, 5  ;;  %v2552_v53 = vunpack.c.l.b16 %v2441_v28  ;;  %v2148_v27 = vshll.u32 %v4630_v21, 16 }
 0x14a   : > { %v1210_v14 = vsel %vm5295_vm7, %v1208_v35, %v1209_v62  ;;  %v2200_v5 = vpack.c.b16 %v2183_v7, %v2182_v38  ;;  %v3108_v62 = vshrl.u32 %v4810_v41, 16  ;;  %v3111_v35 = vshll.u32 %v4810_v41, 16 }
 0x14c   : > { %v2289_v48 = vpop.f32.mrf.mxu0  ;;  %v3110_v21 = vrot.slane %v3108_v62, 4 }
 0x14d   : > { %v1635_v11 = vpop.f32.mrf.mxu3  ;;  %4468 = vmatmul.msk.bf16.gmra.mxu2 %vm686_vm4, %v1259_v60  ;;  %v1000_v50 = vpop.f32.mrf.mxu1  ;;  %v1207_v60 = vsel %vm5295_vm7, %v4452_v33, %v1206_v25  ;;  %v5731_v25 = vld [vmem:[%s5109_s5 + $0x1c] sm:$0xf]  ;;  %v2145_v33 = vor.u32 %v2144_v58, %v2140_v16 }
 0x14e   : > { %v1699_v23 = vadd.f32 %v1635_v11, %v1412_v47  ;;  %v2444_v47 = vsel %vm5295_vm7, %v2442_v8, %v2443_v24  ;;  %v2135_v11 = vor.u32 %v2134_v20, %v2131_v4  ;;  %v4942_v24 = vld [vmem:[%s5109_s5 + $0xb4] sm:$0xff]  ;;  %v3121_v38 = vshrl.u32 %v5731_v25, 16 }
 0x14f   : > { %v2553_v34 = vunpack.c.l.b16 %v2444_v47  ;;  %v1001_v4 = vadd.f32 %v1000_v50, %v5483_v17 }
 0x150   : > { %v1351_v9 = vpop.f32.mrf.mxu2  ;;  %v5735_v52 = vadd.f32 %v2289_v48, %v1699_v23  ;;  %v2136_v48 = vrot.slane %v2135_v11, 4  ;;  %v2146_v23 = vrot.slane %v2145_v33, 4  ;;  %v3123_v41 = vrot.slane %v3121_v38, 4 }
 0x151   : > { %v1413_v3 = vadd.f32 %v1351_v9, %v999_v56  ;;  %v5733_v61 = vpack.c.b16 %v2553_v34, %v2552_v53  ;;  %v1243_v56 = vunpack.c.l.b16 %v1207_v60  ;;  %v1244_v9 = vunpack.c.l.b16 %v1210_v14 }
 0x152   : > { %4581 = vmatmul.msk.bf16.gmra.mxu3 %vm686_vm4, %v4957_v19  ;;  %6534 = vst [vmem:[#allocation3_spill] sm:$0xff] %v5735_v52  ;;  %v3117_v19 = vshll.u32 %v5731_v25, 16  ;;  %v2150_v60 = vrot.slane %v2148_v27, 5  ;;  %v3113_v14 = vrot.slane %v3111_v35, 5  ;;  %v2141_v17 = vsel %vm5121_vm3, %v2136_v48, %v2140_v16  ;;  %v4875_v48 = vld [vmem:[%s5109_s5 + $0x18] sm:$0xe] }
 0x153   : > { %v1260_v58 = vpack.c.b16 %v1244_v9, %v1243_v56  ;;  %v4958_v9 = vld [vmem:[%s5109_s5 + $0xc0] sm:$0xff]  ;;  %v2184_v16 = vunpack.c.l.b16 %v2141_v17 }
 0x154   : > { %v2292_v8 = vpop.f32.mrf.mxu0  ;;  %v3119_v34 = vrot.slane %v3117_v19, 5  ;;  %v2151_v50 = vsel %vm5121_vm3, %v2146_v23, %v2150_v60  ;;  %v3114_v27 = vor.u32 %v3113_v14, %v3110_v21  ;;  %v4813_v23 = vld [vmem:[%s5109_s5 + $0x24] sm:$0xf]  ;;  %v5761_v60 = vld [vmem:[%s5109_s5 + $0x28] sm:$0xf] }
 0x155   : > { %v1638_v28 = vpop.f32.mrf.mxu3  ;;  %v1003_v47 = vpop.f32.mrf.mxu1  ;;  %v2185_v35 = vunpack.c.l.b16 %v2151_v50 }
 0x156   : > { %v1700_v7 = vadd.f32 %v1638_v28, %v1413_v3  ;;  %v5746_v3 = vld [vmem:[%s5109_s5 + $0x20] sm:$0x1]  ;;  %v1004_v62 = vadd.f32 %v1003_v47, %v5506_v2  ;;  %v3115_v38 = vrot.slane %v3114_v27, 4  ;;  %v5008_v47 = vld [vmem:[%s5109_s5 + $0x1c] sm:$0xf] }
 0x157   : > { %4646 = vmatmul.msk.bf16.gmra.mxu0 %vm686_vm4, %v2200_v5  ;;  %v2447_v14 = vrot.slane %v5008_v47, 5  ;;  %v4649_v27 = vld [vmem:[%s5109_s5 + $0x18] sm:$0xe] }
 0x158   : > { %v1353_v20 = vpop.f32.mrf.mxu2  ;;  %4436 = vmatmul.msk.bf16.gmra.mxu1 %vm686_vm4, %v4942_v24  ;;  %v5743_v52 = vadd.f32 %v2292_v8, %v1700_v7  ;;  %v3124_v24 = vor.u32 %v3123_v41, %v3119_v34  ;;  %v3127_v8 = vshll.u32 %v5746_v3, 16  ;;  %v3120_v17 = vsel %vm5121_vm3, %v3115_v38, %v3119_v34 }
 0x159   : > { %v1414_v53 = vadd.f32 %v1353_v20, %v1001_v4  ;;  %v2201_v20 = vpack.c.b16 %v2185_v35, %v2184_v16  ;;  %v3782_v34 = vrot.slane %v5746_v3, 5  ;;  %v5009_v16 = vld [vmem:[%s5109_s5 + $0x20] sm:$0x1]  ;;  %v4665_v38 = vrot.slane %v4649_v27, 9 }
 0x15a   : > { %v3125_v7 = vrot.slane %v3124_v24, 4  ;;  %v3129_v4 = vrot.slane %v3127_v8, 5  ;;  %v3132_v24 = vshrl.u32 %v4813_v23, 16  ;;  %v3135_v8 = vshll.u32 %v4813_v23, 16 }
 0x15b   : > { %v2450_v35 = vrot.slane %v5009_v16, 5  ;;  %v2448_v27 = vsel %vm5295_vm7, %v4665_v38, %v2447_v14  ;;  %v4816_v38 = vld [vmem:[%s5109_s5 + $0x30] sm:$0xf] }
 0x15c   : > { %v2294_v5 = vpop.f32.mrf.mxu0  ;;  %v3130_v50 = vsel %vm5121_vm3, %v3125_v7, %v3129_v4  ;;  %v2449_v7 = vrot.slane %v2447_v14, 4  ;;  %v3137_v3 = vrot.slane %v3135_v8, 5 }
 0x15d   : > { %v1640_v11 = vpop.f32.mrf.mxu3  ;;  %4469 = vmatmul.msk.bf16.gmra.mxu2 %vm686_vm4, %v1260_v58  ;;  %v1005_v33 = vpop.f32.mrf.mxu1  ;;  %v3779_v58 = vrot.slane %v5731_v25, 5  ;;  %v3494_v23 = vunpack.c.l.b16 %v3130_v50 }
 0x15e   : > { %v1701_v56 = vadd.f32 %v1640_v11, %v1414_v53  ;;  %v4891_v11 = vrot.slane %v4875_v48, 9  ;;  %v4959_v48 = vld [vmem:[%s5109_s5 + $0x18] sm:$0xff]  ;;  %v2451_v50 = vsel %vm5295_vm7, %v2449_v7, %v2450_v35  ;;  %v5801_v7 = vld [vmem:[%s5109_s5 + $0x34] sm:$0xf] }
 0x160   : > { %v1356_v28 = vpop.f32.mrf.mxu2  ;;  %v5763_v21 = vadd.f32 %v2294_v5, %v1701_v56  ;;  %v3141_v5 = vshll.u32 %v5761_v60, 16  ;;  %v3145_v56 = vshrl.u32 %v5761_v60, 16 }
 0x161   : > { %v1415_v19 = vadd.f32 %v1356_v28, %v1004_v62  ;;  %v3781_v62 = vrot.slane %v3779_v58, 4 }
 0x162   : > { %4582 = vmatmul.msk.bf16.gmra.mxu3 %vm686_vm4, %v4958_v9  ;;  %v1006_v9 = vadd.f32 %v1005_v33, %v5526_v29  ;;  %v3134_v33 = vrot.slane %v3132_v24, 4  ;;  %v5784_v47 = vrot.slane %v3141_v5, 5 }
 0x164   : > { %v2297_v2 = vpop.f32.mrf.mxu0  ;;  %v3138_v5 = vor.u32 %v3137_v3, %v3134_v33  ;;  %v4876_v33 = vld [vmem:[%s5109_s5 + $0x24] sm:$0xe] }
 0x165   : > { %v1643_v53 = vpop.f32.mrf.mxu3  ;;  %v1008_v41 = vpop.f32.mrf.mxu1 }
 0x166   : > { %v1702_v25 = vadd.f32 %v1643_v53, %v1415_v19  ;;  %v3493_v19 = vunpack.c.l.b16 %v3120_v17  ;;  %v3147_v53 = vrot.slane %v3145_v56, 4  ;;  %v1009_v14 = vadd.f32 %v1008_v41, %v5408_v37 }
 0x167   : > { %4647 = vmatmul.msk.bf16.gmra.mxu0 %vm686_vm4, %v2201_v20  ;;  %v3780_v20 = vsel %vm5295_vm7, %v4891_v11, %v3779_v58  ;;  %v3786_v37 = vrot.slane %v5761_v60, 5 }
 0x168   : > { %v1358_v28 = vpop.f32.mrf.mxu2  ;;  %4681 = vmatmul.msk.bf16.vlgmr.msra.gmra.mxu1 %vm686_vm4, %v5733_v61  ;;  %v5782_v29 = vadd.f32 %v2297_v2, %v1702_v25  ;;  %v3783_v61 = vsel %vm5295_vm7, %v3781_v62, %v3782_v34  ;;  %v3525_v2 = vpack.c.b16 %v3494_v23, %v3493_v19  ;;  %v3891_v11 = vunpack.c.l.b16 %v3780_v20 }
 0x169   : > { %v1416_v4 = vadd.f32 %v1358_v28, %v1006_v9  ;;  %v5793_v9 = vld [vmem:[%s5109_s5 + $0x2c] sm:$0x1]  ;;  %v3892_v8 = vunpack.c.l.b16 %v3783_v61  ;;  %v3148_v56 = vor.u32 %v3147_v53, %v5784_v47  ;;  %v2554_v62 = vunpack.c.l.b16 %v2448_v27 }
 0x16a   : > { %v2555_v34 = vunpack.c.l.b16 %v2451_v50  ;;  %v3151_v16 = vshll.u32 %v5793_v9, 16  ;;  %v3156_v53 = vshrl.u32 %v4816_v38, 16  ;;  %v3159_v61 = vshll.u32 %v4816_v38, 16 }
 0x16b   : > { %v3923_v19 = vpack.c.b16 %v3892_v8, %v3891_v11  ;;  %v3165_v27 = vshll.u32 %v5801_v7, 16  ;;  %v3169_v50 = vshrl.u32 %v5801_v7, 16  ;;  %v5010_v11 = vld [vmem:[%s5109_s5 + $0x28] sm:$0xf]  ;;  %v3789_v60 = vrot.slane %v5793_v9, 5 }
 0x16c   : > { %v2299_v17 = vpop.f32.mrf.mxu0  ;;  %v2585_v23 = vpack.c.b16 %v2555_v34, %v2554_v62  ;;  %v3153_v20 = vrot.slane %v3151_v16, 5  ;;  %v2454_v8 = vrot.slane %v5010_v11, 5  ;;  %v4892_v62 = vrot.slane %v4876_v33, 9  ;;  %v4960_v11 = vld [vmem:[%s5109_s5 + $0x24] sm:$0xff] }
 0x16d   : > { %v1645_v58 = vpop.f32.mrf.mxu3  ;;  %4794 = vmatmul.msk.bf16.vlgmr.msra.gmra.mxu2 %vm686_vm4, %v4959_v48  ;;  %v1010_v24 = vpop.f32.mrf.mxu1  ;;  %v3149_v48 = vrot.slane %v3148_v56, 4  ;;  %v3161_v33 = vrot.slane %v3159_v61, 5  ;;  %v5822_v9 = vrot.slane %v3165_v27, 5 }
 0x16e   : > { %v1703_v25 = vadd.f32 %v1645_v58, %v1416_v4  ;;  %v3139_v4 = vrot.slane %v3138_v5, 4  ;;  %v5011_v5 = vld [vmem:[%s5109_s5 + $0x2c] sm:$0x1] }
 0x16f   : > { %v2457_v56 = vrot.slane %v5011_v5, 5  ;;  %v3154_v16 = vsel %vm5121_vm3, %v3149_v48, %v3153_v20  ;;  %v3787_v20 = vsel %vm5295_vm7, %v4892_v62, %v3786_v37 }
 0x170   : > { %v1361_v35 = vpop.f32.mrf.mxu2  ;;  %v5806_v41 = vadd.f32 %v2299_v17, %v1703_v25  ;;  %v4650_v17 = vld [vmem:[%s5109_s5 + $0x24] sm:$0xe]  ;;  %v1011_v25 = vadd.f32 %v1010_v24, %v5429_v63  ;;  %v3144_v34 = vsel %vm5121_vm3, %v3139_v4, %v5784_v47  ;;  %v2456_v24 = vrot.slane %v2454_v8, 4 }
 0x171   : > { %v1417_v28 = vadd.f32 %v1361_v35, %v1009_v14  ;;  %v3788_v35 = vrot.slane %v3786_v37, 4  ;;  %v4666_v63 = vrot.slane %v4650_v17, 9  ;;  %v3495_v47 = vunpack.c.l.b16 %v3144_v34 }
 0x172   : > { %4859 = vmatmul.msk.bf16.vlgmr.msra.gmra.mxu3 %vm686_vm4, %v3525_v2  ;;  %6535 = vst [vmem:[#allocation4_spill] sm:$0xff] %v5806_v41  ;;  %v3496_v4 = vunpack.c.l.b16 %v3154_v16  ;;  %v5828_v41 = vld [vmem:[%s5109_s5 + $0x38] sm:$0x1] }
 0x173   : > { %v3175_v37 = vshll.u32 %v5828_v41, 16 }
 0x174   : > { %v2302_v3 = vpop.f32.mrf.mxu0  ;;  %v3526_v17 = vpack.c.b16 %v3496_v4, %v3495_v47  ;;  %v5012_v4 = vld [vmem:[%s5109_s5 + $0x34] sm:$0xf] }
 0x175   : > { %v1648_v58 = vpop.f32.mrf.mxu3  ;;  %v1013_v2 = vpop.f32.mrf.mxu1 }
 0x176   : > { %v1704_v14 = vadd.f32 %v1648_v58, %v1417_v28  ;;  %v3158_v28 = vrot.slane %v3156_v53, 4  ;;  %v3171_v58 = vrot.slane %v3169_v50, 4  ;;  %v2458_v50 = vsel %vm5295_vm7, %v2456_v24, %v2457_v56  ;;  %v5847_v24 = vld [vmem:[%s5109_s5 + $0x40] sm:$0xf] }
 0x177   : > { %4908 = vmatmul.msk.bf16.vlgmr.msra.gmra.mxu0 %vm686_vm4, %v3923_v19 }
 0x178   : > { %v1363_v38 = vpop.f32.mrf.mxu2  ;;  %4682 = vmatmul.msk.bf16.gmra.mxu1 %vm686_vm4, %v2585_v23  ;;  %v5825_v5 = vadd.f32 %v2302_v3, %v1704_v14  ;;  %v3790_v23 = vsel %vm5295_vm7, %v3788_v35, %v3789_v60  ;;  %v3162_v53 = vor.u32 %v3161_v33, %v3158_v28  ;;  %v2455_v3 = vsel %vm5295_vm7, %v4666_v63, %v2454_v8 }
 0x179   : > { %v1418_v19 = vadd.f32 %v1363_v38, %v1011_v25  ;;  %v3172_v14 = vor.u32 %v3171_v58, %v5822_v9  ;;  %v1014_v60 = vadd.f32 %v1013_v2, %v5446_v22  ;;  %v3893_v25 = vunpack.c.l.b16 %v3787_v20  ;;  %v4877_v58 = vld [vmem:[%s5109_s5 + $0x30] sm:$0xe] }
 0x17a   : > { %v3894_v34 = vunpack.c.l.b16 %v3790_v23  ;;  %v2556_v35 = vunpack.c.l.b16 %v2455_v3  ;;  %v2557_v8 = vunpack.c.l.b16 %v2458_v50  ;;  %v3163_v28 = vrot.slane %v3162_v53, 4 }
 0x17b   : > { %v3173_v56 = vrot.slane %v3172_v14, 4  ;;  %v3177_v33 = vrot.slane %v3175_v37, 5  ;;  %v3793_v63 = vrot.slane %v5801_v7, 5  ;;  %v2461_v20 = vrot.slane %v5012_v4, 5  ;;  %v4651_v7 = vld [vmem:[%s5109_s5 + $0x30] sm:$0xe] }
 0x17c   : > { %v2304_v48 = vpop.f32.mrf.mxu0  ;;  %v2586_v47 = vpack.c.b16 %v2557_v8, %v2556_v35  ;;  %v4893_v50 = vrot.slane %v4877_v58, 9 }
 0x17d   : > { %v1650_v61 = vpop.f32.mrf.mxu3  ;;  %4795 = vmatmul.msk.bf16.gmra.mxu2 %vm686_vm4, %v4960_v11  ;;  %v1015_v27 = vpop.f32.mrf.mxu1  ;;  %v4819_v11 = vld [vmem:[%s5109_s5 + $0x3c] sm:$0xf]  ;;  %v3178_v3 = vsel %vm5121_vm3, %v3173_v56, %v3177_v33  ;;  %v4961_v33 = vld [vmem:[%s5109_s5 + $0x30] sm:$0xff] }
 0x17e   : > { %v1705_v62 = vadd.f32 %v1650_v61, %v1418_v19  ;;  %v3924_v19 = vpack.c.b16 %v3894_v34, %v3893_v25  ;;  %v3168_v61 = vsel %vm5121_vm3, %v3163_v28, %v5822_v9  ;;  %v3180_v14 = vshrl.u32 %v4819_v11, 16  ;;  %v5013_v34 = vld [vmem:[%s5109_s5 + $0x38] sm:$0x1] }
 0x17f   : > { %v3795_v25 = vrot.slane %v3793_v63, 4  ;;  %v3796_v9 = vrot.slane %v5828_v41, 5  ;;  %v3497_v8 = vunpack.c.l.b16 %v3168_v61  ;;  %v2463_v28 = vrot.slane %v2461_v20, 4 }
 0x180   : > { %v1366_v16 = vpop.f32.mrf.mxu2  ;;  %v5849_v22 = vadd.f32 %v2304_v48, %v1705_v62  ;;  %v3183_v48 = vshll.u32 %v4819_v11, 16  ;;  %v3189_v62 = vshll.u32 %v5847_v24, 16  ;;  %v3498_v58 = vunpack.c.l.b16 %v3178_v3 }
 0x181   : > { %v1419_v38 = vadd.f32 %v1366_v16, %v1014_v60  ;;  %v1016_v60 = vadd.f32 %v1015_v27, %v5467_v55  ;;  %v2464_v16 = vrot.slane %v5013_v34, 5  ;;  %v3794_v11 = vsel %vm5295_vm7, %v4893_v50, %v3793_v63 }
 0x182   : > { %4860 = vmatmul.msk.bf16.gmra.mxu3 %vm686_vm4, %v3526_v17  ;;  %v3193_v17 = vshrl.u32 %v5847_v24, 16  ;;  %v3182_v55 = vrot.slane %v3180_v14, 4  ;;  %v3185_v27 = vrot.slane %v3183_v48, 5  ;;  %v5870_v41 = vrot.slane %v3189_v62, 5 }
 0x183   : > { %v2465_v3 = vsel %vm5295_vm7, %v2463_v28, %v2464_v16  ;;  %v3895_v50 = vunpack.c.l.b16 %v3794_v11  ;;  %v4878_v11 = vld [vmem:[%s5109_s5 + $0x3c] sm:$0xe] }
 0x184   : > { %v2307_v2 = vpop.f32.mrf.mxu0  ;;  %v3195_v4 = vrot.slane %v3193_v17, 4  ;;  %v3186_v62 = vor.u32 %v3185_v27, %v3182_v55 }
 0x185   : > { %v1653_v23 = vpop.f32.mrf.mxu3  ;;  %v1018_v53 = vpop.f32.mrf.mxu1 }
 0x186   : > { %v1706_v37 = vadd.f32 %v1653_v23, %v1419_v38  ;;  %v4667_v38 = vrot.slane %v4651_v7, 9  ;;  %v5879_v7 = vld [vmem:[%s5109_s5 + $0x44] sm:$0x1]  ;;  %v3196_v17 = vor.u32 %v3195_v4, %v5870_v41  ;;  %v3187_v28 = vrot.slane %v3186_v62, 4 }
 0x187   : > { %4909 = vmatmul.msk.bf16.gmra.mxu0 %vm686_vm4, %v3924_v19 }
 0x188   : > { %v1368_v35 = vpop.f32.mrf.mxu2  ;;  %4683 = vmatmul.msk.bf16.gmra.mxu1 %vm686_vm4, %v2586_v47  ;;  %v5868_v19 = vadd.f32 %v2307_v2, %v1706_v37  ;;  %v3797_v47 = vsel %vm5295_vm7, %v3795_v25, %v3796_v9  ;;  %v2462_v61 = vsel %vm5295_vm7, %v4667_v38, %v2461_v20  ;;  %v3527_v2 = vpack.c.b16 %v3498_v58, %v3497_v8  ;;  %v5887_v38 = vld [vmem:[%s5109_s5 + $0x4c] sm:$0xf] }
 0x189   : > { %v1420_v56 = vadd.f32 %v1368_v35, %v1016_v60  ;;  %v3896_v48 = vunpack.c.l.b16 %v3797_v47  ;;  %v1019_v20 = vadd.f32 %v1018_v53, %v5490_v26  ;;  %v2558_v60 = vunpack.c.l.b16 %v2462_v61  ;;  %v4822_v35 = vld [vmem:[%s5109_s5 + $0x48] sm:$0xf] }
 0x18a   : > { %v2559_v25 = vunpack.c.l.b16 %v2465_v3  ;;  %v3199_v9 = vshll.u32 %v5879_v7, 16  ;;  %v3800_v26 = vrot.slane %v5847_v24, 5  ;;  %v3204_v27 = vshrl.u32 %v4822_v35, 16 }
 0x18b   : > { %v3925_v8 = vpack.c.b16 %v3896_v48, %v3895_v50  ;;  %v3207_v4 = vshll.u32 %v4822_v35, 16  ;;  %v3213_v47 = vshll.u32 %v5887_v38, 16  ;;  %v3217_v61 = vshrl.u32 %v5887_v38, 16  ;;  %v5015_v48 = vld [vmem:[%s5109_s5 + $0x44] sm:$0x1] }
 0x18c   : > { %v2309_v23 = vpop.f32.mrf.mxu0  ;;  %v3201_v58 = vrot.slane %v3199_v9, 5  ;;  %v2471_v62 = vrot.slane %v5015_v48, 5  ;;  %v3803_v24 = vrot.slane %v5879_v7, 5  ;;  %v3802_v9 = vrot.slane %v3800_v26, 4  ;;  %v5914_v48 = vld [vmem:[%s5109_s5 + $0x50] sm:$0x1] }
 0x18d   : > { %v1655_v63 = vpop.f32.mrf.mxu3  ;;  %4796 = vmatmul.msk.bf16.gmra.mxu2 %vm686_vm4, %v4961_v33  ;;  %v1020_v14 = vpop.f32.mrf.mxu1  ;;  %v2587_v33 = vpack.c.b16 %v2559_v25, %v2558_v60  ;;  %v3192_v60 = vsel %vm5121_vm3, %v3187_v28, %v5870_v41  ;;  %v3209_v35 = vrot.slane %v3207_v4, 5  ;;  %v5908_v7 = vrot.slane %v3213_v47, 5 }
 0x18e   : > { %v1707_v37 = vadd.f32 %v1655_v63, %v1420_v56  ;;  %v3197_v56 = vrot.slane %v3196_v17, 4  ;;  %v3499_v41 = vunpack.c.l.b16 %v3192_v60 }
 0x190   : > { %v1371_v34 = vpop.f32.mrf.mxu2  ;;  %v5892_v53 = vadd.f32 %v2309_v23, %v1707_v37  ;;  %v4652_v23 = vld [vmem:[%s5109_s5 + $0x3c] sm:$0xe]  ;;  %v1021_v37 = vadd.f32 %v1020_v14, %v5508_v43  ;;  %v3202_v25 = vsel %vm5121_vm3, %v3197_v56, %v3201_v58 }
 0x191   : > { %v1421_v16 = vadd.f32 %v1371_v34, %v1019_v20  ;;  %v4894_v20 = vrot.slane %v4878_v11, 9  ;;  %v3219_v11 = vrot.slane %v3217_v61, 4  ;;  %v4668_v43 = vrot.slane %v4652_v23, 9 }
 0x192   : > { %4861 = vmatmul.msk.bf16.gmra.mxu3 %vm686_vm4, %v3527_v2  ;;  %v5014_v2 = vld [vmem:[%s5109_s5 + $0x40] sm:$0xf]  ;;  %v3500_v28 = vunpack.c.l.b16 %v3202_v25 }
 0x193   : > { %v2468_v50 = vrot.slane %v5014_v2, 5  ;;  %v3801_v58 = vsel %vm5295_vm7, %v4894_v20, %v3800_v26  ;;  %v3223_v26 = vshll.u32 %v5914_v48, 16 }
 0x194   : > { %v2312_v55 = vpop.f32.mrf.mxu0  ;;  %v3528_v23 = vpack.c.b16 %v3500_v28, %v3499_v41  ;;  %v5016_v28 = vld [vmem:[%s5109_s5 + $0x4c] sm:$0xf] }
 0x195   : > { %v1658_v3 = vpop.f32.mrf.mxu3  ;;  %v1023_v63 = vpop.f32.mrf.mxu1  ;;  %v2470_v14 = vrot.slane %v2468_v50, 4 }
 0x196   : > { %v1708_v17 = vadd.f32 %v1658_v3, %v1421_v16  ;;  %v3206_v16 = vrot.slane %v3204_v27, 4  ;;  %v4962_v3 = vld [vmem:[%s5109_s5 + $0x3c] sm:$0xff] }
 0x197   : > { %4910 = vmatmul.msk.bf16.gmra.mxu0 %vm686_vm4, %v3925_v8  ;;  %v2472_v61 = vsel %vm5295_vm7, %v2470_v14, %v2471_v62  ;;  %v5933_v14 = vld [vmem:[%s5109_s5 + $0x58] sm:$0xf] }
 0x198   : > { %v1373_v34 = vpop.f32.mrf.mxu2  ;;  %4684 = vmatmul.msk.bf16.gmra.mxu1 %vm686_vm4, %v2587_v33  ;;  %v5911_v2 = vadd.f32 %v2312_v55, %v1708_v17  ;;  %v3804_v33 = vsel %vm5295_vm7, %v3802_v9, %v3803_v24  ;;  %v3210_v27 = vor.u32 %v3209_v35, %v3206_v16  ;;  %v2469_v55 = vsel %vm5295_vm7, %v4668_v43, %v2468_v50 }
 0x199   : > { %v1422_v8 = vadd.f32 %v1373_v34, %v1021_v37  ;;  %v3220_v17 = vor.u32 %v3219_v11, %v5908_v7  ;;  %v1024_v24 = vadd.f32 %v1023_v63, %v5529_v40  ;;  %v3897_v37 = vunpack.c.l.b16 %v3801_v58  ;;  %v4879_v11 = vld [vmem:[%s5109_s5 + $0x48] sm:$0xe] }
 0x19a   : > { %v3898_v60 = vunpack.c.l.b16 %v3804_v33  ;;  %v2560_v9 = vunpack.c.l.b16 %v2469_v55  ;;  %v2561_v50 = vunpack.c.l.b16 %v2472_v61  ;;  %v3211_v16 = vrot.slane %v3210_v27, 4 }
 0x19b   : > { %v3221_v62 = vrot.slane %v3220_v17, 4  ;;  %v3225_v35 = vrot.slane %v3223_v26, 5  ;;  %v3807_v43 = vrot.slane %v5887_v38, 5  ;;  %v2475_v58 = vrot.slane %v5016_v28, 5  ;;  %v4653_v38 = vld [vmem:[%s5109_s5 + $0x48] sm:$0xe] }
 0x19c   : > { %v2314_v56 = vpop.f32.mrf.mxu0  ;;  %v2588_v41 = vpack.c.b16 %v2561_v50, %v2560_v9  ;;  %v4895_v61 = vrot.slane %v4879_v11, 9 }
 0x19d   : > { %v1660_v4 = vpop.f32.mrf.mxu3  ;;  %4797 = vmatmul.msk.bf16.gmra.mxu2 %vm686_vm4, %v4962_v3  ;;  %v1025_v47 = vpop.f32.mrf.mxu1  ;;  %v4825_v3 = vld [vmem:[%s5109_s5 + $0x54] sm:$0xf]  ;;  %v3226_v55 = vsel %vm5121_vm3, %v3221_v62, %v3225_v35  ;;  %v4963_v35 = vld [vmem:[%s5109_s5 + $0x48] sm:$0xff] }
 0x19e   : > { %v1709_v20 = vadd.f32 %v1660_v4, %v1422_v8  ;;  %v3926_v8 = vpack.c.b16 %v3898_v60, %v3897_v37  ;;  %v3216_v4 = vsel %vm5121_vm3, %v3211_v16, %v5908_v7  ;;  %v3228_v17 = vshrl.u32 %v4825_v3, 16  ;;  %v5017_v60 = vld [vmem:[%s5109_s5 + $0x50] sm:$0x1] }
 0x19f   : > { %v3809_v37 = vrot.slane %v3807_v43, 4  ;;  %v3810_v7 = vrot.slane %v5914_v48, 5  ;;  %v3501_v50 = vunpack.c.l.b16 %v3216_v4  ;;  %v2477_v16 = vrot.slane %v2475_v58, 4 }
 0x1a0   : > { %v1376_v25 = vpop.f32.mrf.mxu2  ;;  %v5935_v40 = vadd.f32 %v2314_v56, %v1709_v20  ;;  %v3231_v56 = vshll.u32 %v4825_v3, 16  ;;  %v3237_v20 = vshll.u32 %v5933_v14, 16  ;;  %v3502_v11 = vunpack.c.l.b16 %v3226_v55 }
 0x1a1   : > { %v1423_v34 = vadd.f32 %v1376_v25, %v1024_v24  ;;  %v1026_v24 = vadd.f32 %v1025_v47, %v5544_v10  ;;  %v2478_v25 = vrot.slane %v5017_v60, 5  ;;  %v3808_v3 = vsel %vm5295_vm7, %v4895_v61, %v3807_v43 }
 0x1a2   : > { %4862 = vmatmul.msk.bf16.gmra.mxu3 %vm686_vm4, %v3528_v23  ;;  %v3241_v23 = vshrl.u32 %v5933_v14, 16  ;;  %v3230_v10 = vrot.slane %v3228_v17, 4  ;;  %v3233_v47 = vrot.slane %v3231_v56, 5  ;;  %v5956_v48 = vrot.slane %v3237_v20, 5 }
 0x1a3   : > { %v2479_v55 = vsel %vm5295_vm7, %v2477_v16, %v2478_v25  ;;  %v3899_v61 = vunpack.c.l.b16 %v3808_v3  ;;  %v4880_v3 = vld [vmem:[%s5109_s5 + $0x54] sm:$0xe] }
 0x1a4   : > { %v2317_v63 = vpop.f32.mrf.mxu0  ;;  %v3243_v28 = vrot.slane %v3241_v23, 4  ;;  %v3234_v20 = vor.u32 %v3233_v47, %v3230_v10 }
 0x1a5   : > { %v1663_v33 = vpop.f32.mrf.mxu3  ;;  %v1028_v27 = vpop.f32.mrf.mxu1 }
 0x1a6   : > { %v1710_v26 = vadd.f32 %v1663_v33, %v1423_v34  ;;  %v4669_v34 = vrot.slane %v4653_v38, 9  ;;  %v5965_v38 = vld [vmem:[%s5109_s5 + $0x5c] sm:$0x1]  ;;  %v3244_v23 = vor.u32 %v3243_v28, %v5956_v48  ;;  %v3235_v16 = vrot.slane %v3234_v20, 4 }
 0x1a7   : > { %4911 = vmatmul.msk.bf16.gmra.mxu0 %vm686_vm4, %v3926_v8 }
 0x1a8   : > { %v1378_v9 = vpop.f32.mrf.mxu2  ;;  %4685 = vmatmul.msk.bf16.gmra.mxu1 %vm686_vm4, %v2588_v41  ;;  %v5954_v8 = vadd.f32 %v2317_v63, %v1710_v26  ;;  %v3811_v41 = vsel %vm5295_vm7, %v3809_v37, %v3810_v7  ;;  %v2476_v4 = vsel %vm5295_vm7, %v4669_v34, %v2475_v58  ;;  %v3529_v63 = vpack.c.b16 %v3502_v11, %v3501_v50  ;;  %v5973_v34 = vld [vmem:[%s5109_s5 + $0x64] sm:$0xf] }
 0x1a9   : > { %v1424_v62 = vadd.f32 %v1378_v9, %v1026_v24  ;;  %v3900_v56 = vunpack.c.l.b16 %v3811_v41  ;;  %v1029_v58 = vadd.f32 %v1028_v27, %v5420_v49  ;;  %v2562_v24 = vunpack.c.l.b16 %v2476_v4  ;;  %v4828_v9 = vld [vmem:[%s5109_s5 + $0x60] sm:$0xf] }
 0x1aa   : > { %v2563_v37 = vunpack.c.l.b16 %v2479_v55  ;;  %v3247_v7 = vshll.u32 %v5965_v38, 16  ;;  %v3814_v49 = vrot.slane %v5933_v14, 5  ;;  %v3252_v47 = vshrl.u32 %v4828_v9, 16 }
 0x1ab   : > { %v3927_v50 = vpack.c.b16 %v3900_v56, %v3899_v61  ;;  %v3255_v28 = vshll.u32 %v4828_v9, 16  ;;  %v3261_v41 = vshll.u32 %v5973_v34, 16  ;;  %v3265_v4 = vshrl.u32 %v5973_v34, 16  ;;  %v5019_v56 = vld [vmem:[%s5109_s5 + $0x5c] sm:$0x1] }
 0x1ac   : > { %v2319_v33 = vpop.f32.mrf.mxu0  ;;  %v3249_v11 = vrot.slane %v3247_v7, 5  ;;  %v2485_v20 = vrot.slane %v5019_v56, 5  ;;  %v3817_v14 = vrot.slane %v5965_v38, 5  ;;  %v3816_v7 = vrot.slane %v3814_v49, 4  ;;  %v6000_v56 = vld [vmem:[%s5109_s5 + $0x68] sm:$0x1] }
 0x1ad   : > { %v1665_v43 = vpop.f32.mrf.mxu3  ;;  %4798 = vmatmul.msk.bf16.gmra.mxu2 %vm686_vm4, %v4963_v35  ;;  %v1030_v17 = vpop.f32.mrf.mxu1  ;;  %v2589_v35 = vpack.c.b16 %v2563_v37, %v2562_v24  ;;  %v3240_v24 = vsel %vm5121_vm3, %v3235_v16, %v5956_v48  ;;  %v3257_v9 = vrot.slane %v3255_v28, 5  ;;  %v5994_v38 = vrot.slane %v3261_v41, 5 }
 0x1ae   : > { %v1711_v26 = vadd.f32 %v1665_v43, %v1424_v62  ;;  %v3245_v62 = vrot.slane %v3244_v23, 4  ;;  %v3503_v48 = vunpack.c.l.b16 %v3240_v24 }
 0x1b0   : > { %v1381_v60 = vpop.f32.mrf.mxu2  ;;  %v5978_v27 = vadd.f32 %v2319_v33, %v1711_v26  ;;  %v4654_v33 = vld [vmem:[%s5109_s5 + $0x54] sm:$0xe]  ;;  %v1031_v26 = vadd.f32 %v1030_v17, %v5439_v0  ;;  %v3250_v37 = vsel %vm5121_vm3, %v3245_v62, %v3249_v11 }
 0x1b1   : > { %v1425_v25 = vadd.f32 %v1381_v60, %v1029_v58  ;;  %v4896_v58 = vrot.slane %v4880_v3, 9  ;;  %v3267_v3 = vrot.slane %v3265_v4, 4  ;;  %v4670_v0 = vrot.slane %v4654_v33, 9 }
 0x1b2   : > { %4863 = vmatmul.msk.bf16.gmra.mxu3 %vm686_vm4, %v3529_v63  ;;  %v5018_v63 = vld [vmem:[%s5109_s5 + $0x58] sm:$0xf]  ;;  %v3504_v16 = vunpack.c.l.b16 %v3250_v37 }
 0x1b3   : > { %v2482_v61 = vrot.slane %v5018_v63, 5  ;;  %v3815_v11 = vsel %vm5295_vm7, %v4896_v58, %v3814_v49  ;;  %v3271_v49 = vshll.u32 %v6000_v56, 16 }
 0x1b4   : > { %v2322_v10 = vpop.f32.mrf.mxu0  ;;  %v3530_v33 = vpack.c.b16 %v3504_v16, %v3503_v48 }
 0x1b5   : > { %v1668_v55 = vpop.f32.mrf.mxu3  ;;  %v1033_v43 = vpop.f32.mrf.mxu1  ;;  %v2484_v17 = vrot.slane %v2482_v61, 4 }
 0x1b6   : > { %v1712_v23 = vadd.f32 %v1668_v55, %v1425_v25  ;;  %v3254_v25 = vrot.slane %v3252_v47, 4  ;;  %v4964_v55 = vld [vmem:[%s5109_s5 + $0x54] sm:$0xff] }
 0x1b7   : > { %4912 = vmatmul.msk.bf16.gmra.mxu0 %vm686_vm4, %v3927_v50  ;;  %v2486_v4 = vsel %vm5295_vm7, %v2484_v17, %v2485_v20  ;;  %v3273_v20 = vrot.slane %v3271_v49, 5  ;;  %v6019_v17 = vld [vmem:[%s5109_s5 + $0x70] sm:$0xf]  ;;  %v4655_v49 = vld [vmem:[%s5109_s5 + $0x60] sm:$0xe] }
 0x1b8   : > { %v1383_v60 = vpop.f32.mrf.mxu2  ;;  %4686 = vmatmul.msk.bf16.gmra.mxu1 %vm686_vm4, %v2589_v35  ;;  %v5997_v63 = vadd.f32 %v2322_v10, %v1712_v23  ;;  %v3818_v35 = vsel %vm5295_vm7, %v3816_v7, %v3817_v14  ;;  %v3258_v47 = vor.u32 %v3257_v9, %v3254_v25  ;;  %v2483_v10 = vsel %vm5295_vm7, %v4670_v0, %v2482_v61 }
 0x1b9   : > { %v1426_v50 = vadd.f32 %v1383_v60, %v1031_v26  ;;  %v3268_v23 = vor.u32 %v3267_v3, %v5994_v38  ;;  %v1034_v14 = vadd.f32 %v1033_v43, %v5460_v39  ;;  %v3901_v26 = vunpack.c.l.b16 %v3815_v11  ;;  %v4831_v3 = vld [vmem:[%s5109_s5 + $0x6c] sm:$0xf] }
 0x1ba   : > { %v3902_v24 = vunpack.c.l.b16 %v3818_v35  ;;  %v2564_v7 = vunpack.c.l.b16 %v2483_v10  ;;  %v2565_v60 = vunpack.c.l.b16 %v2486_v4  ;;  %v3259_v25 = vrot.slane %v3258_v47, 4  ;;  %v5020_v10 = vld [vmem:[%s5109_s5 + $0x64] sm:$0xf] }
 0x1bb   : > { %v3269_v9 = vrot.slane %v3268_v23, 4  ;;  %v3821_v0 = vrot.slane %v5973_v34, 5  ;;  %v2489_v4 = vrot.slane %v5020_v10, 5  ;;  %v3276_v34 = vshrl.u32 %v4831_v3, 16 }
 0x1bc   : > { %v2324_v62 = vpop.f32.mrf.mxu0  ;;  %v2590_v48 = vpack.c.b16 %v2565_v60, %v2564_v7  ;;  %v3264_v47 = vsel %vm5121_vm3, %v3259_v25, %v5994_v38  ;;  %v3824_v38 = vrot.slane %v6000_v56, 5 }
 0x1bd   : > { %v1670_v28 = vpop.f32.mrf.mxu3  ;;  %4799 = vmatmul.msk.bf16.gmra.mxu2 %vm686_vm4, %v4964_v55  ;;  %v1035_v41 = vpop.f32.mrf.mxu1  ;;  %v4881_v55 = vld [vmem:[%s5109_s5 + $0x60] sm:$0xe]  ;;  %v3505_v60 = vunpack.c.l.b16 %v3264_v47  ;;  %v6047_v47 = vld [vmem:[%s5109_s5 + $0x74] sm:$0x1] }
 0x1be   : > { %v1713_v58 = vadd.f32 %v1670_v28, %v1426_v50  ;;  %v3928_v50 = vpack.c.b16 %v3902_v24, %v3901_v26  ;;  %v4897_v16 = vrot.slane %v4881_v55, 9  ;;  %v3274_v28 = vsel %vm5121_vm3, %v3269_v9, %v3273_v20  ;;  %v5021_v24 = vld [vmem:[%s5109_s5 + $0x68] sm:$0x1]  ;;  %v4965_v20 = vld [vmem:[%s5109_s5 + $0x60] sm:$0xff] }
 0x1bf   : > { %v3823_v26 = vrot.slane %v3821_v0, 4  ;;  %v4671_v55 = vrot.slane %v4655_v49, 9 }
 0x1c0   : > { %v1386_v37 = vpop.f32.mrf.mxu2  ;;  %v6021_v39 = vadd.f32 %v2324_v62, %v1713_v58  ;;  %v3279_v62 = vshll.u32 %v4831_v3, 16  ;;  %v3285_v58 = vshll.u32 %v6019_v17, 16  ;;  %v3822_v25 = vsel %vm5295_vm7, %v4897_v16, %v3821_v0 }
 0x1c1   : > { %v1427_v61 = vadd.f32 %v1386_v37, %v1034_v14  ;;  %v1036_v14 = vadd.f32 %v1035_v41, %v5479_v6  ;;  %v2492_v37 = vrot.slane %v5021_v24, 5  ;;  %v2491_v3 = vrot.slane %v2489_v4, 4 }
 0x1c2   : > { %4864 = vmatmul.msk.bf16.gmra.mxu3 %vm686_vm4, %v3530_v33  ;;  %v3289_v33 = vshrl.u32 %v6019_v17, 16  ;;  %v3278_v6 = vrot.slane %v3276_v34, 4  ;;  %v3281_v41 = vrot.slane %v3279_v62, 5  ;;  %v6042_v56 = vrot.slane %v3285_v58, 5 }
 0x1c3   : > { %v3825_v10 = vsel %vm5295_vm7, %v3823_v26, %v3824_v38  ;;  %v3903_v16 = vunpack.c.l.b16 %v3822_v25  ;;  %v2490_v34 = vsel %vm5295_vm7, %v4671_v55, %v2489_v4  ;;  %v3295_v26 = vshll.u32 %v6047_v47, 16  ;;  %v6059_v25 = vld [vmem:[%s5109_s5 + $0x7c] sm:$0xf]  ;;  %v4882_v55 = vld [vmem:[%s5109_s5 + $0x6c] sm:$0xe] }
 0x1c4   : > { %v2327_v43 = vpop.f32.mrf.mxu0  ;;  %v3904_v62 = vunpack.c.l.b16 %v3825_v10  ;;  %v3282_v58 = vor.u32 %v3281_v41, %v3278_v6  ;;  %v2566_v24 = vunpack.c.l.b16 %v2490_v34  ;;  %v3309_v10 = vshll.u32 %v6059_v25, 16 }
 0x1c5   : > { %v1673_v11 = vpop.f32.mrf.mxu3  ;;  %v1038_v35 = vpop.f32.mrf.mxu1 }
 0x1c6   : > { %v1714_v23 = vadd.f32 %v1673_v11, %v1427_v61  ;;  %v3506_v61 = vunpack.c.l.b16 %v3274_v28  ;;  %v3291_v11 = vrot.slane %v3289_v33, 4  ;;  %v3929_v4 = vpack.c.b16 %v3904_v62, %v3903_v16  ;;  %v4656_v16 = vld [vmem:[%s5109_s5 + $0x6c] sm:$0xe] }
 0x1c7   : > { %4913 = vmatmul.msk.bf16.gmra.mxu0 %vm686_vm4, %v3928_v50 }
 0x1c8   : > { %v1388_v7 = vpop.f32.mrf.mxu2  ;;  %4687 = vmatmul.msk.bf16.gmra.mxu1 %vm686_vm4, %v2590_v48  ;;  %v6040_v50 = vadd.f32 %v2327_v43, %v1714_v23  ;;  %v3531_v0 = vpack.c.b16 %v3506_v61, %v3505_v60  ;;  %v2493_v23 = vsel %vm5295_vm7, %v2491_v3, %v2492_v37  ;;  %v3292_v33 = vor.u32 %v3291_v11, %v6042_v56  ;;  %v4834_v60 = vld [vmem:[%s5109_s5 + $0x78] sm:$0xf] }
 0x1c9   : > { %v1428_v9 = vadd.f32 %v1388_v7, %v1036_v14  ;;  %v1039_v14 = vadd.f32 %v1038_v35, %v5498_v45  ;;  %v2567_v7 = vunpack.c.l.b16 %v2493_v23  ;;  %v3283_v37 = vrot.slane %v3282_v58, 4  ;;  %v5022_v23 = vld [vmem:[%s5109_s5 + $0x70] sm:$0xf] }
 0x1ca   : > { %v3828_v45 = vrot.slane %v6019_v17, 5  ;;  %v3300_v35 = vshrl.u32 %v4834_v60, 16  ;;  %v3303_v11 = vshll.u32 %v4834_v60, 16  ;;  %v2496_v62 = vrot.slane %v5022_v23, 5 }
 0x1cb   : > { %v2591_v41 = vpack.c.b16 %v2567_v7, %v2566_v24  ;;  %v3288_v17 = vsel %vm5121_vm3, %v3283_v37, %v6042_v56  ;;  %v4672_v7 = vrot.slane %v4656_v16, 9  ;;  %v3311_v56 = vrot.slane %v3309_v10, 5 }
 0x1cc   : > { %v2329_v48 = vpop.f32.mrf.mxu0  ;;  %v3305_v60 = vrot.slane %v3303_v11, 5 }
 0x1cd   : > { %v1675_v28 = vpop.f32.mrf.mxu3  ;;  %4800 = vmatmul.msk.bf16.gmra.mxu2 %vm686_vm4, %v4965_v20  ;;  %v1040_v43 = vpop.f32.mrf.mxu1  ;;  %v3297_v20 = vrot.slane %v3295_v26, 5  ;;  %v3830_v26 = vrot.slane %v3828_v45, 4 }
 0x1ce   : > { %v1715_v49 = vadd.f32 %v1675_v28, %v1428_v9  ;;  %v3293_v9 = vrot.slane %v3292_v33, 4  ;;  %v3313_v28 = vshrl.u32 %v6059_v25, 16  ;;  %v1041_v33 = vadd.f32 %v1040_v43, %v5521_v12 }
 0x1cf   : > { %v3507_v12 = vunpack.c.l.b16 %v3288_v17 }
 0x1d0   : > { %v1391_v38 = vpop.f32.mrf.mxu2  ;;  %v6064_v3 = vadd.f32 %v2329_v48, %v1715_v49  ;;  %v4898_v48 = vrot.slane %v4882_v55, 9  ;;  %v3831_v49 = vrot.slane %v6047_v47, 5  ;;  %v4966_v55 = vld [vmem:[%s5109_s5 + $0x6c] sm:$0xff]  ;;  %v2498_v47 = vrot.slane %v2496_v62, 4 }
 0x1d1   : > { %v1429_v61 = vadd.f32 %v1391_v38, %v1039_v14  ;;  %v3298_v14 = vsel %vm5121_vm3, %v3293_v9, %v3297_v20  ;;  %v3302_v38 = vrot.slane %v3300_v35, 4  ;;  %v6084_v9 = vld [vmem:[%s5109_s5 + $0x80] sm:$0x1] }
 0x1d2   : > { %4865 = vmatmul.msk.bf16.gmra.mxu3 %vm686_vm4, %v3531_v0  ;;  %v3508_v43 = vunpack.c.l.b16 %v3298_v14  ;;  %v3829_v35 = vsel %vm5295_vm7, %v4898_v48, %v3828_v45  ;;  %v3319_v17 = vshll.u32 %v6084_v9, 16 }
 0x1d3   : > { %v3306_v11 = vor.u32 %v3305_v60, %v3302_v38 }
 0x1d4   : > { %v2332_v6 = vpop.f32.mrf.mxu0  ;;  %v3532_v48 = vpack.c.b16 %v3508_v43, %v3507_v12 }
 0x1d5   : > { %v1678_v0 = vpop.f32.mrf.mxu3  ;;  %v1043_v34 = vpop.f32.mrf.mxu1 }
 0x1d6   : > { %v1716_v58 = vadd.f32 %v1678_v0, %v1429_v61  ;;  %v3315_v61 = vrot.slane %v3313_v28, 4  ;;  %v5023_v0 = vld [vmem:[%s5109_s5 + $0x74] sm:$0x1] }
 0x1d7   : > { %4914 = vmatmul.msk.bf16.gmra.mxu0 %vm686_vm4, %v3929_v4  ;;  %v2499_v4 = vrot.slane %v5023_v0, 5  ;;  %v3835_v0 = vrot.slane %v6059_v25, 5 }
 0x1d8   : > { %v1393_v24 = vpop.f32.mrf.mxu2  ;;  %4688 = vmatmul.msk.bf16.gmra.mxu1 %vm686_vm4, %v2591_v41  ;;  %v6081_v23 = vadd.f32 %v2332_v6, %v1716_v58  ;;  %v3832_v41 = vsel %vm5295_vm7, %v3830_v26, %v3831_v49  ;;  %v2497_v6 = vsel %vm5295_vm7, %v4672_v7, %v2496_v62  ;;  %v3316_v58 = vor.u32 %v3315_v61, %v3311_v56  ;;  %v4883_v61 = vld [vmem:[%s5109_s5 + $0x78] sm:$0xe] }
 0x1d9   : > { %v1430_v37 = vadd.f32 %v1393_v24, %v1041_v33  ;;  %v2500_v16 = vsel %vm5295_vm7, %v2498_v47, %v2499_v4  ;;  %v1044_v49 = vadd.f32 %v1043_v34, %v5540_v59  ;;  %v3905_v33 = vunpack.c.l.b16 %v3829_v35  ;;  %v4837_v47 = vld [vmem:[%s5109_s5 + $0x84] sm:$0xf]  ;;  %v6102_v4 = vld [vmem:[%s5109_s5 + $0x88] sm:$0xf] }
 0x1da   : > { %v3906_v14 = vunpack.c.l.b16 %v3832_v41  ;;  %v2568_v38 = vunpack.c.l.b16 %v2497_v6  ;;  %v2569_v24 = vunpack.c.l.b16 %v2500_v16  ;;  %v3307_v62 = vrot.slane %v3306_v11, 4  ;;  %v4657_v6 = vld [vmem:[%s5109_s5 + $0x78] sm:$0xe]  ;;  %v5024_v16 = vld [vmem:[%s5109_s5 + $0x7c] sm:$0xf] }
 0x1db   : > { %v3317_v7 = vrot.slane %v3316_v58, 4  ;;  %v4899_v43 = vrot.slane %v4883_v61, 9  ;;  %v2503_v58 = vrot.slane %v5024_v16, 5  ;;  %v5025_v61 = vld [vmem:[%s5109_s5 + $0x80] sm:$0x1] }
 0x1dc   : > { %v2334_v20 = vpop.f32.mrf.mxu0  ;;  %v2592_v12 = vpack.c.b16 %v2569_v24, %v2568_v38  ;;  %v3312_v11 = vsel %vm5121_vm3, %v3307_v62, %v3311_v56  ;;  %v3837_v56 = vrot.slane %v3835_v0, 4 }
 0x1dd   : > { %v1680_v10 = vpop.f32.mrf.mxu3  ;;  %4801 = vmatmul.msk.bf16.gmra.mxu2 %vm686_vm4, %v4966_v55  ;;  %v1045_v28 = vpop.f32.mrf.mxu1  ;;  %v3321_v55 = vrot.slane %v3319_v17, 5  ;;  %v3324_v17 = vshrl.u32 %v4837_v47, 16  ;;  %v3836_v24 = vsel %vm5295_vm7, %v4899_v43, %v3835_v0 }
 0x1de   : > { %v1717_v45 = vadd.f32 %v1680_v10, %v1430_v37  ;;  %v3930_v37 = vpack.c.b16 %v3906_v14, %v3905_v33  ;;  %v3838_v33 = vrot.slane %v6084_v9, 5 }
 0x1df   : > { %v3322_v10 = vsel %vm5121_vm3, %v3317_v7, %v3321_v55  ;;  %v4967_v7 = vld [vmem:[%s5109_s5 + $0x78] sm:$0xff]  ;;  %v2505_v55 = vrot.slane %v2503_v58, 4 }
 0x1e0   : > { %v1396_v26 = vpop.f32.mrf.mxu2  ;;  %v6104_v59 = vadd.f32 %v2334_v20, %v1717_v45  ;;  %v3333_v20 = vshll.u32 %v6102_v4, 16  ;;  %v3337_v45 = vshrl.u32 %v6102_v4, 16  ;;  %v3510_v38 = vunpack.c.l.b16 %v3322_v10  ;;  %v6129_v10 = vld [vmem:[%s5109_s5 + $0x8c] sm:$0x1] }
 0x1e1   : > { %v1431_v60 = vadd.f32 %v1396_v26, %v1044_v49  ;;  %v1046_v49 = vadd.f32 %v1045_v28, %v5557_v32  ;;  %v3509_v26 = vunpack.c.l.b16 %v3312_v11  ;;  %v3326_v32 = vrot.slane %v3324_v17, 4 }
 0x1e2   : > { %4866 = vmatmul.msk.bf16.gmra.mxu3 %vm686_vm4, %v3532_v48  ;;  %v3327_v48 = vshll.u32 %v4837_v47, 16  ;;  %v2506_v47 = vrot.slane %v5025_v61, 5  ;;  %v6124_v9 = vrot.slane %v3333_v20, 5  ;;  %v4884_v61 = vld [vmem:[%s5109_s5 + $0x84] sm:$0xe] }
 0x1e3   : > { %v3533_v43 = vpack.c.b16 %v3510_v38, %v3509_v26  ;;  %v4840_v38 = vld [vmem:[%s5109_s5 + $0x90] sm:$0xf] }
 0x1e4   : > { %v2337_v34 = vpop.f32.mrf.mxu0  ;;  %v3329_v28 = vrot.slane %v3327_v48, 5  ;;  %v2507_v17 = vsel %vm5295_vm7, %v2505_v55, %v2506_v47  ;;  %v3842_v47 = vrot.slane %v6102_v4, 5  ;;  %v6156_v4 = vld [vmem:[%s6528_s3] ss:$0 sm:$0xff] }
 0x1e5   : > { %v1683_v35 = vpop.f32.mrf.mxu3  ;;  %v2660_v41 = vpop.f32.mrf.mxu1  ;;  %v2571_v26 = vunpack.c.l.b16 %v2507_v17 }
 0x1e6   : > { %v1718_v25 = vadd.f32 %v1683_v35, %v1431_v60  ;;  %v4673_v60 = vrot.slane %v4657_v6, 9  ;;  %v3339_v35 = vrot.slane %v3337_v45, 4  ;;  %v3907_v6 = vunpack.c.l.b16 %v3836_v24 }
 0x1e7   : > { %4915 = vmatmul.msk.bf16.gmra.mxu0 %vm686_vm4, %v3930_v37  ;;  %v3330_v20 = vor.u32 %v3329_v28, %v3326_v32  ;;  %v3348_v32 = vshrl.u32 %v4840_v38, 16 }
 0x1e8   : > { %v1398_v14 = vpop.f32.mrf.mxu2  ;;  %4689 = vmatmul.msk.bf16.gmra.mxu1 %vm686_vm4, %v2592_v12  ;;  %v6122_v37 = vadd.f32 %v2337_v34, %v1718_v25  ;;  %v3839_v12 = vsel %vm5295_vm7, %v3837_v56, %v3838_v33  ;;  %v2504_v16 = vsel %vm5295_vm7, %v4673_v60, %v2503_v58  ;;  %v3340_v45 = vor.u32 %v3339_v35, %v6124_v9  ;;  %v6143_v58 = vld [vmem:[%s5109_s5 + $0x94] sm:$0xf] }
 0x1e9   : > { %v1432_v62 = vadd.f32 %v1398_v14, %v1046_v49  ;;  %v3908_v48 = vunpack.c.l.b16 %v3839_v12  ;;  %v3343_v49 = vshll.u32 %v6129_v10, 16  ;;  %v2740_v56 = vadd.f32 %v2660_v41, %v5574_v46 }
 0x1ea   : > { %6536 = vst [vmem:[#allocation5_spill] sm:$0xff] %v6122_v37  ;;  %v2570_v14 = vunpack.c.l.b16 %v2504_v16  ;;  %v3351_v35 = vshll.u32 %v4840_v38, 16  ;;  %v3357_v12 = vshll.u32 %v6143_v58, 16  ;;  %v3361_v17 = vshrl.u32 %v6143_v58, 16  ;;  %v6201_v37 = vld [vmem:[%s5109_s5 + $0xa0] sm:$0xf] }
 0x1eb   : > { %v3931_v24 = vpack.c.b16 %v3908_v48, %v3907_v6  ;;  %v3345_v55 = vrot.slane %v3343_v49, 5  ;;  %v5026_v6 = vld [vmem:[%s5109_s5 + $0x88] sm:$0xf] }
 0x1ec   : > { %v2339_v11 = vpop.f32.mrf.mxu0  ;;  %v2593_v28 = vpack.c.b16 %v2571_v26, %v2570_v14  ;;  %v2510_v16 = vrot.slane %v5026_v6, 5  ;;  %v3350_v14 = vrot.slane %v3348_v32, 4 }
 0x1ed   : > { %v1685_v0 = vpop.f32.mrf.mxu3  ;;  %4802 = vmatmul.msk.bf16.gmra.mxu2 %vm686_vm4, %v4967_v7  ;;  %v2662_v34 = vpop.f32.mrf.mxu1  ;;  %v3341_v7 = vrot.slane %v3340_v45, 4  ;;  %v4658_v45 = vld [vmem:[%s5109_s5 + $0x84] sm:$0xe] }
 0x1ee   : > { %v1719_v25 = vadd.f32 %v1685_v0, %v1432_v62  ;;  %v3331_v62 = vrot.slane %v3330_v20, 4  ;;  %v3845_v20 = vrot.slane %v6129_v10, 5  ;;  %v2741_v38 = vadd.f32 %v2662_v34, %v5587_v42  ;;  %v6178_v42 = vld [vmem:[%s5109_s5 + $0x98] sm:$0x1] }
 0x1ef   : > { %v3353_v10 = vrot.slane %v3351_v35, 5  ;;  %v2512_v6 = vrot.slane %v2510_v16, 4 }
 0x1f0   : > { %v2947_v33 = vpop.f32.mrf.mxu2  ;;  %v6148_v46 = vadd.f32 %v2339_v11, %v1719_v25  ;;  %v6159_v11 = vstv %s6136_s14  ;;  %v4900_v25 = vrot.slane %v4884_v61, 9  ;;  %v3336_v49 = vsel %vm5121_vm3, %v3331_v62, %v6124_v9  ;;  %v5027_v9 = vld [vmem:[%s5109_s5 + $0x8c] sm:$0x1] }
 0x1f1   : > { %v3027_v60 = vadd.f32 %v2947_v33, %v2740_v56  ;;  %v3346_v56 = vsel %vm5121_vm3, %v3341_v7, %v3345_v55  ;;  %v3844_v33 = vrot.slane %v3842_v47, 4  ;;  %v6171_v61 = vrot.slane %v3357_v12, 5 }
 0x1f2   : > { %4867 = vmatmul.msk.bf16.gmra.mxu3 %vm686_vm4, %v3533_v43  ;;  %6537 = vst [vmem:[#allocation6_spill] sm:$0xff] %v6148_v46  ;;  %v2513_v62 = vrot.slane %v5027_v9, 5  ;;  %v3363_v46 = vrot.slane %v3361_v17, 4  ;;  %v3511_v32 = vunpack.c.l.b16 %v3336_v49  ;;  %v3843_v34 = vsel %vm5295_vm7, %v4900_v25, %v3842_v47 }
 0x1f3   : > { %v3846_v12 = vsel %vm5295_vm7, %v3844_v33, %v3845_v20  ;;  %v3354_v17 = vor.u32 %v3353_v10, %v3350_v14  ;;  %v3909_v20 = vunpack.c.l.b16 %v3843_v34  ;;  %v4843_v14 = vld [vmem:[%s5109_s5 + $0x9c] sm:$0xf] }
 0x1f4   : > { %v3999_v41 = vpop.f32.mrf.mxu0  ;;  %v2514_v25 = vsel %vm5295_vm7, %v2512_v6, %v2513_v62  ;;  %v3364_v49 = vor.u32 %v3363_v46, %v6171_v61  ;;  %v3910_v33 = vunpack.c.l.b16 %v3846_v12  ;;  %v3375_v34 = vshll.u32 %v4843_v14, 16 }
 0x1f5   : > { %v3601_v0 = vpop.f32.mrf.mxu3  ;;  %v2665_v43 = vpop.f32.mrf.mxu1  ;;  %v2573_v9 = vunpack.c.l.b16 %v2514_v25  ;;  %v3355_v6 = vrot.slane %v3354_v17, 4 }
 0x1f6   : > { %v3681_v48 = vadd.f32 %v3601_v0, %v3027_v60  ;;  %v4674_v0 = vrot.slane %v4658_v45, 9  ;;  %v3365_v46 = vrot.slane %v3364_v49, 4 }
 0x1f7   : > { %4916 = vmatmul.msk.bf16.gmra.mxu0 %vm686_vm4, %v3931_v24  ;;  %v4968_v24 = vld [vmem:[%s5109_s5 + $0x84] sm:$0xff] }
 0x1f8   : > { %v4079_v26 = vadd.f32 %v3999_v41, %v3681_v48  ;;  %v2949_v60 = vpop.f32.mrf.mxu2  ;;  %4690 = vmatmul.msk.bf16.gmra.mxu1 %vm686_vm4, %v2593_v28  ;;  %v3512_v41 = vunpack.c.l.b16 %v3346_v56  ;;  %v2511_v47 = vsel %vm5295_vm7, %v4674_v0, %v2510_v16  ;;  %v3367_v56 = vshll.u32 %v6178_v42, 16 }
 0x1f9   : > { %v3028_v55 = vadd.f32 %v2949_v60, %v2741_v38  ;;  %v2572_v0 = vunpack.c.l.b16 %v2511_v47  ;;  %v5028_v47 = vld [vmem:[%s5109_s5 + $0x94] sm:$0xf] }
 0x1fa   : > { %v4115_v7 = vadd.f32 %v6156_v4, %v4079_v26  ;;  %v3534_v60 = vpack.c.b16 %v3512_v41, %v3511_v32  ;;  %v3369_v62 = vrot.slane %v3367_v56, 5  ;;  %v4885_v32 = vld [vmem:[%s5109_s5 + $0x90] sm:$0xe]  ;;  %v3372_v41 = vshrl.u32 %v4843_v14, 16 }
 0x1fb   : > { %v2517_v25 = vrot.slane %v5028_v47, 5 }
 0x1fc   : > { %vm4148_vm8 = vcmp.ge.f32.partialorder %v4115_v7, 0.0  ;;  %v4181_v28 = vmul.f32 %v6159_v11, %v4115_v7  ;;  %v4001_v35 = vpop.f32.mrf.mxu0 }
 0x1fd   : > { %v3603_v48 = vpop.f32.mrf.mxu3  ;;  %4803 = vmatmul.msk.bf16.gmra.mxu2 %vm686_vm4, %v4968_v24  ;;  %v2667_v45 = vpop.f32.mrf.mxu1  ;;  %v2742_v24 = vadd.f32 %v2665_v43, %v5600_v15  ;;  %v3849_v15 = vrot.slane %v6143_v58, 5  ;;  %v3381_v43 = vshll.u32 %v6201_v37, 16  ;;  %v3370_v58 = vsel %vm5121_vm3, %v3365_v46, %v3369_v62 }
 0x1fe   : > { %v4213_v26 = vsel %vm4148_vm8, %v4115_v7, %v4181_v28  ;;  %v3682_v38 = vadd.f32 %v3603_v48, %v3028_v55  ;;  %v3932_v28 = vpack.c.b16 %v3910_v33, %v3909_v20  ;;  %v2594_v48 = vpack.c.b16 %v2573_v9, %v2572_v0  ;;  %v4659_v20 = vld [vmem:[%s5109_s5 + $0x90] sm:$0xe] }
 0x1ff   : > { %4245 = vst [vmem:[%s6185_s18] sm:$0xff] %v4213_v26  ;;  %v3360_v26 = vsel %vm5121_vm3, %v3355_v6, %v6171_v61  ;;  %v3851_v61 = vrot.slane %v3849_v15, 4  ;;  %v6221_v0 = vrot.slane %v3381_v43, 5  ;;  %v2519_v62 = vrot.slane %v2517_v25, 4 }
 0x200   : > { %v4080_v10 = vadd.f32 %v4001_v35, %v3682_v38  ;;  %v2952_v16 = vpop.f32.mrf.mxu2  ;;  %v3385_v35 = vshrl.u32 %v6201_v37, 16  ;;  %v4901_v38 = vrot.slane %v4885_v32, 9  ;;  %v6226_v32 = vld [vmem:[%s5109_s5 + $0xa4] sm:$0x1] }
 0x201   : > { %v3029_v55 = vadd.f32 %v2952_v16, %v2742_v24  ;;  %v3377_v24 = vrot.slane %v3375_v34, 5  ;;  %v2743_v16 = vadd.f32 %v2667_v45, %v5613_v13  ;;  %v3513_v34 = vunpack.c.l.b16 %v3360_v26 }
 0x202   : > { %v4116_v7 = vadd.f32 %v6156_v4, %v4080_v10  ;;  %4868 = vmatmul.msk.bf16.gmra.mxu3 %vm686_vm4, %v3534_v60  ;;  %v3852_v60 = vrot.slane %v6178_v42, 5  ;;  %v3374_v10 = vrot.slane %v3372_v41, 4  ;;  %v3387_v9 = vrot.slane %v3385_v35, 4  ;;  %v4969_v41 = vld [vmem:[%s5109_s5 + $0x90] sm:$0xff] }
 0x203   : > { %v4675_v42 = vrot.slane %v4659_v20, 9  ;;  %v3850_v45 = vsel %vm5295_vm7, %v4901_v38, %v3849_v15 }
 0x204   : > { %vm4149_vm9 = vcmp.ge.f32.partialorder %v4116_v7, 0.0  ;;  %v4182_v12 = vmul.f32 %v6159_v11, %v4116_v7  ;;  %v4004_v17 = vpop.f32.mrf.mxu0  ;;  %v3378_v43 = vor.u32 %v3377_v24, %v3374_v10  ;;  %v3853_v35 = vsel %vm5295_vm7, %v3851_v61, %v3852_v60 }
 0x205   : > { %v3606_v49 = vpop.f32.mrf.mxu3  ;;  %v2670_v56 = vpop.f32.mrf.mxu1  ;;  %v2518_v26 = vsel %vm5295_vm7, %v4675_v42, %v2517_v25  ;;  %v3911_v60 = vunpack.c.l.b16 %v3850_v45  ;;  %v3912_v10 = vunpack.c.l.b16 %v3853_v35 }
 0x206   : > { %v4214_v33 = vsel %vm4149_vm9, %v4116_v7, %v4182_v12  ;;  %v3683_v14 = vadd.f32 %v3606_v49, %v3029_v55  ;;  %v5029_v7 = vld [vmem:[%s5109_s5 + $0x98] sm:$0x1]  ;;  %v3514_v12 = vunpack.c.l.b16 %v3370_v58  ;;  %v3379_v24 = vrot.slane %v3378_v43, 4 }
 0x207   : > { %4246 = vst [vmem:[%s6185_s18 + $0x8] sm:$0xff] %v4214_v33  ;;  %4917 = vmatmul.msk.bf16.gmra.mxu0 %vm686_vm4, %v3932_v28  ;;  %v2520_v55 = vrot.slane %v5029_v7, 5  ;;  %v2744_v42 = vadd.f32 %v2670_v56, %v5626_v57  ;;  %v3856_v7 = vrot.slane %v6201_v37, 5  ;;  %v3859_v37 = vrot.slane %v6226_v32, 5  ;;  %v6256_v56 = vld [vmem:[%s5109_s5 + $0xac] sm:$0xf] }
 0x208   : > { %v4081_v6 = vadd.f32 %v4004_v17, %v3683_v14  ;;  %v2954_v46 = vpop.f32.mrf.mxu2  ;;  %4691 = vmatmul.msk.bf16.gmra.mxu1 %vm686_vm4, %v2594_v48  ;;  %v3388_v17 = vor.u32 %v3387_v9, %v6221_v0  ;;  %v3391_v48 = vshll.u32 %v6226_v32, 16  ;;  %v3535_v38 = vpack.c.b16 %v3514_v12, %v3513_v34 }
 0x209   : > { %v3030_v13 = vadd.f32 %v2954_v46, %v2743_v16  ;;  %v2521_v15 = vsel %vm5295_vm7, %v2519_v62, %v2520_v55  ;;  %v2574_v16 = vunpack.c.l.b16 %v2518_v26  ;;  %v4846_v55 = vld [vmem:[%s5109_s5 + $0xa8] sm:$0xf]  ;;  %v3933_v34 = vpack.c.b16 %v3912_v10, %v3911_v60  ;;  %v5030_v26 = vld [vmem:[%s5109_s5 + $0xa0] sm:$0xf]  ;;  %v4660_v60 = vld [vmem:[%s5109_s5 + $0x9c] sm:$0xe] }
 0x20a   : > { %v4117_v28 = vadd.f32 %v6156_v4, %v4081_v6  ;;  %v2575_v61 = vunpack.c.l.b16 %v2521_v15  ;;  %v3389_v9 = vrot.slane %v3388_v17, 4  ;;  %v3393_v25 = vrot.slane %v3391_v48, 5  ;;  %v4886_v6 = vld [vmem:[%s5109_s5 + $0x9c] sm:$0xe] }
 0x20b   : > { %v3384_v45 = vsel %vm5121_vm3, %v3379_v24, %v6221_v0  ;;  %v3858_v17 = vrot.slane %v3856_v7, 4  ;;  %v3396_v48 = vshrl.u32 %v4846_v55, 16  ;;  %v2524_v15 = vrot.slane %v5030_v26, 5 }
 0x20c   : > { %vm4150_vm10 = vcmp.ge.f32.partialorder %v4117_v28, 0.0  ;;  %v4183_v47 = vmul.f32 %v6159_v11, %v4117_v28  ;;  %v4006_v49 = vpop.f32.mrf.mxu0  ;;  %v3394_v57 = vsel %vm5121_vm3, %v3389_v9, %v3393_v25  ;;  %v3399_v0 = vshll.u32 %v4846_v55, 16  ;;  %v5031_v55 = vld [vmem:[%s5109_s5 + $0xa4] sm:$0x1] }
 0x20d   : > { %v3608_v58 = vpop.f32.mrf.mxu3  ;;  %4804 = vmatmul.msk.bf16.gmra.mxu2 %vm686_vm4, %v4969_v41  ;;  %v2672_v20 = vpop.f32.mrf.mxu1  ;;  %v3405_v32 = vshll.u32 %v6256_v56, 16  ;;  %v3516_v10 = vunpack.c.l.b16 %v3394_v57  ;;  %v3860_v25 = vsel %vm5295_vm7, %v3858_v17, %v3859_v37 }
 0x20e   : > { %v4215_v33 = vsel %vm4150_vm10, %v4117_v28, %v4183_v47  ;;  %v3684_v14 = vadd.f32 %v3608_v58, %v3030_v13  ;;  %v4902_v28 = vrot.slane %v4886_v6, 9  ;;  %v2595_v13 = vpack.c.b16 %v2575_v61, %v2574_v16 }
 0x20f   : > { %4247 = vst [vmem:[%s6185_s18 + $0x10] sm:$0xff] %v4215_v33  ;;  %v3409_v33 = vshrl.u32 %v6256_v56, 16  ;;  %v2745_v61 = vadd.f32 %v2672_v20, %v5639_v54  ;;  %v3398_v6 = vrot.slane %v3396_v48, 4  ;;  %v6277_v54 = vld [vmem:[%s5109_s5 + $0xb0] sm:$0x1] }
 0x210   : > { %v4082_v46 = vadd.f32 %v4006_v49, %v3684_v14  ;;  %v2957_v62 = vpop.f32.mrf.mxu2  ;;  %v3515_v14 = vunpack.c.l.b16 %v3384_v45  ;;  %v3857_v24 = vsel %vm5295_vm7, %v4902_v28, %v3856_v7  ;;  %v6274_v28 = vrot.slane %v3405_v32, 5 }
 0x211   : > { %v3031_v12 = vadd.f32 %v2957_v62, %v2744_v42  ;;  %v4676_v42 = vrot.slane %v4660_v60, 9  ;;  %v2526_v62 = vrot.slane %v2524_v15, 4  ;;  %v3411_v45 = vrot.slane %v3409_v33, 4 }
 0x212   : > { %v4118_v41 = vadd.f32 %v6156_v4, %v4082_v46  ;;  %4869 = vmatmul.msk.bf16.gmra.mxu3 %vm686_vm4, %v3535_v38  ;;  %v4970_v46 = vld [vmem:[%s5109_s5 + $0x9c] sm:$0xff]  ;;  %v3536_v57 = vpack.c.b16 %v3516_v10, %v3515_v14  ;;  %v3913_v37 = vunpack.c.l.b16 %v3857_v24  ;;  %v3415_v60 = vshll.u32 %v6277_v54, 16 }
 0x213   : > { %v2525_v48 = vsel %vm5295_vm7, %v4676_v42, %v2524_v15  ;;  %v6291_v15 = vld [vmem:[%s5109_s5 + $0xb8] sm:$0xf] }
 0x214   : > { %vm4151_vm11 = vcmp.ge.f32.partialorder %v4118_v41, 0.0  ;;  %v4184_v43 = vmul.f32 %v6159_v11, %v4118_v41  ;;  %v4009_v35 = vpop.f32.mrf.mxu0  ;;  %v2576_v10 = vunpack.c.l.b16 %v2525_v48  ;;  %v3417_v42 = vrot.slane %v3415_v60, 5 }
 0x215   : > { %v3611_v47 = vpop.f32.mrf.mxu3  ;;  %v2675_v49 = vpop.f32.mrf.mxu1 }
 0x216   : > { %v4216_v58 = vsel %vm4151_vm11, %v4118_v41, %v4184_v43  ;;  %v3685_v38 = vadd.f32 %v3611_v47, %v3031_v12  ;;  %v2527_v41 = vrot.slane %v5031_v55, 5  ;;  %v2746_v33 = vadd.f32 %v2675_v49, %v5651_v31 }
 0x217   : > { %4248 = vst [vmem:[%s6185_s18 + $0x18] sm:$0xff] %v4216_v58  ;;  %4918 = vmatmul.msk.bf16.gmra.mxu0 %vm686_vm4, %v3933_v34  ;;  %v3401_v34 = vrot.slane %v3399_v0, 5  ;;  %v3429_v31 = vshll.u32 %v6291_v15, 16  ;;  %v3433_v49 = vshrl.u32 %v6291_v15, 16 }
 0x218   : > { %v4083_v16 = vadd.f32 %v4009_v35, %v3685_v38  ;;  %v2959_v9 = vpop.f32.mrf.mxu2  ;;  %4692 = vmatmul.msk.bf16.gmra.mxu1 %vm686_vm4, %v2595_v13  ;;  %v3914_v35 = vunpack.c.l.b16 %v3860_v25  ;;  %v2528_v47 = vsel %vm5295_vm7, %v2526_v62, %v2527_v41  ;;  %v3412_v38 = vor.u32 %v3411_v45, %v6274_v28  ;;  %v4887_v62 = vld [vmem:[%s5109_s5 + $0xa8] sm:$0xe] }
 0x219   : > { %v3032_v7 = vadd.f32 %v2959_v9, %v2745_v61  ;;  %v3402_v26 = vor.u32 %v3401_v34, %v3398_v6  ;;  %v2577_v24 = vunpack.c.l.b16 %v2528_v47  ;;  %v3863_v45 = vrot.slane %v6256_v56, 5 }
 0x21a   : > { %v4119_v12 = vadd.f32 %v6156_v4, %v4083_v16  ;;  %v4849_v16 = vld [vmem:[%s5109_s5 + $0xb4] sm:$0xf]  ;;  %v3934_v61 = vpack.c.b16 %v3914_v35, %v3913_v37  ;;  %v5032_v37 = vld [vmem:[%s5109_s5 + $0xac] sm:$0xf] }
 0x21b   : > { %v3403_v9 = vrot.slane %v3402_v26, 4  ;;  %v3420_v55 = vshrl.u32 %v4849_v16, 16  ;;  %v3423_v41 = vshll.u32 %v4849_v16, 16  ;;  %v4903_v26 = vrot.slane %v4887_v62, 9  ;;  %v4971_v16 = vld [vmem:[%s5109_s5 + $0xa8] sm:$0xff] }
 0x21c   : > { %vm4152_vm12 = vcmp.ge.f32.partialorder %v4119_v12, 0.0  ;;  %v4185_v20 = vmul.f32 %v6159_v11, %v4119_v12  ;;  %v4011_v13 = vpop.f32.mrf.mxu0 }
 0x21d   : > { %v3613_v43 = vpop.f32.mrf.mxu3  ;;  %4805 = vmatmul.msk.bf16.gmra.mxu2 %vm686_vm4, %v4970_v46  ;;  %v2677_v17 = vpop.f32.mrf.mxu1  ;;  %v3413_v46 = vrot.slane %v3412_v38, 4  ;;  %v3422_v56 = vrot.slane %v3420_v55, 4  ;;  %v6309_v38 = vrot.slane %v3429_v31, 5 }
 0x21e   : > { %v4217_v0 = vsel %vm4152_vm12, %v4119_v12, %v4185_v20  ;;  %v3686_v58 = vadd.f32 %v3613_v43, %v3032_v7  ;;  %v2596_v7 = vpack.c.b16 %v2577_v24, %v2576_v10  ;;  %v2531_v43 = vrot.slane %v5032_v37, 5  ;;  %v6315_v24 = vld [vmem:[%s5109_s5 + $0xbc] sm:$0x1] }
 0x21f   : > { %4249 = vst [vmem:[%s6185_s18 + $0x20] sm:$0xff] %v4217_v0  ;;  %v3418_v47 = vsel %vm5121_vm3, %v3413_v46, %v3417_v42  ;;  %v4661_v0 = vld [vmem:[%s5109_s5 + $0xa8] sm:$0xe]  ;;  %v3866_v10 = vrot.slane %v6277_v54, 5  ;;  %v3439_v54 = vshll.u32 %v6315_v24, 16 }
 0x220   : > { %v4084_v32 = vadd.f32 %v4011_v13, %v3686_v58  ;;  %v2962_v14 = vpop.f32.mrf.mxu2  ;;  %v3425_v58 = vrot.slane %v3423_v41, 5  ;;  %v3518_v55 = vunpack.c.l.b16 %v3418_v47 }
 0x221   : > { %v3033_v6 = vadd.f32 %v2962_v14, %v2746_v33  ;;  %v3865_v14 = vrot.slane %v3863_v45, 4 }
 0x222   : > { %v4120_v25 = vadd.f32 %v6156_v4, %v4084_v32  ;;  %4870 = vmatmul.msk.bf16.gmra.mxu3 %vm686_vm4, %v3536_v57  ;;  %v3408_v57 = vsel %vm5121_vm3, %v3403_v9, %v6274_v28  ;;  %v3435_v28 = vrot.slane %v3433_v49, 4  ;;  %v2747_v32 = vadd.f32 %v2677_v17, %v5664_v44 }
 0x223   : > { %v4677_v9 = vrot.slane %v4661_v0, 9  ;;  %v3517_v62 = vunpack.c.l.b16 %v3408_v57  ;;  %v3864_v44 = vsel %vm5295_vm7, %v4903_v26, %v3863_v45  ;;  %v3426_v17 = vor.u32 %v3425_v58, %v3422_v56 }
 0x224   : > { %vm4153_vm13 = vcmp.ge.f32.partialorder %v4120_v25, 0.0  ;;  %v4186_v34 = vmul.f32 %v6159_v11, %v4120_v25  ;;  %v4014_v12 = vpop.f32.mrf.mxu0  ;;  %v3436_v41 = vor.u32 %v3435_v28, %v6309_v38  ;;  %v3441_v56 = vrot.slane %v3439_v54, 5 }
 0x225   : > { %v3616_v20 = vpop.f32.mrf.mxu3  ;;  %v2680_v13 = vpop.f32.mrf.mxu1  ;;  %v2532_v45 = vsel %vm5295_vm7, %v4677_v9, %v2531_v43  ;;  %v3427_v26 = vrot.slane %v3426_v17, 4  ;;  %v5034_v17 = vld [vmem:[%s5109_s5 + $0xb8] sm:$0xf] }
 0x226   : > { %v4218_v35 = vsel %vm4153_vm13, %v4120_v25, %v4186_v34  ;;  %v3687_v48 = vadd.f32 %v3616_v20, %v3033_v6  ;;  %v2533_v25 = vrot.slane %v2531_v43, 4  ;;  %v3867_v34 = vsel %vm5295_vm7, %v3865_v14, %v3866_v10 }
 0x227   : > { %4250 = vst [vmem:[%s6185_s18 + $0x28] sm:$0xff] %v4218_v35  ;;  %4919 = vmatmul.msk.bf16.gmra.mxu0 %vm686_vm4, %v3934_v61  ;;  %v5033_v61 = vld [vmem:[%s5109_s5 + $0xb0] sm:$0x1]  ;;  %v3537_v35 = vpack.c.b16 %v3518_v55, %v3517_v62  ;;  %v3916_v47 = vunpack.c.l.b16 %v3867_v34  ;;  %v3437_v0 = vrot.slane %v3436_v41, 4  ;;  %v2748_v28 = vadd.f32 %v2680_v13, %v5678_v30  ;;  %v6344_v13 = vld [vmem:[%s5109_s5 + $0xc4] sm:$0xf] }
 0x228   : > { %v4085_v60 = vadd.f32 %v4014_v12, %v3687_v48  ;;  %v2964_v33 = vpop.f32.mrf.mxu2  ;;  %4693 = vmatmul.msk.bf16.gmra.mxu1 %vm686_vm4, %v2596_v7  ;;  %v2534_v6 = vrot.slane %v5033_v61, 5  ;;  %v3915_v48 = vunpack.c.l.b16 %v3864_v44  ;;  %v2578_v43 = vunpack.c.l.b16 %v2532_v45 }
 0x229   : > { %v3034_v42 = vadd.f32 %v2964_v33, %v2747_v32  ;;  %v4852_v33 = vld [vmem:[%s5109_s5 + $0xc0] sm:$0xf]  ;;  %v3432_v9 = vsel %vm5121_vm3, %v3427_v26, %v6309_v38  ;;  %v3870_v30 = vrot.slane %v6291_v15, 5  ;;  %v2538_v38 = vrot.slane %v5034_v17, 5 }
 0x22a   : > { %v4121_v46 = vadd.f32 %v6156_v4, %v4085_v60  ;;  %v2535_v20 = vsel %vm5295_vm7, %v2533_v25, %v2534_v6  ;;  %v3442_v25 = vsel %vm5121_vm3, %v3437_v0, %v3441_v56  ;;  %v3444_v62 = vshrl.u32 %v4852_v33, 16  ;;  %v4972_v0 = vld [vmem:[%s5109_s5 + $0xb4] sm:$0xff] }
 0x22b   : > { %v2579_v32 = vunpack.c.l.b16 %v2535_v20  ;;  %v3447_v41 = vshll.u32 %v4852_v33, 16  ;;  %v3453_v15 = vshll.u32 %v6344_v13, 16  ;;  %v3457_v34 = vshrl.u32 %v6344_v13, 16 }
 0x22c   : > { %vm4154_vm14 = vcmp.ge.f32.partialorder %v4121_v46, 0.0  ;;  %v4187_v31 = vmul.f32 %v6159_v11, %v4121_v46  ;;  %v4016_v49 = vpop.f32.mrf.mxu0  ;;  %v3520_v45 = vunpack.c.l.b16 %v3442_v25  ;;  %v3446_v26 = vrot.slane %v3444_v62, 4 }
 0x22d   : > { %v3618_v12 = vpop.f32.mrf.mxu3  ;;  %4806 = vmatmul.msk.bf16.gmra.mxu2 %vm686_vm4, %v4971_v16  ;;  %v2682_v7 = vpop.f32.mrf.mxu1  ;;  %v3935_v16 = vpack.c.b16 %v3916_v47, %v3915_v48  ;;  %v3873_v47 = vrot.slane %v6315_v24, 5 }
 0x22e   : > { %v4219_v57 = vsel %vm4154_vm14, %v4121_v46, %v4187_v31  ;;  %v3688_v37 = vadd.f32 %v3618_v12, %v3034_v42  ;;  %v2597_v46 = vpack.c.b16 %v2579_v32, %v2578_v43  ;;  %v4888_v42 = vld [vmem:[%s5109_s5 + $0xb4] sm:$0xe]  ;;  %v3519_v12 = vunpack.c.l.b16 %v3432_v9 }
 0x22f   : > { %4251 = vst [vmem:[%s6185_s18 + $0x30] sm:$0xff] %v4219_v57  ;;  %v4904_v20 = vrot.slane %v4888_v42, 9  ;;  %v3872_v57 = vrot.slane %v3870_v30, 4  ;;  %v3449_v43 = vrot.slane %v3447_v41, 5 }
 0x230   : > { %v4086_v58 = vadd.f32 %v4016_v49, %v3688_v37  ;;  %v2967_v60 = vpop.f32.mrf.mxu2  ;;  %v4662_v49 = vld [vmem:[%s5109_s5 + $0xb4] sm:$0xe] }
 0x231   : > { %v3035_v10 = vadd.f32 %v2967_v60, %v2748_v28  ;;  %v4678_v56 = vrot.slane %v4662_v49, 9  ;;  %v5035_v28 = vld [vmem:[%s5109_s5 + $0xbc] sm:$0x1]  ;;  %v3874_v9 = vsel %vm5295_vm7, %v3872_v57, %v3873_v47  ;;  %v3450_v62 = vor.u32 %v3449_v43, %v3446_v26  ;;  %v4889_v47 = vld [vmem:[%s5109_s5 + $0xc0] sm:$0xe] }
 0x232   : > { %v4122_v14 = vadd.f32 %v6156_v4, %v4086_v58  ;;  %4871 = vmatmul.msk.bf16.gmra.mxu3 %vm686_vm4, %v3537_v35  ;;  %v2749_v35 = vadd.f32 %v2682_v7, %v5691_v51  ;;  %v2540_v58 = vrot.slane %v2538_v38, 4  ;;  %v2541_v60 = vrot.slane %v5035_v28, 5 }
 0x233   : > { %v3871_v7 = vsel %vm5295_vm7, %v4904_v20, %v3870_v30 }
 0x234   : > { %vm4155_vm15 = vcmp.ge.f32.partialorder %v4122_v14, 0.0  ;;  %v4188_v61 = vmul.f32 %v6159_v11, %v4122_v14  ;;  %v4019_v6 = vpop.f32.mrf.mxu0  ;;  %v2542_v42 = vsel %vm5295_vm7, %v2540_v58, %v2541_v60  ;;  %v6386_v58 = vld [vmem:[%s5109_s5 + $0xd0] sm:$0xf] }
 0x235   : > { %v3621_v55 = vpop.f32.mrf.mxu3  ;;  %v2685_v44 = vpop.f32.mrf.mxu1 }
 0x236   : > { %v4220_v54 = vsel %vm4155_vm15, %v4122_v14, %v4188_v61  ;;  %v3689_v31 = vadd.f32 %v3621_v55, %v3035_v10  ;;  %v6360_v14 = vrot.slane %v3453_v15, 5  ;;  %v3459_v10 = vrot.slane %v3457_v34, 4 }
 0x237   : > { %4252 = vst [vmem:[%s6185_s18 + $0x38] sm:$0xff] %v4220_v54  ;;  %4920 = vmatmul.msk.bf16.gmra.mxu0 %vm686_vm4, %v3935_v16  ;;  %v6363_v16 = vld [vmem:[%s5109_s5 + $0xc8] sm:$0x1]  ;;  %v3538_v61 = vpack.c.b16 %v3520_v45, %v3519_v12  ;;  %v3917_v54 = vunpack.c.l.b16 %v3871_v7  ;;  %v2750_v15 = vadd.f32 %v2685_v44, %v5707_v1  ;;  %v2581_v12 = vunpack.c.l.b16 %v2542_v42  ;;  %v6538_v42 = vld [vmem:[#allocation3_spill] sm:$0xff] }
 0x238   : > { %v4087_v37 = vadd.f32 %v4019_v6, %v3689_v31  ;;  %v2969_v48 = vpop.f32.mrf.mxu2  ;;  %4694 = vmatmul.msk.bf16.gmra.mxu1 %vm686_vm4, %v2597_v46  ;;  %v2539_v46 = vsel %vm5295_vm7, %v4678_v56, %v2538_v38  ;;  %v3460_v41 = vor.u32 %v3459_v10, %v6360_v14  ;;  %v3463_v30 = vshll.u32 %v6363_v16, 16  ;;  %v4855_v56 = vld [vmem:[%s5109_s5 + $0xcc] sm:$0xf] }
 0x239   : > { %v3036_v33 = vadd.f32 %v2969_v48, %v2749_v35  ;;  %v3918_v31 = vunpack.c.l.b16 %v3874_v9  ;;  %v2580_v38 = vunpack.c.l.b16 %v2539_v46  ;;  %v3451_v45 = vrot.slane %v3450_v62, 4  ;;  %v4663_v9 = vld [vmem:[%s5109_s5 + $0xc0] sm:$0xe] }
 0x23a   : > { %v4123_v32 = vadd.f32 %v6156_v4, %v4087_v37  ;;  %v3461_v37 = vrot.slane %v3460_v41, 4  ;;  %v3465_v35 = vrot.slane %v3463_v30, 5  ;;  %v4905_v7 = vrot.slane %v4889_v47, 9  ;;  %v4973_v30 = vld [vmem:[%s5109_s5 + $0xc0] sm:$0xff] }
 0x23b   : > { %v3936_v48 = vpack.c.b16 %v3918_v31, %v3917_v54  ;;  %v2598_v26 = vpack.c.b16 %v2581_v12, %v2580_v38  ;;  %v3456_v43 = vsel %vm5121_vm3, %v3451_v45, %v6360_v14  ;;  %v3481_v14 = vshrl.u32 %v6386_v58, 16 }
 0x23c   : > { %vm4156_vm0 = vcmp.ge.f32.partialorder %v4123_v32, 0.0  ;;  %v4189_v51 = vmul.f32 %v6159_v11, %v4123_v32  ;;  %v4021_v24 = vpop.f32.mrf.mxu0  ;;  %v3880_v41 = vrot.slane %v6363_v16, 5  ;;  %v3521_v54 = vunpack.c.l.b16 %v3456_v43 }
 0x23d   : > { %v3623_v25 = vpop.f32.mrf.mxu3  ;;  %4807 = vmatmul.msk.bf16.gmra.mxu2 %vm686_vm4, %v4972_v0  ;;  %v2687_v6 = vpop.f32.mrf.mxu1  ;;  %v3877_v0 = vrot.slane %v6344_v13, 5  ;;  %v3468_v13 = vshrl.u32 %v4855_v56, 16  ;;  %v4679_v31 = vrot.slane %v4663_v9, 9 }
 0x23e   : > { %v4221_v55 = vsel %vm4156_vm0, %v4123_v32, %v4189_v51  ;;  %v3690_v17 = vadd.f32 %v3623_v25, %v3036_v33  ;;  %v5036_v32 = vld [vmem:[%s5109_s5 + $0xc4] sm:$0xf]  ;;  %v3471_v25 = vshll.u32 %v4855_v56, 16  ;;  %v2751_v62 = vadd.f32 %v2687_v6, %v6538_v42 }
 0x23f   : > { %4253 = vst [vmem:[%s6185_s18 + $0x40] sm:$0xff] %v4221_v55  ;;  %v2545_v33 = vrot.slane %v5036_v32, 5  ;;  %v3878_v6 = vsel %vm5295_vm7, %v4905_v7, %v3877_v0 }
 0x240   : > { %v4088_v49 = vadd.f32 %v4021_v24, %v3690_v17  ;;  %v2972_v34 = vpop.f32.mrf.mxu2  ;;  %v3466_v24 = vsel %vm5121_vm3, %v3461_v37, %v3465_v35  ;;  %v3879_v17 = vrot.slane %v3877_v0, 4  ;;  %v3483_v35 = vrot.slane %v3481_v14, 4 }
 0x241   : > { %v3037_v57 = vadd.f32 %v2972_v34, %v2750_v15  ;;  %v5037_v15 = vld [vmem:[%s5109_s5 + $0xc8] sm:$0x1]  ;;  %v3522_v45 = vunpack.c.l.b16 %v3466_v24  ;;  %v2546_v0 = vsel %vm5295_vm7, %v4679_v31, %v2545_v33 }
 0x242   : > { %v4124_v20 = vadd.f32 %v6156_v4, %v4088_v49  ;;  %4872 = vmatmul.msk.bf16.gmra.mxu3 %vm686_vm4, %v3538_v61  ;;  %v3477_v61 = vshll.u32 %v6386_v58, 16  ;;  %v2547_v49 = vrot.slane %v2545_v33, 4  ;;  %v2548_v34 = vrot.slane %v5037_v15, 5 }
 0x243   : > { %v3881_v47 = vsel %vm5295_vm7, %v3879_v17, %v3880_v41  ;;  %v3539_v32 = vpack.c.b16 %v3522_v45, %v3521_v54  ;;  %v2582_v14 = vunpack.c.l.b16 %v2546_v0 }
 0x244   : > { %vm4157_vm1 = vcmp.ge.f32.partialorder %v4124_v20, 0.0  ;;  %v4190_v1 = vmul.f32 %v6159_v11, %v4124_v20  ;;  %v4024_v44 = vpop.f32.mrf.mxu0  ;;  %v3479_v37 = vrot.slane %v3477_v61, 5  ;;  %v2549_v56 = vsel %vm5295_vm7, %v2547_v49, %v2548_v34  ;;  %v4890_v49 = vld [vmem:[%s5109_s5 + $0xcc] sm:$0xe] }
 0x245   : > { %v3626_v28 = vpop.f32.mrf.mxu3  ;;  %v2690_v60 = vpop.f32.mrf.mxu1 }
 0x246   : > { %v4222_v10 = vsel %vm4157_vm1, %v4124_v20, %v4190_v1  ;;  %v3691_v51 = vadd.f32 %v3626_v28, %v3037_v57  ;;  %v3470_v20 = vrot.slane %v3468_v13, 4  ;;  %v3473_v57 = vrot.slane %v3471_v25, 5  ;;  %v4857_v1 = vld [vmem:[%s5109_s5 + $0xd4] sm:$0x1] }
 0x247   : > { %4254 = vst [vmem:[%s6185_s18 + $0x48] sm:$0xff] %v4222_v10  ;;  %4921 = vmatmul.msk.bf16.gmra.mxu0 %vm686_vm4, %v3936_v48  ;;  %v3919_v10 = vunpack.c.l.b16 %v3878_v6  ;;  %v3484_v7 = vor.u32 %v3483_v35, %v3479_v37  ;;  %v3487_v9 = vshll.u32 %v4857_v1, 16  ;;  %v2752_v25 = vadd.f32 %v2690_v60, %v5743_v52 }
 0x248   : > { %v4089_v46 = vadd.f32 %v4024_v44, %v3691_v51  ;;  %v2974_v55 = vpop.f32.mrf.mxu2  ;;  %4695 = vmatmul.msk.bf16.gmra.mxu1 %vm686_vm4, %v2598_v26  ;;  %v3920_v51 = vunpack.c.l.b16 %v3881_v47  ;;  %v3474_v24 = vor.u32 %v3473_v57, %v3470_v20  ;;  %v3884_v52 = vrot.slane %v6386_v58, 5 }
 0x249   : > { %v3038_v12 = vadd.f32 %v2974_v55, %v2751_v62  ;;  %v3485_v17 = vrot.slane %v3484_v7, 4  ;;  %v3489_v41 = vrot.slane %v3487_v9, 5  ;;  %v4906_v6 = vrot.slane %v4890_v49, 9 }
 0x24a   : > { %v4125_v38 = vadd.f32 %v6156_v4, %v4089_v46  ;;  %v2583_v46 = vunpack.c.l.b16 %v2549_v56  ;;  %v3937_v62 = vpack.c.b16 %v3920_v51, %v3919_v10  ;;  %v3475_v55 = vrot.slane %v3474_v24, 4 }
 0x24b   : > { %v3490_v45 = vsel %vm5121_vm3, %v3485_v17, %v3489_v41  ;;  %v3886_v58 = vrot.slane %v3884_v52, 4  ;;  %v6539_v17 = vld [vmem:[#allocation4_spill] sm:$0xff] }
 0x24c   : > { %vm4158_vm2 = vcmp.ge.f32.partialorder %v4125_v38, 0.0  ;;  %v4191_v16 = vmul.f32 %v6159_v11, %v4125_v38  ;;  %v4026_v48 = vpop.f32.mrf.mxu0  ;;  %v2599_v31 = vpack.c.b16 %v2583_v46, %v2582_v14  ;;  %v3524_v56 = vunpack.c.l.b16 %v3490_v45 }
 0x24d   : > { %v3628_v44 = vpop.f32.mrf.mxu3  ;;  %4808 = vmatmul.msk.bf16.gmra.mxu2 %vm686_vm4, %v4973_v30  ;;  %v2692_v26 = vpop.f32.mrf.mxu1 }
 0x24e   : > { %v4223_v28 = vsel %vm4158_vm2, %v4125_v38, %v4191_v16  ;;  %v3692_v43 = vadd.f32 %v3628_v44, %v3038_v12  ;;  %v3480_v12 = vsel %vm5121_vm3, %v3475_v55, %v3479_v37  ;;  %v2753_v57 = vadd.f32 %v2692_v26, %v5763_v21 }
 0x24f   : > { %4255 = vst [vmem:[%s6185_s18 + $0x50] sm:$0xff] %v4223_v28  ;;  %v3887_v16 = vrot.slane %v4857_v1, 5  ;;  %v3523_v0 = vunpack.c.l.b16 %v3480_v12  ;;  %v3885_v28 = vsel %vm5295_vm7, %v4906_v6, %v3884_v52 }
 0x250   : > { %v4090_v13 = vadd.f32 %v4026_v48, %v3692_v43  ;;  %v2977_v61 = vpop.f32.mrf.mxu2  ;;  %v4974_v48 = vld [vmem:[%s5109_s5 + $0xcc] sm:$0xff]  ;;  %v3921_v51 = vunpack.c.l.b16 %v3885_v28 }
 0x251   : > { %v3039_v42 = vadd.f32 %v2977_v61, %v2752_v25  ;;  %v3888_v21 = vsel %vm5295_vm7, %v3886_v58, %v3887_v16  ;;  %v3540_v10 = vpack.c.b16 %v3524_v56, %v3523_v0 }
 0x252   : > { %v4126_v33 = vadd.f32 %v6156_v4, %v4090_v13  ;;  %4873 = vmatmul.msk.bf16.gmra.mxu3 %vm686_vm4, %v3539_v32  ;;  %v3922_v24 = vunpack.c.l.b16 %v3888_v21 }
 0x254   : > { %vm4159_vm5 = vcmp.ge.f32.partialorder %v4126_v33, 0.0  ;;  %v4192_v30 = vmul.f32 %v6159_v11, %v4126_v33  ;;  %v4029_v54 = vpop.f32.mrf.mxu0  ;;  %v3938_v61 = vpack.c.b16 %v3922_v24, %v3921_v51 }
 0x255   : > { %v3631_v60 = vpop.f32.mrf.mxu3  ;;  %v2695_v15 = vpop.f32.mrf.mxu1 }
 0x256   : > { %v4224_v34 = vsel %vm4159_vm5, %v4126_v33, %v4192_v30  ;;  %v3693_v38 = vadd.f32 %v3631_v60, %v3039_v42  ;;  %v2754_v9 = vadd.f32 %v2695_v15, %v5782_v29 }
 0x257   : > { %4256 = vst [vmem:[%s6185_s18 + $0x58] sm:$0xff] %v4224_v34  ;;  %4922 = vmatmul.msk.bf16.gmra.mxu0 %vm686_vm4, %v3937_v62 }
 0x258   : > { %v4091_v20 = vadd.f32 %v4029_v54, %v3693_v38  ;;  %v2979_v35 = vpop.f32.mrf.mxu2  ;;  %4696 = vmatmul.msk.bf16.gmra.mxu1 %vm686_vm4, %v2599_v31 }
 0x259   : > { %v3040_v44 = vadd.f32 %v2979_v35, %v2753_v57 }
 0x25a   : > { %v4127_v47 = vadd.f32 %v6156_v4, %v4091_v20 }
 0x25c   : > { %vm4160_vm6 = vcmp.ge.f32.partialorder %v4127_v47, 0.0  ;;  %v4193_v36 = vmul.f32 %v6159_v11, %v4127_v47  ;;  %v4031_v37 = vpop.f32.mrf.mxu0 }
 0x25d   : > { %v3633_v26 = vpop.f32.mrf.mxu3  ;;  %4809 = vmatmul.msk.bf16.gmra.mxu2 %vm686_vm4, %v4974_v48  ;;  %v2697_v1 = vpop.f32.mrf.mxu1 }
 0x25e   : > { %v4225_v43 = vsel %vm4160_vm6, %v4127_v47, %v4193_v36  ;;  %v3694_v32 = vadd.f32 %v3633_v26, %v3040_v44  ;;  %v2755_v41 = vadd.f32 %v2697_v1, %v6539_v17 }
 0x25f   : > { %4257 = vst [vmem:[%s6185_s18 + $0x60] sm:$0xff] %v4225_v43 }
 0x260   : > { %v4092_v7 = vadd.f32 %v4031_v37, %v3694_v32  ;;  %v2982_v13 = vpop.f32.mrf.mxu2 }
 0x261   : > { %v3041_v18 = vadd.f32 %v2982_v13, %v2754_v9 }
 0x262   : > { %v4128_v25 = vadd.f32 %v6156_v4, %v4092_v7  ;;  %4874 = vmatmul.msk.bf16.gmra.mxu3 %vm686_vm4, %v3540_v10 }
 0x264   : > { %vm4161_vm3 = vcmp.ge.f32.partialorder %v4128_v25, 0.0  ;;  %v4194_v14 = vmul.f32 %v6159_v11, %v4128_v25  ;;  %v4034_v46 = vpop.f32.mrf.mxu0 }
 0x265   : > { %v3636_v33 = vpop.f32.mrf.mxu3  ;;  %v2700_v42 = vpop.f32.mrf.mxu1 }
 0x266   : > { %v4226_v62 = vsel %vm4161_vm3, %v4128_v25, %v4194_v14  ;;  %v3695_v55 = vadd.f32 %v3636_v33, %v3041_v18  ;;  %v2756_v45 = vadd.f32 %v2700_v42, %v5825_v5 }
 0x267   : > { %4258 = vst [vmem:[%s6185_s18 + $0x68] sm:$0xff] %v4226_v62  ;;  %4923 = vmatmul.msk.bf16.gmra.mxu0 %vm686_vm4, %v3938_v61 }
 0x268   : > { %v4093_v29 = vadd.f32 %v4034_v46, %v3695_v55  ;;  %v2984_v30 = vpop.f32.mrf.mxu2 }
 0x269   : > { %v3042_v31 = vadd.f32 %v2984_v30, %v2755_v41 }
 0x26a   : > { %v4129_v54 = vadd.f32 %v6156_v4, %v4093_v29 }
 0x26c   : > { %vm4162_vm7 = vcmp.ge.f32.partialorder %v4129_v54, 0.0  ;;  %v4195_v49 = vmul.f32 %v6159_v11, %v4129_v54  ;;  %v4036_v52 = vpop.f32.mrf.mxu0 }
 0x26d   : > { %v3638_v60 = vpop.f32.mrf.mxu3  ;;  %v2702_v15 = vpop.f32.mrf.mxu1 }
 0x26e   : > { %v4227_v34 = vsel %vm4162_vm7, %v4129_v54, %v4195_v49  ;;  %v3696_v38 = vadd.f32 %v3638_v60, %v3042_v31  ;;  %v2757_v56 = vadd.f32 %v2702_v15, %v5849_v22  ;;  %v6462_v22 = vld [vmem:[%s6528_s3] ss:$0 sm:$0xff] }
 0x26f   : > { %4259 = vst [vmem:[%s6185_s18 + $0x70] sm:$0xff] %v4227_v34 }
 0x270   : > { %v4094_v12 = vadd.f32 %v4036_v52, %v3696_v38  ;;  %v2987_v6 = vpop.f32.mrf.mxu2 }
 0x271   : > { %v3043_v57 = vadd.f32 %v2987_v6, %v2756_v45 }
 0x272   : > { %v4130_v20 = vadd.f32 %v6156_v4, %v4094_v12 }
 0x274   : > { %vm4163_vm4 = vcmp.ge.f32.partialorder %v4130_v20, 0.0  ;;  %v4196_v35 = vmul.f32 %v6159_v11, %v4130_v20  ;;  %v4039_v58 = vpop.f32.mrf.mxu0 }
 0x275   : > { %v3641_v16 = vpop.f32.mrf.mxu3  ;;  %v2705_v48 = vpop.f32.mrf.mxu1 }
 0x276   : > { %v4228_v47 = vsel %vm4163_vm4, %v4130_v20, %v4196_v35  ;;  %v3697_v44 = vadd.f32 %v3641_v16, %v3043_v57  ;;  %v2758_v51 = vadd.f32 %v2705_v48, %v5868_v19 }
 0x277   : > { %4260 = vst [vmem:[%s6185_s18 + $0x78] sm:$0xff] %v4228_v47 }
 0x278   : > { %v4095_v0 = vadd.f32 %v4039_v58, %v3697_v44  ;;  %v2989_v36 = vpop.f32.mrf.mxu2 }
 0x279   : > { %v3044_v37 = vadd.f32 %v2989_v36, %v2757_v56 }
 0x27a   : > { %v4131_v5 = vadd.f32 %v6156_v4, %v4095_v0 }
 0x27c   : > { %vm4164_vm8 = vcmp.ge.f32.partialorder %v4131_v5, 0.0  ;;  %v4197_v28 = vmul.f32 %v6159_v11, %v4131_v5  ;;  %v4041_v21 = vpop.f32.mrf.mxu0 }
 0x27d   : > { %v3643_v26 = vpop.f32.mrf.mxu3  ;;  %v2707_v1 = vpop.f32.mrf.mxu1 }
 0x27e   : > { %v4229_v43 = vsel %vm4164_vm8, %v4131_v5, %v4197_v28  ;;  %v3698_v32 = vadd.f32 %v3643_v26, %v3044_v37  ;;  %v2759_v46 = vadd.f32 %v2707_v1, %v5892_v53 }
 0x27f   : > { %4261 = vst [vmem:[%s6185_s18 + $0x80] sm:$0xff] %v4229_v43 }
 0x280   : > { %v4096_v10 = vadd.f32 %v4041_v21, %v3698_v32  ;;  %v2992_v24 = vpop.f32.mrf.mxu2 }
 0x281   : > { %v3045_v7 = vadd.f32 %v2992_v24, %v2758_v51 }
 0x282   : > { %v4132_v4 = vadd.f32 %v6462_v22, %v4096_v10 }
 0x284   : > { %vm4165_vm9 = vcmp.ge.f32.partialorder %v4132_v4, 0.0  ;;  %v4198_v9 = vmul.f32 %v6159_v11, %v4132_v4  ;;  %v4044_v13 = vpop.f32.mrf.mxu0 }
 0x285   : > { %v3646_v25 = vpop.f32.mrf.mxu3  ;;  %v2710_v18 = vpop.f32.mrf.mxu1 }
 0x286   : > { %v4230_v61 = vsel %vm4165_vm9, %v4132_v4, %v4198_v9  ;;  %v3699_v14 = vadd.f32 %v3646_v25, %v3045_v7  ;;  %v2760_v49 = vadd.f32 %v2710_v18, %v5911_v2 }
 0x287   : > { %4262 = vst [vmem:[%s6185_s18 + $0x88] sm:$0xff] %v4230_v61 }
 0x288   : > { %v4097_v19 = vadd.f32 %v4044_v13, %v3699_v14  ;;  %v2994_v33 = vpop.f32.mrf.mxu2 }
 0x289   : > { %v3046_v62 = vadd.f32 %v2994_v33, %v2759_v46 }
 0x28a   : > { %v4133_v42 = vadd.f32 %v6462_v22, %v4097_v19 }
 0x28c   : > { %vm4166_vm10 = vcmp.ge.f32.partialorder %v4133_v42, 0.0  ;;  %v4199_v55 = vmul.f32 %v6159_v11, %v4133_v42  ;;  %v4046_v29 = vpop.f32.mrf.mxu0 }
 0x28d   : > { %v3648_v17 = vpop.f32.mrf.mxu3  ;;  %v2712_v41 = vpop.f32.mrf.mxu1 }
 0x28e   : > { %v4231_v30 = vsel %vm4166_vm10, %v4133_v42, %v4199_v55  ;;  %v3700_v54 = vadd.f32 %v3648_v17, %v3046_v62  ;;  %v2761_v57 = vadd.f32 %v2712_v41, %v5935_v40 }
 0x28f   : > { %4263 = vst [vmem:[%s6185_s18 + $0x90] sm:$0xff] %v4231_v30 }
 0x290   : > { %v4098_v31 = vadd.f32 %v4046_v29, %v3700_v54  ;;  %v2997_v52 = vpop.f32.mrf.mxu2 }
 0x291   : > { %v3047_v60 = vadd.f32 %v2997_v52, %v2760_v49 }
 0x292   : > { %v4134_v53 = vadd.f32 %v6462_v22, %v4098_v31 }
 0x294   : > { %vm4167_vm11 = vcmp.ge.f32.partialorder %v4134_v53, 0.0  ;;  %v4200_v15 = vmul.f32 %v6159_v11, %v4134_v53  ;;  %v4049_v34 = vpop.f32.mrf.mxu0 }
 0x295   : > { %v3651_v38 = vpop.f32.mrf.mxu3  ;;  %v2715_v12 = vpop.f32.mrf.mxu1 }
 0x296   : > { %v4232_v45 = vsel %vm4167_vm11, %v4134_v53, %v4200_v15  ;;  %v3701_v6 = vadd.f32 %v3651_v38, %v3047_v60  ;;  %v2762_v5 = vadd.f32 %v2715_v12, %v5954_v8 }
 0x297   : > { %4264 = vst [vmem:[%s6185_s18 + $0x98] sm:$0xff] %v4232_v45 }
 0x298   : > { %v4099_v20 = vadd.f32 %v4049_v34, %v3701_v6  ;;  %v2999_v35 = vpop.f32.mrf.mxu2 }
 0x299   : > { %v3048_v58 = vadd.f32 %v2999_v35, %v2761_v57 }
 0x29a   : > { %v4135_v2 = vadd.f32 %v6462_v22, %v4099_v20 }
 0x29c   : > { %vm4168_vm12 = vcmp.ge.f32.partialorder %v4135_v2, 0.0  ;;  %v4201_v16 = vmul.f32 %v6159_v11, %v4135_v2  ;;  %v4051_v48 = vpop.f32.mrf.mxu0 }
 0x29d   : > { %v3653_v47 = vpop.f32.mrf.mxu3  ;;  %v2717_v44 = vpop.f32.mrf.mxu1 }
 0x29e   : > { %v4233_v0 = vsel %vm4168_vm12, %v4135_v2, %v4201_v16  ;;  %v3702_v56 = vadd.f32 %v3653_v47, %v3048_v58  ;;  %v2763_v24 = vadd.f32 %v2717_v44, %v5978_v27 }
 0x29f   : > { %4265 = vst [vmem:[%s6185_s18 + $0xa0] sm:$0xff] %v4233_v0 }
 0x2a0   : > { %v4100_v36 = vadd.f32 %v4051_v48, %v3702_v56  ;;  %v3002_v37 = vpop.f32.mrf.mxu2 }
 0x2a1   : > { %v3049_v28 = vadd.f32 %v3002_v37, %v2762_v5 }
 0x2a2   : > { %v4136_v40 = vadd.f32 %v6462_v22, %v4100_v36 }
 0x2a4   : > { %vm4169_vm13 = vcmp.ge.f32.partialorder %v4136_v40, 0.0  ;;  %v4202_v21 = vmul.f32 %v6159_v11, %v4136_v40  ;;  %v4054_v26 = vpop.f32.mrf.mxu0 }
 0x2a5   : > { %v3656_v1 = vpop.f32.mrf.mxu3  ;;  %v2720_v43 = vpop.f32.mrf.mxu1 }
 0x2a6   : > { %v4234_v32 = vsel %vm4169_vm13, %v4136_v40, %v4202_v21  ;;  %v3703_v10 = vadd.f32 %v3656_v1, %v3049_v28  ;;  %v2764_v46 = vadd.f32 %v2720_v43, %v5997_v63 }
 0x2a7   : > { %4266 = vst [vmem:[%s6185_s18 + $0xa8] sm:$0xff] %v4234_v32 }
 0x2a8   : > { %v4101_v51 = vadd.f32 %v4054_v26, %v3703_v10  ;;  %v3004_v4 = vpop.f32.mrf.mxu2 }
 0x2a9   : > { %v3050_v7 = vadd.f32 %v3004_v4, %v2763_v24 }
 0x2aa   : > { %v4137_v8 = vadd.f32 %v6462_v22, %v4101_v51 }
 0x2ac   : > { %vm4170_vm14 = vcmp.ge.f32.partialorder %v4137_v8, 0.0  ;;  %v4203_v9 = vmul.f32 %v6159_v11, %v4137_v8  ;;  %v4056_v13 = vpop.f32.mrf.mxu0 }
 0x2ad   : > { %v3658_v25 = vpop.f32.mrf.mxu3  ;;  %v2722_v18 = vpop.f32.mrf.mxu1 }
 0x2ae   : > { %v4235_v61 = vsel %vm4170_vm14, %v4137_v8, %v4203_v9  ;;  %v3704_v14 = vadd.f32 %v3658_v25, %v3050_v7  ;;  %v2765_v31 = vadd.f32 %v2722_v18, %v6021_v39 }
 0x2af   : > { %4267 = vst [vmem:[%s6185_s18 + $0xb0] sm:$0xff] %v4235_v61 }
 0x2b0   : > { %v4102_v19 = vadd.f32 %v4056_v13, %v3704_v14  ;;  %v3007_v33 = vpop.f32.mrf.mxu2 }
 0x2b1   : > { %v3051_v42 = vadd.f32 %v3007_v33, %v2764_v46 }
 0x2b2   : > { %v4138_v27 = vadd.f32 %v6462_v22, %v4102_v19 }
 0x2b4   : > { %vm4171_vm15 = vcmp.ge.f32.partialorder %v4138_v27, 0.0  ;;  %v4204_v62 = vmul.f32 %v6159_v11, %v4138_v27  ;;  %v4059_v55 = vpop.f32.mrf.mxu0 }
 0x2b5   : > { %v3661_v29 = vpop.f32.mrf.mxu3  ;;  %v2725_v17 = vpop.f32.mrf.mxu1 }
 0x2b6   : > { %v4236_v41 = vsel %vm4171_vm15, %v4138_v27, %v4204_v62  ;;  %v3705_v30 = vadd.f32 %v3661_v29, %v3051_v42  ;;  %v2766_v6 = vadd.f32 %v2725_v17, %v6040_v50  ;;  %v6540_v62 = vld [vmem:[#allocation5_spill] sm:$0xff] }
 0x2b7   : > { %4268 = vst [vmem:[%s6185_s18 + $0xb8] sm:$0xff] %v4236_v41 }
 0x2b8   : > { %v4103_v54 = vadd.f32 %v4059_v55, %v3705_v30  ;;  %v3009_v49 = vpop.f32.mrf.mxu2 }
 0x2b9   : > { %v3052_v52 = vadd.f32 %v3009_v49, %v2765_v31 }
 0x2ba   : > { %v4139_v63 = vadd.f32 %v6462_v22, %v4103_v54 }
 0x2bc   : > { %vm4172_vm0 = vcmp.ge.f32.partialorder %v4139_v63, 0.0  ;;  %v4205_v53 = vmul.f32 %v6159_v11, %v4139_v63  ;;  %v4061_v60 = vpop.f32.mrf.mxu0 }
 0x2bd   : > { %v3663_v15 = vpop.f32.mrf.mxu3  ;;  %v2727_v34 = vpop.f32.mrf.mxu1 }
 0x2be   : > { %v4237_v38 = vsel %vm4172_vm0, %v4139_v63, %v4205_v53  ;;  %v3706_v12 = vadd.f32 %v3663_v15, %v3052_v52  ;;  %v2767_v0 = vadd.f32 %v2727_v34, %v6064_v3  ;;  %v6541_v53 = vld [vmem:[#allocation6_spill] sm:$0xff] }
 0x2bf   : > { %4269 = vst [vmem:[%s6185_s18 + $0xc0] sm:$0xff] %v4237_v38 }
 0x2c0   : > { %v4104_v45 = vadd.f32 %v4061_v60, %v3706_v12  ;;  %v3012_v20 = vpop.f32.mrf.mxu2 }
 0x2c1   : > { %v3053_v57 = vadd.f32 %v3012_v20, %v2766_v6 }
 0x2c2   : > { %v4140_v39 = vadd.f32 %v6462_v22, %v4104_v45 }
 0x2c4   : > { %vm4173_vm1 = vcmp.ge.f32.partialorder %v4140_v39, 0.0  ;;  %v4206_v35 = vmul.f32 %v6159_v11, %v4140_v39  ;;  %v4064_v2 = vpop.f32.mrf.mxu0 }
 0x2c5   : > { %v3666_v58 = vpop.f32.mrf.mxu3  ;;  %v2730_v47 = vpop.f32.mrf.mxu1 }
 0x2c6   : > { %v4238_v16 = vsel %vm4173_vm1, %v4140_v39, %v4206_v35  ;;  %v3707_v48 = vadd.f32 %v3666_v58, %v3053_v57  ;;  %v2768_v1 = vadd.f32 %v2730_v47, %v6081_v23 }
 0x2c7   : > { %4270 = vst [vmem:[%s6185_s18 + $0xc8] sm:$0xff] %v4238_v16 }
 0x2c8   : > { %v4105_v44 = vadd.f32 %v4064_v2, %v3707_v48  ;;  %v3014_v56 = vpop.f32.mrf.mxu2 }
 0x2c9   : > { %v3054_v36 = vadd.f32 %v3014_v56, %v2767_v0 }
 0x2ca   : > { %v4141_v50 = vadd.f32 %v6462_v22, %v4105_v44 }
 0x2cc   : > { %vm4174_vm2 = vcmp.ge.f32.partialorder %v4141_v50, 0.0  ;;  %v4207_v5 = vmul.f32 %v6159_v11, %v4141_v50  ;;  %v4066_v37 = vpop.f32.mrf.mxu0 }
 0x2cd   : > { %v3668_v40 = vpop.f32.mrf.mxu3  ;;  %v2732_v32 = vpop.f32.mrf.mxu1 }
 0x2ce   : > { %v4239_v28 = vsel %vm4174_vm2, %v4141_v50, %v4207_v5  ;;  %v3708_v21 = vadd.f32 %v3668_v40, %v3054_v36  ;;  %v2769_v13 = vadd.f32 %v2732_v32, %v6104_v59 }
 0x2cf   : > { %4271 = vst [vmem:[%s6185_s18 + $0xd0] sm:$0xff] %v4239_v28 }
 0x2d0   : > { %v4106_v26 = vadd.f32 %v4066_v37, %v3708_v21  ;;  %v3017_v43 = vpop.f32.mrf.mxu2 }
 0x2d1   : > { %v3055_v10 = vadd.f32 %v3017_v43, %v2768_v1 }
 0x2d2   : > { %v4142_v3 = vadd.f32 %v6462_v22, %v4106_v26 }
 0x2d4   : > { %vm4175_vm5 = vcmp.ge.f32.partialorder %v4142_v3, 0.0  ;;  %v4208_v51 = vmul.f32 %v6159_v11, %v4142_v3  ;;  %v4069_v24 = vpop.f32.mrf.mxu0 }
 0x2d5   : > { %v3671_v4 = vpop.f32.mrf.mxu3  ;;  %v2735_v61 = vpop.f32.mrf.mxu1 }
 0x2d6   : > { %v4240_v8 = vsel %vm4175_vm5, %v4142_v3, %v4208_v51  ;;  %v3709_v7 = vadd.f32 %v3671_v4, %v3055_v10  ;;  %v2770_v55 = vadd.f32 %v2735_v61, %v6540_v62 }
 0x2d7   : > { %4272 = vst [vmem:[%s6185_s18 + $0xd8] sm:$0xff] %v4240_v8 }
 0x2d8   : > { %v4107_v9 = vadd.f32 %v4069_v24, %v3709_v7  ;;  %v3019_v25 = vpop.f32.mrf.mxu2 }
 0x2d9   : > { %v3056_v18 = vadd.f32 %v3019_v25, %v2769_v13 }
 0x2da   : > { %v4143_v23 = vadd.f32 %v6462_v22, %v4107_v9 }
 0x2dc   : > { %vm4176_vm6 = vcmp.ge.f32.partialorder %v4143_v23, 0.0  ;;  %v4209_v14 = vmul.f32 %v6159_v11, %v4143_v23  ;;  %v4071_v19 = vpop.f32.mrf.mxu0 }
 0x2dd   : > { %v3673_v46 = vpop.f32.mrf.mxu3  ;;  %v2737_v30 = vpop.f32.mrf.mxu1 }
 0x2de   : > { %v4241_v33 = vsel %vm4176_vm6, %v4143_v23, %v4209_v14  ;;  %v3710_v27 = vadd.f32 %v3673_v46, %v3056_v18  ;;  %v2771_v60 = vadd.f32 %v2737_v30, %v6541_v53 }
 0x2df   : > { %4273 = vst [vmem:[%s6185_s18 + $0xe0] sm:$0xff] %v4241_v33 }
 0x2e0   : > { %v4108_v42 = vadd.f32 %v4071_v19, %v3710_v27  ;;  %v3022_v29 = vpop.f32.mrf.mxu2 }
 0x2e1   : > { %v3057_v17 = vadd.f32 %v3022_v29, %v2770_v55 }
 0x2e2   : > { %v4144_v59 = vadd.f32 %v6462_v22, %v4108_v42 }
 0x2e4   : > { %vm4177_vm3 = vcmp.ge.f32.partialorder %v4144_v59, 0.0  ;;  %v4210_v41 = vmul.f32 %v6159_v11, %v4144_v59  ;;  %v4074_v54 = vpop.f32.mrf.mxu0 }
 0x2e5   : > { %v3676_v31 = vpop.f32.mrf.mxu3 }
 0x2e6   : > { %v4242_v49 = vsel %vm4177_vm3, %v4144_v59, %v4210_v41  ;;  %v3711_v63 = vadd.f32 %v3676_v31, %v3057_v17 }
 0x2e7   : > { %4274 = vst [vmem:[%s6185_s18 + $0xe8] sm:$0xff] %v4242_v49 }
 0x2e8   : > { %v4109_v52 = vadd.f32 %v4074_v54, %v3711_v63  ;;  %v3024_v15 = vpop.f32.mrf.mxu2 }
 0x2e9   : > { %v3058_v38 = vadd.f32 %v3024_v15, %v2771_v60 }
 0x2ea   : > { %v4145_v34 = vadd.f32 %v6462_v22, %v4109_v52 }
 0x2ec   : > { %vm4178_vm7 = vcmp.ge.f32.partialorder %v4145_v34, 0.0  ;;  %v4211_v12 = vmul.f32 %v6159_v11, %v4145_v34  ;;  %v4076_v39 = vpop.f32.mrf.mxu0 }
 0x2ed   : > { %v3678_v45 = vpop.f32.mrf.mxu3 }
 0x2ee   : > { %v4243_v6 = vsel %vm4178_vm7, %v4145_v34, %v4211_v12  ;;  %v3712_v20 = vadd.f32 %v3678_v45, %v3058_v38 }
 0x2ef   : > { %4275 = vst [vmem:[%s6185_s18 + $0xf0] sm:$0xff] %v4243_v6 }
 0x2f0   : > { %v4110_v57 = vadd.f32 %v4076_v39, %v3712_v20 }
 0x2f2   : > { %v4146_v35 = vadd.f32 %v6462_v22, %v4110_v57 }
 0x2f4   : > { %vm4179_vm4 = vcmp.ge.f32.partialorder %v4146_v35, 0.0  ;;  %v4212_v2 = vmul.f32 %v6159_v11, %v4146_v35 }
 0x2f6   : > { %v4244_v58 = vsel %vm4179_vm4, %v4146_v35, %v4212_v2 }
 0x2f7   : > { %4276 = vst [vmem:[%s6185_s18 + $0xf8] sm:$0xff] %v4244_v58 }
 0x2f8 PF: > { %s15_s17 = sadd.s32 1, %s5045_s17  }
 0x2f9   : > { %p12_p4 = scmp.ge.s32.totalorder %s15_s17, 4  }
 0x2fb   :  { %14 = sbr.rel (!%p12_p4) target bundleno = 2 (0x2), region = 76 }

</bundles_post_ra>
